<compile_context>
chip_gen: v7x
topology: tpu7x:2x2x1
jax: 0.10.0
libtpu: 0.0.40
codegen_flags: <defaults>
</compile_context>

<pallas_src>
import functools

import jax
import jax.numpy as jnp
from jax import lax
from jax.experimental import pallas as pl
from jax.experimental.pallas import tpu as pltpu


# ---------------------------------------------------------------------------
# Fused kernel: nb images per grid step; paired-row layout, lane-dense matmuls
# ---------------------------------------------------------------------------
def _hinet_up_block_kernel(x_ref, skip_ref, up_ref, m1u_ref, m1s_ref, m2_ref,
                           idu_ref, ids_ref, bup_ref, b1_ref, b2_ref, bid_ref,
                           o_ref, *, slope, rows_per_image):
    f32, bf16 = jnp.float32, jnp.bfloat16
    H = rows_per_image                      # paired rows per image (static)

    xb = x_ref[...].astype(bf16)            # (nb*H, W*Cin)
    sk = skip_ref[...].astype(f32)          # (nb*H, 2*W2*Cskip)  paired [even|odd]

    # --- ConvTranspose2d(k=2, s=2): ONE fused MXU matmul; in the paired-row
    #     layout the even/odd row interleave is a no-op. ---------------------
    x_up = jnp.dot(xb, up_ref[...], preferred_element_type=f32) + bup_ref[...]

    def shifted(v, direction):
        """v shifted by one paired row (+1: previous row, -1: next row) with
        per-image zero borders (conv zero padding + no contamination between
        the nb images stacked in this block).  Copy/VPU work only, no MXU."""
        z = jnp.zeros((1, v.shape[1]), v.dtype)
        r = lax.broadcasted_iota(jnp.int32, v.shape, 0) % H
        if direction > 0:                   # result[j] = v[j-1]
            return jnp.where(r == 0, 0.0,
                             jnp.concatenate([z, v[:-1]], axis=0))
        else:                               # result[j] = v[j+1]
            return jnp.where(r == H - 1, 0.0,
                             jnp.concatenate([v[1:], z], axis=0))

    def conv3x3(v, m_ref):
        """3x3 conv (padding=1) in the paired-row layout: vertical taps are the
        previous / current / next paired rows; horizontal taps + horizontal
        zero padding are folded into the banded block matrices m_ref[0..2]."""
        acc = jnp.dot(shifted(v, +1).astype(bf16), m_ref[0],
                      preferred_element_type=f32)
        acc = acc + jnp.dot(v.astype(bf16), m_ref[1],
                            preferred_element_type=f32)
        acc = acc + jnp.dot(shifted(v, -1).astype(bf16), m_ref[2],
                            preferred_element_type=f32)
        return acc

    # conv1 on the implicit concat([x_up, skip]) + LeakyReLU
    y = conv3x3(x_up, m1u_ref) + conv3x3(sk, m1s_ref) + b1_ref[...]
    y = jnp.where(y > 0, y, slope * y)

    # conv2 + LeakyReLU
    z = conv3x3(y, m2_ref) + b2_ref[...]
    z = jnp.where(z > 0, z, slope * z)

    # identity 1x1 conv on the implicit concat
    ident = (jnp.dot(x_up.astype(bf16), idu_ref[...], preferred_element_type=f32)
             + jnp.dot(sk.astype(bf16), ids_ref[...], preferred_element_type=f32)
             + bid_ref[...])

    o_ref[...] = (z + ident).astype(o_ref.dtype)   # lane-dense (nb*H, 2*W2*Cout)


# ---------------------------------------------------------------------------
# Host-side structured-weight construction (tiny, trace-time only)
# ---------------------------------------------------------------------------
def _prep_structured_weights(params, H, W, Cin, Cout, Cskip):
    W2 = 2 * W
    f32, bf16 = jnp.float32, jnp.bfloat16
    w_up = params["w_up"].astype(f32)             # (Cin, Cout, 2, 2) torch ConvT layout
    w1 = params["w1"].astype(f32)                 # (Cout, Cin, 3, 3)
    w2 = params["w2"].astype(f32)                 # (Cout, Cout, 3, 3)
    wid = params["wid"][:, :, 0, 0].astype(f32)   # (Cout, Cin)

    # Fused ConvTranspose2d matrix: (W*Cin) -> paired row [even | odd],
    # i.e. (W*Cin, 2*W2*Cout).  Column half kh holds output row 2h+kh.
    up = jnp.concatenate([
        jnp.kron(jnp.eye(W, dtype=f32),
                 jnp.transpose(w_up[:, :, kh, :], (0, 2, 1)).reshape(Cin, 2 * Cout))
        for kh in range(2)], axis=1)

    def banded(w_oihw, lo, hi, dh):
        """Horizontal taps + horizontal zero padding for vertical tap dh, as a
        banded (W2*Cb, W2*Cout) matrix acting on one (un-paired) image row."""
        cb = hi - lo
        m = jnp.zeros((W2 * cb, W2 * Cout), f32)
        for dw in range(3):
            blk = jnp.transpose(w_oihw[:, lo:hi, dh, dw])        # (Cb, Cout)
            m = m + jnp.kron(jnp.eye(W2, k=1 - dw, dtype=f32), blk)
        return m

    def paired_conv_mats(w_oihw, lo, hi):
        """(3, 2*W2*Cb, 2*W2*Cout) [prev, center, next] paired-row matrices.
        Row blocks = [even_in, odd_in]; column blocks = [even_out, odd_out]."""
        B0 = banded(w_oihw, lo, hi, 0)    # vertical tap using input row p-1
        B1 = banded(w_oihw, lo, hi, 1)    # input row p
        B2 = banded(w_oihw, lo, hi, 2)    # input row p+1
        Z = jnp.zeros_like(B0)
        blk = lambda a, b, c, d: jnp.concatenate(
            [jnp.concatenate([a, b], axis=1),
             jnp.concatenate([c, d], axis=1)], axis=0)
        m_prev = blk(Z, Z, B0, Z)      # odd row of previous pair -> even out (dh=0)
        m_center = blk(B1, B0, B2, B1)
        m_next = blk(Z, B2, Z, Z)      # even row of next pair -> odd out (dh=2)
        return jnp.stack([m_prev, m_center, m_next]).astype(bf16)

    M1u = paired_conv_mats(w1, 0, Cout)       # conv1, x_up half of the concat
    M1s = paired_conv_mats(w1, Cout, Cin)     # conv1, skip half of the concat
    M2 = paired_conv_mats(w2, 0, Cout)        # conv2

    IDu = jnp.kron(jnp.eye(2 * W2, dtype=f32),
                   jnp.transpose(wid[:, :Cout])).astype(bf16)
    IDs = jnp.kron(jnp.eye(2 * W2, dtype=f32),
                   jnp.transpose(wid[:, Cout:])).astype(bf16)

    tile2 = lambda b: jnp.tile(b.astype(f32), 2 * W2)[None, :]   # (1, 2*W2*Cout)
    return (up.astype(bf16), M1u, M1s, M2, IDu, IDs,
            tile2(params["b_up"]), tile2(params["b1"]),
            tile2(params["b2"]), tile2(params["bid"]))


# ---------------------------------------------------------------------------
# Wrapper (NCHW module boundary <-> paired lane-dense row layout)
# ---------------------------------------------------------------------------
def hinet_up_block(x_nchw, skip_nchw, params, slope=0.2, images_per_step=8):
    N, Cin, H, W = x_nchw.shape
    Cout = params["b_up"].shape[0]
    Cskip = skip_nchw.shape[1]
    assert Cout + Cskip == Cin, "concat must feed HINetConvBlock(in_channels=Cin)"
    H2, W2 = 2 * H, 2 * W

    # nb images per grid step; keep grid >= 2 so v7x's 2nd TensorCore gets work.
    nb = max(1, min(images_per_step, N // 2 if N >= 2 else 1))
    while N % nb:
        nb -= 1
    assert nb == N or (nb * H) % 8 == 0, "row block must be sublane aligned"
    grid = (N // nb,)

    # Boundary layout plumbing only (free host reshapes handled by XLA):
    #   x:    rows x (W*Cin), channels minor
    #   skip: paired rows -- rows (2h, 2h+1) side by side -> (N*H, 2*W2*Cskip)
    x_rows = jnp.transpose(x_nchw, (0, 2, 3, 1)).reshape(N * H, W * Cin)
    skip_pair = jnp.transpose(skip_nchw, (0, 2, 3, 1)).reshape(N * H, 2 * W2 * Cskip)

    weights = _prep_structured_weights(params, H, W, Cin, Cout, Cskip)

    def _const_spec(a):
        nd = a.ndim
        return pl.BlockSpec(a.shape, lambda g, _z=(0,) * nd: _z)

    out_pair = pl.pallas_call(
        functools.partial(_hinet_up_block_kernel, slope=slope, rows_per_image=H),
        out_shape=jax.ShapeDtypeStruct((N * H, 2 * W2 * Cout), jnp.float32),
        grid=grid,
        in_specs=[
            pl.BlockSpec((nb * H, W * Cin), lambda g: (g, 0)),
            pl.BlockSpec((nb * H, 2 * W2 * Cskip), lambda g: (g, 0)),
        ] + [_const_spec(w) for w in weights],
        out_specs=pl.BlockSpec((nb * H, 2 * W2 * Cout), lambda g: (g, 0)),
        compiler_params=pltpu.CompilerParams(
            dimension_semantics=("parallel",)),
    )(x_rows, skip_pair, *weights)

    # paired rows -> NCHW
    return jnp.transpose(out_pair.reshape(N, H2, W2, Cout), (0, 3, 1, 2))


# ---------------------------------------------------------------------------
# Pure-JAX reference (mirrors PyTorch semantics, NCHW) for verification.
# ---------------------------------------------------------------------------
def reference(x_nchw, skip_nchw, p, slope):
    dn = ("NCHW", "OIHW", "NCHW")
    prec = lax.Precision.HIGHEST
    # ConvTranspose2d(k=2,s=2) == lhs-dilated conv with flipped, transposed kernel
    w_up_conv = jnp.transpose(p["w_up"][:, :, ::-1, ::-1], (1, 0, 2, 3))
    x_up = lax.conv_general_dilated(x_nchw, w_up_conv, (1, 1), ((1, 1), (1, 1)),
                                    lhs_dilation=(2, 2), dimension_numbers=dn,
                                    precision=prec)
    x_up = x_up + p["b_up"][None, :, None, None]
    y = jnp.concatenate([x_up, skip_nchw], axis=1)
    h = lax.conv_general_dilated(y, p["w1"], (1, 1), ((1, 1), (1, 1)),
                                 dimension_numbers=dn, precision=prec)
    h = h + p["b1"][None, :, None, None]
    h = jnp.where(h > 0, h, slope * h)
    h = lax.conv_general_dilated(h, p["w2"], (1, 1), ((1, 1), (1, 1)),
                                 dimension_numbers=dn, precision=prec)
    h = h + p["b2"][None, :, None, None]
    h = jnp.where(h > 0, h, slope * h)
    ident = lax.conv_general_dilated(y, p["wid"], (1, 1), ((0, 0), (0, 0)),
                                     dimension_numbers=dn, precision=prec)
    ident = ident + p["bid"][None, :, None, None]
    return h + ident


if __name__ == "__main__":
    # in_channels=16, out_channels=8; 16 images so the batched grid (nb=8) has
    # two "parallel" steps (keeps both v7x TensorCores busy).
    N, Cin, Cout, H, W = 16, 16, 8, 8, 8
    slope = 0.2

    key = jax.random.PRNGKey(0)
    ks = jax.random.split(key, 10)
    params = {
        "w_up": 0.1 * jax.random.normal(ks[0], (Cin, Cout, 2, 2), jnp.float32),
        "b_up": 0.1 * jax.random.normal(ks[1], (Cout,), jnp.float32),
        "w1":   0.1 * jax.random.normal(ks[2], (Cout, Cin, 3, 3), jnp.float32),
        "b1":   0.1 * jax.random.normal(ks[3], (Cout,), jnp.float32),
        "w2":   0.1 * jax.random.normal(ks[4], (Cout, Cout, 3, 3), jnp.float32),
        "b2":   0.1 * jax.random.normal(ks[5], (Cout,), jnp.float32),
        "wid":  0.1 * jax.random.normal(ks[6], (Cout, Cin, 1, 1), jnp.float32),
        "bid":  0.1 * jax.random.normal(ks[7], (Cout,), jnp.float32),
    }
    x = jax.random.normal(ks[8], (N, Cin, H, W), jnp.float32)
    skip = jax.random.normal(ks[9], (N, Cin - Cout, 2 * H, 2 * W), jnp.float32)

    out = hinet_up_block(x, skip, params, slope)
    out = jax.block_until_ready(out)

    ref = reference(x, skip, params, slope)
    assert out.shape == (N, Cout, 2 * H, 2 * W), out.shape
    max_err = float(jnp.max(jnp.abs(out - ref)))
    mean_err = float(jnp.mean(jnp.abs(out - ref)))
    # bf16 matmul operands vs. f32 HIGHEST-precision reference
    assert max_err < 5e-2 and mean_err < 5e-3, (max_err, mean_err)

    print("KERNEL_OK")
</pallas_src>

<mosaic_0001>
module attributes {stable_mosaic.version = 11 : i64} {
  func.func @_hinet_up_block_kernel(%arg0: i32, %arg1: memref<64x128xf32, #tpu.memory_space<vmem>>, %arg2: memref<64x256xf32, #tpu.memory_space<vmem>>, %arg3: memref<128x256xbf16, #tpu.memory_space<vmem>>, %arg4: memref<3x256x256xbf16, #tpu.memory_space<vmem>>, %arg5: memref<3x256x256xbf16, #tpu.memory_space<vmem>>, %arg6: memref<3x256x256xbf16, #tpu.memory_space<vmem>>, %arg7: memref<256x256xbf16, #tpu.memory_space<vmem>>, %arg8: memref<256x256xbf16, #tpu.memory_space<vmem>>, %arg9: memref<1x256xf32, #tpu.memory_space<vmem>>, %arg10: memref<1x256xf32, #tpu.memory_space<vmem>>, %arg11: memref<1x256xf32, #tpu.memory_space<vmem>>, %arg12: memref<1x256xf32, #tpu.memory_space<vmem>>, %arg13: memref<64x256xf32, #tpu.memory_space<vmem>>) attributes {dimension_semantics = [#tpu.dimension_semantics<parallel>], iteration_bounds = array<i64: 2>, scalar_prefetch = 0 : i64, scratch_operands = 0 : i64, tpu.core_type = #tpu.core_type<tc>, window_params = [{transform_indices = @transform_0, window_bounds = array<i64: 64, 128>}, {transform_indices = @transform_1, window_bounds = array<i64: 64, 256>}, {pipeline_mode = #tpu.pipeline_mode<synchronous>, transform_indices = @transform_2, window_bounds = array<i64: 128, 256>}, {pipeline_mode = #tpu.pipeline_mode<synchronous>, transform_indices = @transform_3, window_bounds = array<i64: 3, 256, 256>}, {pipeline_mode = #tpu.pipeline_mode<synchronous>, transform_indices = @transform_4, window_bounds = array<i64: 3, 256, 256>}, {pipeline_mode = #tpu.pipeline_mode<synchronous>, transform_indices = @transform_5, window_bounds = array<i64: 3, 256, 256>}, {pipeline_mode = #tpu.pipeline_mode<synchronous>, transform_indices = @transform_6, window_bounds = array<i64: 256, 256>}, {pipeline_mode = #tpu.pipeline_mode<synchronous>, transform_indices = @transform_7, window_bounds = array<i64: 256, 256>}, {pipeline_mode = #tpu.pipeline_mode<synchronous>, transform_indices = @transform_8, window_bounds = array<i64: 1, 256>}, {pipeline_mode = #tpu.pipeline_mode<synchronous>, transform_indices = @transform_9, window_bounds = array<i64: 1, 256>}, {pipeline_mode = #tpu.pipeline_mode<synchronous>, transform_indices = @transform_10, window_bounds = array<i64: 1, 256>}, {pipeline_mode = #tpu.pipeline_mode<synchronous>, transform_indices = @transform_11, window_bounds = array<i64: 1, 256>}, {transform_indices = @transform_12, window_bounds = array<i64: 64, 256>}]} {
    %c0 = arith.constant 0 : index
    %c0_0 = arith.constant 0 : index
    %0 = vector.load %arg1[%c0, %c0_0] : memref<64x128xf32, #tpu.memory_space<vmem>>, vector<64x128xf32>
    %1 = arith.truncf %0 : vector<64x128xf32> to vector<64x128xbf16>
    %c0_1 = arith.constant 0 : index
    %c0_2 = arith.constant 0 : index
    %2 = vector.load %arg2[%c0_1, %c0_2] : memref<64x256xf32, #tpu.memory_space<vmem>>, vector<64x256xf32>
    %c0_3 = arith.constant 0 : index
    %c0_4 = arith.constant 0 : index
    %3 = vector.load %arg3[%c0_3, %c0_4] : memref<128x256xbf16, #tpu.memory_space<vmem>>, vector<128x256xbf16>
    %cst = arith.constant dense<0.000000e+00> : vector<64x256xf32>
    %4 = tpu.matmul %1, %3, %cst {dimension_numbers = #tpu.dot_dimension_numbers<[1], [0], [0], [1], [0, 0, 1, 1], [], []>} : vector<64x128xbf16>, vector<128x256xbf16>, vector<64x256xf32> -> vector<64x256xf32>
    %c0_5 = arith.constant 0 : index
    %c0_6 = arith.constant 0 : index
    %5 = vector.load %arg9[%c0_5, %c0_6] : memref<1x256xf32, #tpu.memory_space<vmem>>, vector<1x256xf32>
    %6 = vector.broadcast %5 : vector<1x256xf32> to vector<64x256xf32>
    %7 = arith.addf %4, %6 : vector<64x256xf32>
    %cst_7 = arith.constant 0.000000e+00 : f32
    %8 = vector.broadcast %cst_7 : f32 to vector<1x256xf32>
    %9 = tpu.iota {dimensions = array<i32: 0>} : vector<64x256xi32>
    %c8_i32 = arith.constant 8 : i32
    %c0_i32 = arith.constant 0 : i32
    %10 = arith.cmpi eq, %c8_i32, %c0_i32 : i32
    %c1_i32 = arith.constant 1 : i32
    %11 = arith.select %10, %c1_i32, %c8_i32 : i32
    %12 = vector.broadcast %11 : i32 to vector<64x256xi32>
    %13 = arith.remsi %9, %12 : vector<64x256xi32>
    %c0_i32_8 = arith.constant 0 : i32
    %14 = vector.broadcast %c0_i32_8 : i32 to vector<64x256xi32>
    %15 = arith.cmpi ne, %13, %14 : vector<64x256xi32>
    %c0_i32_9 = arith.constant 0 : i32
    %16 = vector.broadcast %c0_i32_9 : i32 to vector<64x256xi32>
    %17 = arith.cmpi slt, %13, %16 : vector<64x256xi32>
    %c0_i32_10 = arith.constant 0 : i32
    %18 = arith.cmpi slt, %11, %c0_i32_10 : i32
    %19 = vector.broadcast %18 : i1 to vector<64x256xi1>
    %20 = vector.broadcast %19 : vector<64x256xi1> to vector<64x256xi1>
    %21 = arith.xori %17, %20 : vector<64x256xi1>
    %22 = arith.andi %21, %15 : vector<64x256xi1>
    %23 = vector.broadcast %11 : i32 to vector<64x256xi32>
    %24 = arith.addi %13, %23 : vector<64x256xi32>
    %25 = arith.select %22, %24, %13 : vector<64x256xi1>, vector<64x256xi32>
    %c0_i32_11 = arith.constant 0 : i32
    %26 = vector.broadcast %c0_i32_11 : i32 to vector<64x256xi32>
    %27 = arith.cmpi eq, %25, %26 : vector<64x256xi32>
    %28 = vector.extract_strided_slice %7 {offsets = [0, 0], sizes = [63, 256], strides = [1, 1]} : vector<64x256xf32> to vector<63x256xf32>
    %29 = tpu.concatenate %8, %28 in 0 : vector<1x256xf32>, vector<63x256xf32> -> vector<64x256xf32>
    %cst_12 = arith.constant 0.000000e+00 : f32
    %30 = vector.broadcast %cst_12 : f32 to vector<64x256xf32>
    %31 = arith.select %27, %30, %29 : vector<64x256xi1>, vector<64x256xf32>
    %32 = arith.truncf %31 : vector<64x256xf32> to vector<64x256xbf16>
    %c0_13 = arith.constant 0 : index
    %c0_14 = arith.constant 0 : index
    %c0_15 = arith.constant 0 : index
    %33 = vector.load %arg4[%c0_13, %c0_14, %c0_15] : memref<3x256x256xbf16, #tpu.memory_space<vmem>>, vector<1x256x256xbf16>
    %34 = vector.shape_cast %33 : vector<1x256x256xbf16> to vector<256x256xbf16>
    %cst_16 = arith.constant dense<0.000000e+00> : vector<64x256xf32>
    %35 = tpu.matmul %32, %34, %cst_16 {dimension_numbers = #tpu.dot_dimension_numbers<[1], [0], [0], [1], [0, 0, 1, 1], [], []>} : vector<64x256xbf16>, vector<256x256xbf16>, vector<64x256xf32> -> vector<64x256xf32>
    %36 = arith.truncf %7 : vector<64x256xf32> to vector<64x256xbf16>
    %c1 = arith.constant 1 : index
    %c0_17 = arith.constant 0 : index
    %c0_18 = arith.constant 0 : index
    %37 = vector.load %arg4[%c1, %c0_17, %c0_18] : memref<3x256x256xbf16, #tpu.memory_space<vmem>>, vector<1x256x256xbf16>
    %38 = vector.shape_cast %37 : vector<1x256x256xbf16> to vector<256x256xbf16>
    %cst_19 = arith.constant dense<0.000000e+00> : vector<64x256xf32>
    %39 = tpu.matmul %36, %38, %cst_19 {dimension_numbers = #tpu.dot_dimension_numbers<[1], [0], [0], [1], [0, 0, 1, 1], [], []>} : vector<64x256xbf16>, vector<256x256xbf16>, vector<64x256xf32> -> vector<64x256xf32>
    %40 = arith.addf %35, %39 : vector<64x256xf32>
    %cst_20 = arith.constant 0.000000e+00 : f32
    %41 = vector.broadcast %cst_20 : f32 to vector<1x256xf32>
    %42 = tpu.iota {dimensions = array<i32: 0>} : vector<64x256xi32>
    %c8_i32_21 = arith.constant 8 : i32
    %c0_i32_22 = arith.constant 0 : i32
    %43 = arith.cmpi eq, %c8_i32_21, %c0_i32_22 : i32
    %c1_i32_23 = arith.constant 1 : i32
    %44 = arith.select %43, %c1_i32_23, %c8_i32_21 : i32
    %45 = vector.broadcast %44 : i32 to vector<64x256xi32>
    %46 = arith.remsi %42, %45 : vector<64x256xi32>
    %c0_i32_24 = arith.constant 0 : i32
    %47 = vector.broadcast %c0_i32_24 : i32 to vector<64x256xi32>
    %48 = arith.cmpi ne, %46, %47 : vector<64x256xi32>
    %c0_i32_25 = arith.constant 0 : i32
    %49 = vector.broadcast %c0_i32_25 : i32 to vector<64x256xi32>
    %50 = arith.cmpi slt, %46, %49 : vector<64x256xi32>
    %c0_i32_26 = arith.constant 0 : i32
    %51 = arith.cmpi slt, %44, %c0_i32_26 : i32
    %52 = vector.broadcast %51 : i1 to vector<64x256xi1>
    %53 = vector.broadcast %52 : vector<64x256xi1> to vector<64x256xi1>
    %54 = arith.xori %50, %53 : vector<64x256xi1>
    %55 = arith.andi %54, %48 : vector<64x256xi1>
    %56 = vector.broadcast %44 : i32 to vector<64x256xi32>
    %57 = arith.addi %46, %56 : vector<64x256xi32>
    %58 = arith.select %55, %57, %46 : vector<64x256xi1>, vector<64x256xi32>
    %c7_i32 = arith.constant 7 : i32
    %59 = vector.broadcast %c7_i32 : i32 to vector<64x256xi32>
    %60 = arith.cmpi eq, %58, %59 : vector<64x256xi32>
    %61 = vector.extract_strided_slice %7 {offsets = [1, 0], sizes = [63, 256], strides = [1, 1]} : vector<64x256xf32> to vector<63x256xf32>
    %62 = tpu.concatenate %61, %41 in 0 : vector<63x256xf32>, vector<1x256xf32> -> vector<64x256xf32>
    %cst_27 = arith.constant 0.000000e+00 : f32
    %63 = vector.broadcast %cst_27 : f32 to vector<64x256xf32>
    %64 = arith.select %60, %63, %62 : vector<64x256xi1>, vector<64x256xf32>
    %65 = arith.truncf %64 : vector<64x256xf32> to vector<64x256xbf16>
    %c2 = arith.constant 2 : index
    %c0_28 = arith.constant 0 : index
    %c0_29 = arith.constant 0 : index
    %66 = vector.load %arg4[%c2, %c0_28, %c0_29] : memref<3x256x256xbf16, #tpu.memory_space<vmem>>, vector<1x256x256xbf16>
    %67 = vector.shape_cast %66 : vector<1x256x256xbf16> to vector<256x256xbf16>
    %cst_30 = arith.constant dense<0.000000e+00> : vector<64x256xf32>
    %68 = tpu.matmul %65, %67, %cst_30 {dimension_numbers = #tpu.dot_dimension_numbers<[1], [0], [0], [1], [0, 0, 1, 1], [], []>} : vector<64x256xbf16>, vector<256x256xbf16>, vector<64x256xf32> -> vector<64x256xf32>
    %69 = arith.addf %40, %68 : vector<64x256xf32>
    %cst_31 = arith.constant 0.000000e+00 : f32
    %70 = vector.broadcast %cst_31 : f32 to vector<1x256xf32>
    %71 = tpu.iota {dimensions = array<i32: 0>} : vector<64x256xi32>
    %c8_i32_32 = arith.constant 8 : i32
    %c0_i32_33 = arith.constant 0 : i32
    %72 = arith.cmpi eq, %c8_i32_32, %c0_i32_33 : i32
    %c1_i32_34 = arith.constant 1 : i32
    %73 = arith.select %72, %c1_i32_34, %c8_i32_32 : i32
    %74 = vector.broadcast %73 : i32 to vector<64x256xi32>
    %75 = arith.remsi %71, %74 : vector<64x256xi32>
    %c0_i32_35 = arith.constant 0 : i32
    %76 = vector.broadcast %c0_i32_35 : i32 to vector<64x256xi32>
    %77 = arith.cmpi ne, %75, %76 : vector<64x256xi32>
    %c0_i32_36 = arith.constant 0 : i32
    %78 = vector.broadcast %c0_i32_36 : i32 to vector<64x256xi32>
    %79 = arith.cmpi slt, %75, %78 : vector<64x256xi32>
    %c0_i32_37 = arith.constant 0 : i32
    %80 = arith.cmpi slt, %73, %c0_i32_37 : i32
    %81 = vector.broadcast %80 : i1 to vector<64x256xi1>
    %82 = vector.broadcast %81 : vector<64x256xi1> to vector<64x256xi1>
    %83 = arith.xori %79, %82 : vector<64x256xi1>
    %84 = arith.andi %83, %77 : vector<64x256xi1>
    %85 = vector.broadcast %73 : i32 to vector<64x256xi32>
    %86 = arith.addi %75, %85 : vector<64x256xi32>
    %87 = arith.select %84, %86, %75 : vector<64x256xi1>, vector<64x256xi32>
    %c0_i32_38 = arith.constant 0 : i32
    %88 = vector.broadcast %c0_i32_38 : i32 to vector<64x256xi32>
    %89 = arith.cmpi eq, %87, %88 : vector<64x256xi32>
    %90 = vector.extract_strided_slice %2 {offsets = [0, 0], sizes = [63, 256], strides = [1, 1]} : vector<64x256xf32> to vector<63x256xf32>
    %91 = tpu.concatenate %70, %90 in 0 : vector<1x256xf32>, vector<63x256xf32> -> vector<64x256xf32>
    %cst_39 = arith.constant 0.000000e+00 : f32
    %92 = vector.broadcast %cst_39 : f32 to vector<64x256xf32>
    %93 = arith.select %89, %92, %91 : vector<64x256xi1>, vector<64x256xf32>
    %94 = arith.truncf %93 : vector<64x256xf32> to vector<64x256xbf16>
    %c0_40 = arith.constant 0 : index
    %c0_41 = arith.constant 0 : index
    %c0_42 = arith.constant 0 : index
    %95 = vector.load %arg5[%c0_40, %c0_41, %c0_42] : memref<3x256x256xbf16, #tpu.memory_space<vmem>>, vector<1x256x256xbf16>
    %96 = vector.shape_cast %95 : vector<1x256x256xbf16> to vector<256x256xbf16>
    %cst_43 = arith.constant dense<0.000000e+00> : vector<64x256xf32>
    %97 = tpu.matmul %94, %96, %cst_43 {dimension_numbers = #tpu.dot_dimension_numbers<[1], [0], [0], [1], [0, 0, 1, 1], [], []>} : vector<64x256xbf16>, vector<256x256xbf16>, vector<64x256xf32> -> vector<64x256xf32>
    %98 = arith.truncf %2 : vector<64x256xf32> to vector<64x256xbf16>
    %c1_44 = arith.constant 1 : index
    %c0_45 = arith.constant 0 : index
    %c0_46 = arith.constant 0 : index
    %99 = vector.load %arg5[%c1_44, %c0_45, %c0_46] : memref<3x256x256xbf16, #tpu.memory_space<vmem>>, vector<1x256x256xbf16>
    %100 = vector.shape_cast %99 : vector<1x256x256xbf16> to vector<256x256xbf16>
    %cst_47 = arith.constant dense<0.000000e+00> : vector<64x256xf32>
    %101 = tpu.matmul %98, %100, %cst_47 {dimension_numbers = #tpu.dot_dimension_numbers<[1], [0], [0], [1], [0, 0, 1, 1], [], []>} : vector<64x256xbf16>, vector<256x256xbf16>, vector<64x256xf32> -> vector<64x256xf32>
    %102 = arith.addf %97, %101 : vector<64x256xf32>
    %cst_48 = arith.constant 0.000000e+00 : f32
    %103 = vector.broadcast %cst_48 : f32 to vector<1x256xf32>
    %104 = tpu.iota {dimensions = array<i32: 0>} : vector<64x256xi32>
    %c8_i32_49 = arith.constant 8 : i32
    %c0_i32_50 = arith.constant 0 : i32
    %105 = arith.cmpi eq, %c8_i32_49, %c0_i32_50 : i32
    %c1_i32_51 = arith.constant 1 : i32
    %106 = arith.select %105, %c1_i32_51, %c8_i32_49 : i32
    %107 = vector.broadcast %106 : i32 to vector<64x256xi32>
    %108 = arith.remsi %104, %107 : vector<64x256xi32>
    %c0_i32_52 = arith.constant 0 : i32
    %109 = vector.broadcast %c0_i32_52 : i32 to vector<64x256xi32>
    %110 = arith.cmpi ne, %108, %109 : vector<64x256xi32>
    %c0_i32_53 = arith.constant 0 : i32
    %111 = vector.broadcast %c0_i32_53 : i32 to vector<64x256xi32>
    %112 = arith.cmpi slt, %108, %111 : vector<64x256xi32>
    %c0_i32_54 = arith.constant 0 : i32
    %113 = arith.cmpi slt, %106, %c0_i32_54 : i32
    %114 = vector.broadcast %113 : i1 to vector<64x256xi1>
    %115 = vector.broadcast %114 : vector<64x256xi1> to vector<64x256xi1>
    %116 = arith.xori %112, %115 : vector<64x256xi1>
    %117 = arith.andi %116, %110 : vector<64x256xi1>
    %118 = vector.broadcast %106 : i32 to vector<64x256xi32>
    %119 = arith.addi %108, %118 : vector<64x256xi32>
    %120 = arith.select %117, %119, %108 : vector<64x256xi1>, vector<64x256xi32>
    %c7_i32_55 = arith.constant 7 : i32
    %121 = vector.broadcast %c7_i32_55 : i32 to vector<64x256xi32>
    %122 = arith.cmpi eq, %120, %121 : vector<64x256xi32>
    %123 = vector.extract_strided_slice %2 {offsets = [1, 0], sizes = [63, 256], strides = [1, 1]} : vector<64x256xf32> to vector<63x256xf32>
    %124 = tpu.concatenate %123, %103 in 0 : vector<63x256xf32>, vector<1x256xf32> -> vector<64x256xf32>
    %cst_56 = arith.constant 0.000000e+00 : f32
    %125 = vector.broadcast %cst_56 : f32 to vector<64x256xf32>
    %126 = arith.select %122, %125, %124 : vector<64x256xi1>, vector<64x256xf32>
    %127 = arith.truncf %126 : vector<64x256xf32> to vector<64x256xbf16>
    %c2_57 = arith.constant 2 : index
    %c0_58 = arith.constant 0 : index
    %c0_59 = arith.constant 0 : index
    %128 = vector.load %arg5[%c2_57, %c0_58, %c0_59] : memref<3x256x256xbf16, #tpu.memory_space<vmem>>, vector<1x256x256xbf16>
    %129 = vector.shape_cast %128 : vector<1x256x256xbf16> to vector<256x256xbf16>
    %cst_60 = arith.constant dense<0.000000e+00> : vector<64x256xf32>
    %130 = tpu.matmul %127, %129, %cst_60 {dimension_numbers = #tpu.dot_dimension_numbers<[1], [0], [0], [1], [0, 0, 1, 1], [], []>} : vector<64x256xbf16>, vector<256x256xbf16>, vector<64x256xf32> -> vector<64x256xf32>
    %131 = arith.addf %102, %130 : vector<64x256xf32>
    %132 = arith.addf %69, %131 : vector<64x256xf32>
    %c0_61 = arith.constant 0 : index
    %c0_62 = arith.constant 0 : index
    %133 = vector.load %arg10[%c0_61, %c0_62] : memref<1x256xf32, #tpu.memory_space<vmem>>, vector<1x256xf32>
    %134 = vector.broadcast %133 : vector<1x256xf32> to vector<64x256xf32>
    %135 = arith.addf %132, %134 : vector<64x256xf32>
    %cst_63 = arith.constant 0.000000e+00 : f32
    %136 = vector.broadcast %cst_63 : f32 to vector<64x256xf32>
    %137 = arith.cmpf ogt, %135, %136 : vector<64x256xf32>
    %cst_64 = arith.constant 2.000000e-01 : f32
    %138 = vector.broadcast %cst_64 : f32 to vector<64x256xf32>
    %139 = arith.mulf %138, %135 : vector<64x256xf32>
    %140 = arith.select %137, %135, %139 : vector<64x256xi1>, vector<64x256xf32>
    %cst_65 = arith.constant 0.000000e+00 : f32
    %141 = vector.broadcast %cst_65 : f32 to vector<1x256xf32>
    %142 = tpu.iota {dimensions = array<i32: 0>} : vector<64x256xi32>
    %c8_i32_66 = arith.constant 8 : i32
    %c0_i32_67 = arith.constant 0 : i32
    %143 = arith.cmpi eq, %c8_i32_66, %c0_i32_67 : i32
    %c1_i32_68 = arith.constant 1 : i32
    %144 = arith.select %143, %c1_i32_68, %c8_i32_66 : i32
    %145 = vector.broadcast %144 : i32 to vector<64x256xi32>
    %146 = arith.remsi %142, %145 : vector<64x256xi32>
    %c0_i32_69 = arith.constant 0 : i32
    %147 = vector.broadcast %c0_i32_69 : i32 to vector<64x256xi32>
    %148 = arith.cmpi ne, %146, %147 : vector<64x256xi32>
    %c0_i32_70 = arith.constant 0 : i32
    %149 = vector.broadcast %c0_i32_70 : i32 to vector<64x256xi32>
    %150 = arith.cmpi slt, %146, %149 : vector<64x256xi32>
    %c0_i32_71 = arith.constant 0 : i32
    %151 = arith.cmpi slt, %144, %c0_i32_71 : i32
    %152 = vector.broadcast %151 : i1 to vector<64x256xi1>
    %153 = vector.broadcast %152 : vector<64x256xi1> to vector<64x256xi1>
    %154 = arith.xori %150, %153 : vector<64x256xi1>
    %155 = arith.andi %154, %148 : vector<64x256xi1>
    %156 = vector.broadcast %144 : i32 to vector<64x256xi32>
    %157 = arith.addi %146, %156 : vector<64x256xi32>
    %158 = arith.select %155, %157, %146 : vector<64x256xi1>, vector<64x256xi32>
    %c0_i32_72 = arith.constant 0 : i32
    %159 = vector.broadcast %c0_i32_72 : i32 to vector<64x256xi32>
    %160 = arith.cmpi eq, %158, %159 : vector<64x256xi32>
    %161 = vector.extract_strided_slice %140 {offsets = [0, 0], sizes = [63, 256], strides = [1, 1]} : vector<64x256xf32> to vector<63x256xf32>
    %162 = tpu.concatenate %141, %161 in 0 : vector<1x256xf32>, vector<63x256xf32> -> vector<64x256xf32>
    %cst_73 = arith.constant 0.000000e+00 : f32
    %163 = vector.broadcast %cst_73 : f32 to vector<64x256xf32>
    %164 = arith.select %160, %163, %162 : vector<64x256xi1>, vector<64x256xf32>
    %165 = arith.truncf %164 : vector<64x256xf32> to vector<64x256xbf16>
    %c0_74 = arith.constant 0 : index
    %c0_75 = arith.constant 0 : index
    %c0_76 = arith.constant 0 : index
    %166 = vector.load %arg6[%c0_74, %c0_75, %c0_76] : memref<3x256x256xbf16, #tpu.memory_space<vmem>>, vector<1x256x256xbf16>
    %167 = vector.shape_cast %166 : vector<1x256x256xbf16> to vector<256x256xbf16>
    %cst_77 = arith.constant dense<0.000000e+00> : vector<64x256xf32>
    %168 = tpu.matmul %165, %167, %cst_77 {dimension_numbers = #tpu.dot_dimension_numbers<[1], [0], [0], [1], [0, 0, 1, 1], [], []>} : vector<64x256xbf16>, vector<256x256xbf16>, vector<64x256xf32> -> vector<64x256xf32>
    %169 = arith.truncf %140 : vector<64x256xf32> to vector<64x256xbf16>
    %c1_78 = arith.constant 1 : index
    %c0_79 = arith.constant 0 : index
    %c0_80 = arith.constant 0 : index
    %170 = vector.load %arg6[%c1_78, %c0_79, %c0_80] : memref<3x256x256xbf16, #tpu.memory_space<vmem>>, vector<1x256x256xbf16>
    %171 = vector.shape_cast %170 : vector<1x256x256xbf16> to vector<256x256xbf16>
    %cst_81 = arith.constant dense<0.000000e+00> : vector<64x256xf32>
    %172 = tpu.matmul %169, %171, %cst_81 {dimension_numbers = #tpu.dot_dimension_numbers<[1], [0], [0], [1], [0, 0, 1, 1], [], []>} : vector<64x256xbf16>, vector<256x256xbf16>, vector<64x256xf32> -> vector<64x256xf32>
    %173 = arith.addf %168, %172 : vector<64x256xf32>
    %cst_82 = arith.constant 0.000000e+00 : f32
    %174 = vector.broadcast %cst_82 : f32 to vector<1x256xf32>
    %175 = tpu.iota {dimensions = array<i32: 0>} : vector<64x256xi32>
    %c8_i32_83 = arith.constant 8 : i32
    %c0_i32_84 = arith.constant 0 : i32
    %176 = arith.cmpi eq, %c8_i32_83, %c0_i32_84 : i32
    %c1_i32_85 = arith.constant 1 : i32
    %177 = arith.select %176, %c1_i32_85, %c8_i32_83 : i32
    %178 = vector.broadcast %177 : i32 to vector<64x256xi32>
    %179 = arith.remsi %175, %178 : vector<64x256xi32>
    %c0_i32_86 = arith.constant 0 : i32
    %180 = vector.broadcast %c0_i32_86 : i32 to vector<64x256xi32>
    %181 = arith.cmpi ne, %179, %180 : vector<64x256xi32>
    %c0_i32_87 = arith.constant 0 : i32
    %182 = vector.broadcast %c0_i32_87 : i32 to vector<64x256xi32>
    %183 = arith.cmpi slt, %179, %182 : vector<64x256xi32>
    %c0_i32_88 = arith.constant 0 : i32
    %184 = arith.cmpi slt, %177, %c0_i32_88 : i32
    %185 = vector.broadcast %184 : i1 to vector<64x256xi1>
    %186 = vector.broadcast %185 : vector<64x256xi1> to vector<64x256xi1>
    %187 = arith.xori %183, %186 : vector<64x256xi1>
    %188 = arith.andi %187, %181 : vector<64x256xi1>
    %189 = vector.broadcast %177 : i32 to vector<64x256xi32>
    %190 = arith.addi %179, %189 : vector<64x256xi32>
    %191 = arith.select %188, %190, %179 : vector<64x256xi1>, vector<64x256xi32>
    %c7_i32_89 = arith.constant 7 : i32
    %192 = vector.broadcast %c7_i32_89 : i32 to vector<64x256xi32>
    %193 = arith.cmpi eq, %191, %192 : vector<64x256xi32>
    %194 = vector.extract_strided_slice %140 {offsets = [1, 0], sizes = [63, 256], strides = [1, 1]} : vector<64x256xf32> to vector<63x256xf32>
    %195 = tpu.concatenate %194, %174 in 0 : vector<63x256xf32>, vector<1x256xf32> -> vector<64x256xf32>
    %cst_90 = arith.constant 0.000000e+00 : f32
    %196 = vector.broadcast %cst_90 : f32 to vector<64x256xf32>
    %197 = arith.select %193, %196, %195 : vector<64x256xi1>, vector<64x256xf32>
    %198 = arith.truncf %197 : vector<64x256xf32> to vector<64x256xbf16>
    %c2_91 = arith.constant 2 : index
    %c0_92 = arith.constant 0 : index
    %c0_93 = arith.constant 0 : index
    %199 = vector.load %arg6[%c2_91, %c0_92, %c0_93] : memref<3x256x256xbf16, #tpu.memory_space<vmem>>, vector<1x256x256xbf16>
    %200 = vector.shape_cast %199 : vector<1x256x256xbf16> to vector<256x256xbf16>
    %cst_94 = arith.constant dense<0.000000e+00> : vector<64x256xf32>
    %201 = tpu.matmul %198, %200, %cst_94 {dimension_numbers = #tpu.dot_dimension_numbers<[1], [0], [0], [1], [0, 0, 1, 1], [], []>} : vector<64x256xbf16>, vector<256x256xbf16>, vector<64x256xf32> -> vector<64x256xf32>
    %202 = arith.addf %173, %201 : vector<64x256xf32>
    %c0_95 = arith.constant 0 : index
    %c0_96 = arith.constant 0 : index
    %203 = vector.load %arg11[%c0_95, %c0_96] : memref<1x256xf32, #tpu.memory_space<vmem>>, vector<1x256xf32>
    %204 = vector.broadcast %203 : vector<1x256xf32> to vector<64x256xf32>
    %205 = arith.addf %202, %204 : vector<64x256xf32>
    %cst_97 = arith.constant 0.000000e+00 : f32
    %206 = vector.broadcast %cst_97 : f32 to vector<64x256xf32>
    %207 = arith.cmpf ogt, %205, %206 : vector<64x256xf32>
    %cst_98 = arith.constant 2.000000e-01 : f32
    %208 = vector.broadcast %cst_98 : f32 to vector<64x256xf32>
    %209 = arith.mulf %208, %205 : vector<64x256xf32>
    %210 = arith.select %207, %205, %209 : vector<64x256xi1>, vector<64x256xf32>
    %211 = arith.truncf %7 : vector<64x256xf32> to vector<64x256xbf16>
    %c0_99 = arith.constant 0 : index
    %c0_100 = arith.constant 0 : index
    %212 = vector.load %arg7[%c0_99, %c0_100] : memref<256x256xbf16, #tpu.memory_space<vmem>>, vector<256x256xbf16>
    %cst_101 = arith.constant dense<0.000000e+00> : vector<64x256xf32>
    %213 = tpu.matmul %211, %212, %cst_101 {dimension_numbers = #tpu.dot_dimension_numbers<[1], [0], [0], [1], [0, 0, 1, 1], [], []>} : vector<64x256xbf16>, vector<256x256xbf16>, vector<64x256xf32> -> vector<64x256xf32>
    %214 = arith.truncf %2 : vector<64x256xf32> to vector<64x256xbf16>
    %c0_102 = arith.constant 0 : index
    %c0_103 = arith.constant 0 : index
    %215 = vector.load %arg8[%c0_102, %c0_103] : memref<256x256xbf16, #tpu.memory_space<vmem>>, vector<256x256xbf16>
    %cst_104 = arith.constant dense<0.000000e+00> : vector<64x256xf32>
    %216 = tpu.matmul %214, %215, %cst_104 {dimension_numbers = #tpu.dot_dimension_numbers<[1], [0], [0], [1], [0, 0, 1, 1], [], []>} : vector<64x256xbf16>, vector<256x256xbf16>, vector<64x256xf32> -> vector<64x256xf32>
    %217 = arith.addf %213, %216 : vector<64x256xf32>
    %c0_105 = arith.constant 0 : index
    %c0_106 = arith.constant 0 : index
    %218 = vector.load %arg12[%c0_105, %c0_106] : memref<1x256xf32, #tpu.memory_space<vmem>>, vector<1x256xf32>
    %219 = vector.broadcast %218 : vector<1x256xf32> to vector<64x256xf32>
    %220 = arith.addf %217, %219 : vector<64x256xf32>
    %221 = arith.addf %210, %220 : vector<64x256xf32>
    %c0_107 = arith.constant 0 : index
    %c0_108 = arith.constant 0 : index
    %222 = vector.load %arg13[%c0_107, %c0_108] : memref<64x256xf32, #tpu.memory_space<vmem>>, vector<64x256xf32>
    tpu.vector_store %arg13[%c0_107, %c0_108], %221 {strides = array<i32>} : memref<64x256xf32, #tpu.memory_space<vmem>>, vector<64x256xf32>,
    return
  }
  func.func @transform_0(%arg0: i32) -> (i32, i32) {
    %c0_i32 = arith.constant 0 : i32
    %c0_i32_0 = arith.constant 0 : i32
    return %arg0, %c0_i32 : i32, i32
  }
  func.func @transform_1(%arg0: i32) -> (i32, i32) {
    %c0_i32 = arith.constant 0 : i32
    %c0_i32_0 = arith.constant 0 : i32
    return %arg0, %c0_i32 : i32, i32
  }
  func.func @transform_2(%arg0: i32) -> (i32, i32) {
    %c0_i32 = arith.constant 0 : i32
    %c0_i32_0 = arith.constant 0 : i32
    %c0_i32_1 = arith.constant 0 : i32
    return %c0_i32, %c0_i32_0 : i32, i32
  }
  func.func @transform_3(%arg0: i32) -> (i32, i32, i32) {
    %c0_i32 = arith.constant 0 : i32
    %c0_i32_0 = arith.constant 0 : i32
    %c0_i32_1 = arith.constant 0 : i32
    %c0_i32_2 = arith.constant 0 : i32
    return %c0_i32, %c0_i32_0, %c0_i32_1 : i32, i32, i32
  }
  func.func @transform_4(%arg0: i32) -> (i32, i32, i32) {
    %c0_i32 = arith.constant 0 : i32
    %c0_i32_0 = arith.constant 0 : i32
    %c0_i32_1 = arith.constant 0 : i32
    %c0_i32_2 = arith.constant 0 : i32
    return %c0_i32, %c0_i32_0, %c0_i32_1 : i32, i32, i32
  }
  func.func @transform_5(%arg0: i32) -> (i32, i32, i32) {
    %c0_i32 = arith.constant 0 : i32
    %c0_i32_0 = arith.constant 0 : i32
    %c0_i32_1 = arith.constant 0 : i32
    %c0_i32_2 = arith.constant 0 : i32
    return %c0_i32, %c0_i32_0, %c0_i32_1 : i32, i32, i32
  }
  func.func @transform_6(%arg0: i32) -> (i32, i32) {
    %c0_i32 = arith.constant 0 : i32
    %c0_i32_0 = arith.constant 0 : i32
    %c0_i32_1 = arith.constant 0 : i32
    return %c0_i32, %c0_i32_0 : i32, i32
  }
  func.func @transform_7(%arg0: i32) -> (i32, i32) {
    %c0_i32 = arith.constant 0 : i32
    %c0_i32_0 = arith.constant 0 : i32
    %c0_i32_1 = arith.constant 0 : i32
    return %c0_i32, %c0_i32_0 : i32, i32
  }
  func.func @transform_8(%arg0: i32) -> (i32, i32) {
    %c0_i32 = arith.constant 0 : i32
    %c0_i32_0 = arith.constant 0 : i32
    %c0_i32_1 = arith.constant 0 : i32
    return %c0_i32, %c0_i32_0 : i32, i32
  }
  func.func @transform_9(%arg0: i32) -> (i32, i32) {
    %c0_i32 = arith.constant 0 : i32
    %c0_i32_0 = arith.constant 0 : i32
    %c0_i32_1 = arith.constant 0 : i32
    return %c0_i32, %c0_i32_0 : i32, i32
  }
  func.func @transform_10(%arg0: i32) -> (i32, i32) {
    %c0_i32 = arith.constant 0 : i32
    %c0_i32_0 = arith.constant 0 : i32
    %c0_i32_1 = arith.constant 0 : i32
    return %c0_i32, %c0_i32_0 : i32, i32
  }
  func.func @transform_11(%arg0: i32) -> (i32, i32) {
    %c0_i32 = arith.constant 0 : i32
    %c0_i32_0 = arith.constant 0 : i32
    %c0_i32_1 = arith.constant 0 : i32
    return %c0_i32, %c0_i32_0 : i32, i32
  }
  func.func @transform_12(%arg0: i32) -> (i32, i32) {
    %c0_i32 = arith.constant 0 : i32
    %c0_i32_0 = arith.constant 0 : i32
    return %arg0, %c0_i32 : i32, i32
  }
}

</mosaic_0001>

<bundles_post_ra>
// kernel: tpu_custom_call.1
= control target key start
LH: loop header
LB: loop body
LE: loop exit
PB: predicated region body
PF: predicated region fallthrough
CT: control target
= control target key end

     0   :  { %s8143_s0 = inlined_call_operand.hbm [shape: f32[128,128], index: 0, kind: input, shape index: {}]   ;;  %s8144_s1 = inlined_call_operand.hbm [shape: f32[128,256], index: 1, kind: input, shape index: {}]   ;;  %s8145_s2 = inlined_call_operand.hbm [shape: bf16[128,256], index: 2, kind: input, shape index: {}]   ;;  %s8146_s3 = inlined_call_operand.hbm [shape: bf16[3,256,256], index: 3, kind: input, shape index: {}]   ;;  %s8147_s4 = inlined_call_operand.hbm [shape: bf16[3,256,256], index: 4, kind: input, shape index: {}]   ;;  %s8148_s5 = inlined_call_operand.hbm [shape: bf16[3,256,256], index: 5, kind: input, shape index: {}]   ;;  %s8149_s6 = inlined_call_operand.hbm [shape: bf16[256,256], index: 6, kind: input, shape index: {}]   ;;  %s8150_s7 = inlined_call_operand.hbm [shape: bf16[256,256], index: 7, kind: input, shape index: {}]   ;;  %s8151_s8 = inlined_call_operand.vmem [shape: f32[1,256], index: 8, kind: input, shape index: {}]   ;;  %s8152_s9 = inlined_call_operand.vmem [shape: f32[1,256], index: 9, kind: input, shape index: {}]   ;;  %s8153_s10 = inlined_call_operand.vmem [shape: f32[1,256], index: 10, kind: input, shape index: {}]   ;;  %s8154_s11 = inlined_call_operand.vmem [shape: f32[1,256], index: 11, kind: input, shape index: {}]   ;;  %s8155_s12 = inlined_call_operand.hbm [shape: f32[128,256], index: 12, kind: output, shape index: {}]  }
   0x1   :  { %8185 = sst [smem:[#allocation36_spill]] %s8143_s0 }
   0x2   :  { %8186 = sst [smem:[#allocation37_spill]] %s8145_s2 }
   0x3   :  { %8187 = sst [smem:[#allocation38_spill]] %s8146_s3 }
   0x4   :  { %8188 = sst [smem:[#allocation39_spill]] %s8147_s4 }
   0x5   :  { %8189 = sst [smem:[#allocation40_spill]] %s8148_s5 }
   0x6   :  { %8190 = sst [smem:[#allocation41_spill]] %s8149_s6 }
   0x7   :  { %8191 = sst [smem:[#allocation42_spill]] %s8152_s9 }
   0x8   :  { %8192 = sst [smem:[#allocation43_spill]] %s8153_s10 }
   0x9   :  { %8193 = sst [smem:[#allocation44_spill]] %s8154_s11 }
   0xa   :  { %8194 = sst [smem:[#allocation45_spill]] %s8155_s12 }
   0xb   :  { %17 = vsyncpa [#allocation3], 0 }
   0xc   :  { %19 = vsyncpa [#allocation3 + $0x1], 0 }
   0xd   :  { %20 = vsyncpa [#allocation6], 0 }
   0xe   :  { %22 = vsyncpa [#allocation6 + $0x1], 0 }
   0xf   :  { %23 = vsyncpa [#allocation9], 0 }
  0x10   :  { %24 = vsyncpa [#allocation12], 0 }
  0x11   :  { %25 = vsyncpa [#allocation15], 0 }
  0x12   :  { %26 = vsyncpa [#allocation4], 0 }
  0x13   :  { %28 = vsyncpa [#allocation4 + $0x1], 0  ;;  %s6622_s21 = smov 0   ;;  %s6624_s22 = smov 0  }
  0x14   :  { %s6626_s23 = smov 0   ;;  %s6628_s24 = smov 0  }
  0x15 LB: > { %s6541_s25 = smov [#allocation7]   ;;  %s6643_s27 = sadd.s32 4294967295, %s6539_s24   ;;  %s6539_s24 = sphi %s6628_s24, %s8322_s24   ;;  %s6535_s23 = sphi %s6626_s23, %s8321_s23   ;;  %s6531_s22 = sphi %s6624_s22, %s8320_s22   ;;  %s6527_s21 = sphi %s6622_s21, %s8319_s21  }
  0x16   : > { %s339_s26 = sshll.u32 %s6541_s25, 4  ;;  %p4766_p0 = scmp.ge.s32.totalorder %s6539_s24, 1  ;;  %s6648_s26 = int_to_ptr.vmem [resolvable:$true] %s339_s26 }
  0x17   : > { %p8157_p1 = scmp.eq.s32.totalorder %s6643_s27, 0  ;;  %p327_p2 = scmp.lt.s32.totalorder %s6539_s24, 3 }
  0x18   : > { %s6542_s29 = smov [#allocation8]   ;;  %s6543_s14 = smov [#allocation11]  }
  0x19   : > { %p6650_p3 = pnand %p4766_p0, %p327_p2  ;;  %s352_s30 = sshll.u32 %s6542_s29, 4  ;;  %s6663_s30 = int_to_ptr.vmem [resolvable:$true] %s352_s30 }
  0x1a   : > { %s378_s15 = sshll.u32 %s6543_s14, 4  ;;  %s8197_s2 = sld [smem:[#allocation37_spill]]  ;;  %s6665_s15 = int_to_ptr.vmem [resolvable:$true] %s378_s15 }
  0x1b   : > { %s8195_s28 = scalar_select %p6650_p3, 1, 0 }
  0x1c   : > { %p5584_p5 = pneg %p6650_p3 }
  0x1e   : > { %p6659_p6 = pnand %p5584_p5, %p8157_p1 }
  0x20   : > { %s6225_s18 = scalar_lea.hbm %s8197_s2, 2048  ;;  %p6675_p8 = pneg %p6659_p6 }
  0x21   : > { %p6226_p7 = scmp.ne.s32.totalorder %s8197_s2, %s6225_s18  ;;  %p6232_p11 = scmp.lt.u32.totalorder %s6225_s18, %s8197_s2 }
  0x23   : > { %p6228_p9 = pnand %p6675_p8, %p6226_p7 }
  0x25   : > { %p6229_p10 = pneg %p6228_p9 }
  0x27   : > { %p6234_p12 = pnand %p6232_p11, %p6229_p10 }
  0x29   : > { %6237 = shalt.err (!%p6234_p12)
}
  0x2a   : > { %s6238_s16 = scalar_lea.vmem %s6648_s26, 2048  ;;  %p6246_p5 = scmp.lt.s32.totalorder %s6648_s26, %s6648_s26 }
  0x2b   : > { %p6239_p13 = scmp.ne.s32.totalorder %s6648_s26, %s6238_s16  ;;  %p6247_p4 = scmp.lt.s32.totalorder %s6238_s16, %s6238_s16 }
  0x2d   : > { %p6241_p0 = pnand %p6239_p13, %p6675_p8  ;;  %p6248_p7 = por %p6247_p4, %p6246_p5 }
  0x2f   : > { %p6242_p2 = pneg %p6241_p0 }
  0x31   : > { %p6249_p9 = pnand %p6248_p7, %p6242_p2 }
  0x33   : > { %6252 = shalt.err (!%p6249_p9)
}
  0x34   : > { %s8159_s17 = smov 128   ;;  %s8160_s18 = smov 8  }
  0x35   : > { %5587 = dma.hbm_to_vmem [thread:$0]  (!%p6659_p6), %s8197_s2, 2048, %s6648_s26, [#allocation6], %s8159_s17, %s8159_s17, %s8160_s18  }
  0x36   : > { %s8199_s3 = sld [smem:[#allocation38_spill]] }
  0x3c   : > { %s6253_s16 = scalar_lea.hbm %s8199_s3, 12288 }
  0x3d   : > { %p6254_p4 = scmp.ne.s32.totalorder %s8199_s3, %s6253_s16  ;;  %p6260_p12 = scmp.lt.u32.totalorder %s6253_s16, %s8199_s3 }
  0x3f   : > { %p6256_p10 = pnand %p6254_p4, %p6675_p8 }
  0x41   : > { %p6257_p11 = pneg %p6256_p10 }
  0x43   : > { %p6262_p13 = pnand %p6260_p12, %p6257_p11 }
  0x45   : > { %6265 = shalt.err (!%p6262_p13)
}
  0x46   : > { %s6266_s26 = scalar_lea.vmem %s6663_s30, 12288  ;;  %p6274_p7 = scmp.lt.s32.totalorder %s6663_s30, %s6663_s30 }
  0x47   : > { %p6267_p0 = scmp.ne.s32.totalorder %s6663_s30, %s6266_s26  ;;  %p6275_p9 = scmp.lt.s32.totalorder %s6266_s26, %s6266_s26 }
  0x49   : > { %p6269_p2 = pnand %p6267_p0, %p6675_p8  ;;  %p6276_p4 = por %p6275_p9, %p6274_p7 }
  0x4b   : > { %p6270_p5 = pneg %p6269_p2 }
  0x4d   : > { %p6277_p10 = pnand %p6276_p4, %p6270_p5 }
  0x4f   : > { %6280 = shalt.err (!%p6277_p10)
}
  0x50   : > { %5590 = dma.hbm_to_vmem [thread:$0]  (!%p6659_p6), %s8199_s3, 12288, %s6663_s30, [#allocation9], %s8159_s17, %s8159_s17, %s8160_s18  }
  0x51   : > { %s8200_s5 = sld [smem:[#allocation40_spill]] }
  0x57   : > { %s6281_s19 = scalar_lea.hbm %s8200_s5, 12288 }
  0x58   : > { %p6282_p11 = scmp.ne.s32.totalorder %s8200_s5, %s6281_s19  ;;  %p6288_p0 = scmp.lt.u32.totalorder %s6281_s19, %s8200_s5 }
  0x5a   : > { %p6284_p12 = pnand %p6282_p11, %p6675_p8 }
  0x5c   : > { %p6285_p13 = pneg %p6284_p12 }
  0x5e   : > { %p6290_p2 = pnand %p6288_p0, %p6285_p13 }
  0x60   : > { %6293 = shalt.err (!%p6290_p2)
}
  0x61   : > { %s6294_s30 = scalar_lea.vmem %s6665_s15, 12288  ;;  %p6302_p4 = scmp.lt.s32.totalorder %s6665_s15, %s6665_s15 }
  0x62   : > { %p6295_p5 = scmp.ne.s32.totalorder %s6665_s15, %s6294_s30  ;;  %p6303_p10 = scmp.lt.s32.totalorder %s6294_s30, %s6294_s30 }
  0x64   : > { %p6297_p7 = pnand %p6295_p5, %p6675_p8  ;;  %p6304_p11 = por %p6303_p10, %p6302_p4 }
  0x66   : > { %p6298_p9 = pneg %p6297_p7 }
  0x68   : > { %p6305_p12 = pnand %p6304_p11, %p6298_p9 }
  0x6a   : > { %6308 = shalt.err (!%p6305_p12)
}
  0x6b   : > { %5596 = dma.hbm_to_vmem [thread:$0]  (!%p6659_p6), %s8200_s5, 12288, %s6665_s15, [#allocation12], %s8159_s17, %s8159_s17, %s8160_s18  }
  0x6c   : > { %s6546_s10 = smov [#allocation10]   ;;  %s6547_s12 = smov [#allocation13]  }
  0x6d   : > { %s365_s11 = sshll.u32 %s6546_s10, 4  ;;  %s391_s19 = sshll.u32 %s6547_s12, 4  ;;  %s366_s11 = int_to_ptr.vmem [resolvable:$true] %s365_s11  ;;  %s392_s19 = int_to_ptr.vmem [resolvable:$true] %s391_s19 }
  0x6e   : > { %s8201_s4 = sld [smem:[#allocation39_spill]] }
  0x74   : > { %s6309_s14 = scalar_lea.hbm %s8201_s4, 12288 }
  0x75   : > { %p6310_p13 = scmp.ne.s32.totalorder %s8201_s4, %s6309_s14  ;;  %p6316_p5 = scmp.lt.u32.totalorder %s6309_s14, %s8201_s4 }
  0x77   : > { %p6312_p0 = pnand %p6310_p13, %p6675_p8 }
  0x79   : > { %p6313_p2 = pneg %p6312_p0 }
  0x7b   : > { %p6318_p7 = pnand %p6316_p5, %p6313_p2 }
  0x7d   : > { %6321 = shalt.err (!%p6318_p7)
}
  0x7e   : > { %s6322_s15 = scalar_lea.vmem %s366_s11, 12288  ;;  %p6330_p11 = scmp.lt.s32.totalorder %s366_s11, %s366_s11 }
  0x7f   : > { %p6323_p9 = scmp.ne.s32.totalorder %s366_s11, %s6322_s15  ;;  %p6331_p12 = scmp.lt.s32.totalorder %s6322_s15, %s6322_s15 }
  0x81   : > { %p6325_p4 = pnand %p6323_p9, %p6675_p8  ;;  %p6332_p1 = por %p6331_p12, %p6330_p11 }
  0x83   : > { %p6326_p10 = pneg %p6325_p4 }
  0x85   : > { %p6333_p3 = pnand %p6332_p1, %p6326_p10 }
  0x87   : > { %6336 = shalt.err (!%p6333_p3)
}
  0x88   : > { %5593 = dma.hbm_to_vmem [thread:$0]  (!%p6659_p6), %s8201_s4, 12288, %s366_s11, [#allocation9], %s8159_s17, %s8159_s17, %s8160_s18  }
  0x89   : > { %s8202_s6 = sld [smem:[#allocation41_spill]] }
  0x8f   : > { %s6337_s20 = scalar_lea.hbm %s8202_s6, 4096 }
  0x90   : > { %p6338_p1 = scmp.ne.s32.totalorder %s8202_s6, %s6337_s20  ;;  %p6344_p0 = scmp.lt.u32.totalorder %s6337_s20, %s8202_s6 }
  0x92   : > { %p6340_p3 = pnand %p6338_p1, %p6675_p8 }
  0x94   : > { %p6341_p13 = pneg %p6340_p3 }
  0x96   : > { %p6346_p2 = pnand %p6344_p0, %p6341_p13 }
  0x98   : > { %6349 = shalt.err (!%p6346_p2)
}
  0x99   : > { %s6350_s26 = scalar_lea.vmem %s392_s19, 4096  ;;  %p6358_p4 = scmp.lt.s32.totalorder %s392_s19, %s392_s19 }
  0x9a   : > { %p6351_p5 = scmp.ne.s32.totalorder %s392_s19, %s6350_s26  ;;  %p6359_p10 = scmp.lt.s32.totalorder %s6350_s26, %s6350_s26 }
  0x9c   : > { %p6353_p7 = pnand %p6351_p5, %p6675_p8  ;;  %p6360_p11 = por %p6359_p10, %p6358_p4 }
  0x9e   : > { %p6354_p9 = pneg %p6353_p7 }
  0xa0   : > { %p6361_p12 = pnand %p6360_p11, %p6354_p9 }
  0xa2   : > { %6364 = shalt.err (!%p6361_p12)
}
  0xa3   : > { %5599 = dma.hbm_to_vmem [thread:$0]  (!%p6659_p6), %s8202_s6, 4096, %s392_s19, [#allocation12], %s8159_s17, %s8159_s17, %s8160_s18  }
  0xa4   : > { %s6548_s2 = smov [#allocation14]   ;;  %s6365_s20 = scalar_lea.hbm %s8150_s7, 4096 }
  0xa5   : > { %s404_s9 = sshll.u32 %s6548_s2, 4  ;;  %p6366_p1 = scmp.ne.s32.totalorder %s8150_s7, %s6365_s20  ;;  %s405_s9 = int_to_ptr.vmem [resolvable:$true] %s404_s9 }
  0xa6   : > { %p6372_p0 = scmp.lt.u32.totalorder %s6365_s20, %s8150_s7 }
  0xa7   : > { %p6368_p3 = pnand %p6366_p1, %p6675_p8 }
  0xa9   : > { %p6369_p13 = pneg %p6368_p3 }
  0xab   : > { %p6374_p2 = pnand %p6372_p0, %p6369_p13 }
  0xad   : > { %6377 = shalt.err (!%p6374_p2)
}
  0xae   : > { %s6378_s19 = scalar_lea.vmem %s405_s9, 4096  ;;  %p6386_p4 = scmp.lt.s32.totalorder %s405_s9, %s405_s9 }
  0xaf   : > { %p6379_p5 = scmp.ne.s32.totalorder %s405_s9, %s6378_s19  ;;  %p6387_p10 = scmp.lt.s32.totalorder %s6378_s19, %s6378_s19 }
  0xb1   : > { %p6381_p7 = pnand %p6379_p5, %p6675_p8  ;;  %p6388_p11 = por %p6387_p10, %p6386_p4 }
  0xb3   : > { %p6382_p9 = pneg %p6381_p7 }
  0xb5   : > { %p6389_p12 = pnand %p6388_p11, %p6382_p9 }
  0xb7   : > { %6392 = shalt.err (!%p6389_p12)
}
  0xb8   : > { %5602 = dma.hbm_to_vmem [thread:$0]  (!%p6659_p6), %s8150_s7, 4096, %s405_s9, [#allocation15], %s8159_s17, %s8159_s17, %s8160_s18  }
  0xb9   : > { %s4765_s13 = sadd.s32 4294967294, %s6539_s24   ;;  %s6816_s25 = sadd.s32 1, %s6539_s24  }
  0xba   : > { %s38_s15 = ssub.s32 %s6539_s24, %s6816_s25  ;;  %s41_s2 = sadd.s32 1, %s6535_s23 }
  0xbb   : > { %p39_p8 = scmp.eq.s32.totalorder %s38_s15, 0  ;;  %p48_p1 = scmp.ne.s32.totalorder %s6535_s23, %s6531_s22 }
  0xbc   : > { %p49_p3 = scmp.eq.s32.totalorder %s6539_s24, 0  ;;  %p54_p13 = scmp.ne.s32.totalorder %s6531_s22, %s6527_s21 }
  0xbd   : > { %s6827_s10 = scalar_select %p39_p8, %s6535_s23, %s41_s2  }
  0xbe   : > { %p6829_p0 = por %p49_p3, %p48_p1  ;;  %p8204_p2 = scmp.eq.s32.totalorder %s6643_s27, 0 }
  0xbf   : > { %p314_p5 = scmp.eq.s32.totalorder %s6643_s27, 1  ;;  %p320_p7 = scmp.eq.s32.totalorder %s4765_s13, 1 }
  0xc0   : > { %p6835_p6 = por %p8204_p2, %p54_p13  ;;  %p5620_p9 = scmp.lt.s32.totalorder %s6539_s24, 2 }
  0xc1   : > { %s6842_s20 = sand.u32 1, %s6535_s23   ;;  %p6844_p4 = por %p314_p5, %p48_p1 }
  0xc2   : > { %p6848_p10 = por %p320_p7, %p54_p13  ;;  %s4774_s16 = sshll.u32 %s6842_s20, 6 }
  0xc3   : > { %s8206_s29 = scalar_select %p6844_p4, 1, 0 }
  0xc4   : > { %s8207_s14 = scalar_select %p6848_p10, 1, 0 }
  0xc5   : > { %s5405_s30 = sshll.u32 %s6539_s24, 10  ;;  %s8208_s0 = sld [smem:[#allocation36_spill]] }
  0xc6   : > { %s434_s13 = scalar_lea.vmem [#allocation2], %s4774_s16  ;;  %p6863_p11 = pnand %p5620_p9, %p6829_p0 }
  0xc7   : > { %s441_s15 = sshll.u32 %s434_s13, 4  ;;  %s4777_s18 = sshll.u32 %s6842_s20, 7  ;;  %s6859_s15 = int_to_ptr.vmem [resolvable:$true] %s441_s15 }
  0xc8   : > { %s431_s19 = scalar_lea.sflag [#allocation3], %s6842_s20  ;;  %p6395_p8 = pneg %p6863_p11 }
  0xcb   : > { %s6857_s11 = scalar_lea.hbm %s8208_s0, %s5405_s30  ;;  %s6398_s12 = scalar_lea.hbm %s8208_s0, 2048 }
  0xcc   : > { %s6393_s30 = scalar_lea.hbm %s6857_s11, 1024  ;;  %p6399_p13 = scmp.lt.u32.totalorder %s6857_s11, %s8208_s0 }
  0xcd   : > { %p6394_p12 = scmp.ne.s32.totalorder %s6857_s11, %s6393_s30  ;;  %p6400_p0 = scmp.lt.u32.totalorder %s6398_s12, %s6393_s30 }
  0xce   : > { %p6402_p5 = scmp.lt.u32.totalorder %s6393_s30, %s6857_s11 }
  0xcf   : > { %p6396_p1 = pnand %p6395_p8, %p6394_p12  ;;  %p6401_p2 = por %p6400_p0, %p6399_p13 }
  0xd1   : > { %p6397_p3 = pneg %p6396_p1  ;;  %p6403_p7 = por %p6402_p5, %p6401_p2 }
  0xd3   : > { %p6404_p9 = pnand %p6403_p7, %p6397_p3 }
  0xd5   : > { %6407 = shalt.err (!%p6404_p9)
}
  0xd6   : > { %s6408_s17 = scalar_lea.vmem %s6859_s15, 1024  ;;  %s6549_s16 = smov [#allocation2]  }
  0xd7   : > { %p6409_p12 = scmp.ne.s32.totalorder %s6859_s15, %s6408_s17  ;;  %s6413_s26 = sshll.u32 %s6549_s16, 4  ;;  %s6414_s26 = int_to_ptr.vmem [resolvable:$false] %s6413_s26 }
  0xd8   : > { %s6415_s3 = scalar_lea.vmem %s6414_s26, 2048  ;;  %p6416_p4 = scmp.lt.s32.totalorder %s6859_s15, %s6414_s26 }
  0xd9   : > { %p6411_p1 = pnand %p6409_p12, %p6395_p8  ;;  %p6417_p13 = scmp.lt.s32.totalorder %s6415_s3, %s6408_s17 }
  0xdb   : > { %p6412_p10 = pneg %p6411_p1  ;;  %p6418_p0 = por %p6417_p13, %p6416_p4 }
  0xdd   : > { %p6419_p2 = pnand %p6418_p0, %p6412_p10 }
  0xdf   : > { %6422 = shalt.err (!%p6419_p2)
}
  0xe0   : > { %s8210_s30 = smov 8   ;;  %s8211_s12 = smov 128  }
  0xe1   : > { %5606 = dma.hbm_to_vmem [thread:$0]  (!%p6863_p11), %s6857_s11, 1024, %s6859_s15, %s431_s19, %s8211_s12, %s8211_s12, %s8210_s30  }
  0xe2   : > { %s5407_s13 = sshll.u32 %s6539_s24, 11  ;;  %s455_s3 = scalar_lea.vmem [#allocation5], %s4777_s18 }
  0xe3   : > { %s6904_s26 = scalar_lea.hbm %s8144_s1, %s5407_s13  ;;  %s463_s0 = sshll.u32 %s455_s3, 4  ;;  %s6908_s0 = int_to_ptr.vmem [resolvable:$true] %s463_s0 }
  0xe4   : > { %s8212_s4 = sand.u32 1, %s6539_s24   ;;  %s6423_s6 = scalar_lea.hbm %s6904_s26, 2048 }
  0xe5   : > { %s6912_s5 = scalar_lea.sflag [#allocation6], %s8212_s4  ;;  %p6424_p4 = scmp.ne.s32.totalorder %s6904_s26, %s6423_s6 }
  0xe6   : > { %s6428_s20 = scalar_lea.hbm %s8144_s1, 4096  ;;  %p6429_p5 = scmp.lt.u32.totalorder %s6904_s26, %s8144_s1 }
  0xe7   : > { %p6426_p10 = pnand %p6424_p4, %p6395_p8  ;;  %p6430_p7 = scmp.lt.u32.totalorder %s6428_s20, %s6423_s6 }
  0xe8   : > { %p6432_p12 = scmp.lt.u32.totalorder %s6423_s6, %s6904_s26 }
  0xe9   : > { %p6427_p3 = pneg %p6426_p10  ;;  %p6431_p9 = por %p6430_p7, %p6429_p5 }
  0xeb   : > { %p6433_p1 = por %p6432_p12, %p6431_p9 }
  0xed   : > { %p6434_p13 = pnand %p6433_p1, %p6427_p3 }
  0xef   : > { %6437 = shalt.err (!%p6434_p13)
}
  0xf0   : > { %s6438_s4 = scalar_lea.vmem %s6908_s0, 2048  ;;  %s6550_s18 = smov [#allocation5]  }
  0xf1   : > { %p6439_p0 = scmp.ne.s32.totalorder %s6908_s0, %s6438_s4  ;;  %s6443_s12 = sshll.u32 %s6550_s18, 4  ;;  %s6444_s12 = int_to_ptr.vmem [resolvable:$false] %s6443_s12 }
  0xf2   : > { %s6445_s13 = scalar_lea.vmem %s6444_s12, 4096  ;;  %p6446_p10 = scmp.lt.s32.totalorder %s6908_s0, %s6444_s12 }
  0xf3   : > { %p6441_p2 = pnand %p6439_p0, %p6395_p8  ;;  %p6447_p5 = scmp.lt.s32.totalorder %s6445_s13, %s6438_s4 }
  0xf5   : > { %p6442_p4 = pneg %p6441_p2  ;;  %p6448_p7 = por %p6447_p5, %p6446_p10 }
  0xf7   : > { %p6449_p9 = pnand %p6448_p7, %p6442_p4 }
  0xf9   : > { %6452 = shalt.err (!%p6449_p9)
}
  0xfa   : > { %s6551_s6 = smov 256   ;;  %s6552_s16 = smov 16  }
  0xfb   : > { %5609 = dma.hbm_to_vmem [thread:$0]  (!%p6863_p11), %s6904_s26, 2048, %s6908_s0, %s6912_s5, %s6551_s6, %s6551_s6, %s6552_s16  }
  0xfc   : > { %p8213_p8 = scmp.ne.s32.totalorder %s8195_s28, 0 }
  0xfe   : > { %475 = sbr.rel (%p8213_p8) target bundleno = 1594 (0x63a), region = 68 }
 0x105   : > { %s6941_s17 = sand.u32 1, %s6531_s22  }
 0x106   : > { %s4782_s3 = sshll.u32 %s6941_s17, 6  ;;  %s478_s11 = scalar_lea.sflag [#allocation3], %s6941_s17 }
 0x107   : > { %s6945_s15 = scalar_lea.vmem [#allocation2], %s4782_s3 }
 0x108   : > { %6498 = dma.done.wait (%p6835_p6), %s478_s11, 1024  }
 0x109   : > { %6500 = vsyncadd (%p6835_p6), %s478_s11, 4294966272  ;;  %s486_s0 = sand.u32 1, %s6643_s27   ;;  %s4783_s5 = sshll.u32 %s6941_s17, 7 }
 0x10a   : > { %s487_s28 = scalar_lea.sflag [#allocation6], %s486_s0  ;;  %s6955_s2 = scalar_lea.vmem [#allocation5], %s4783_s5 }
 0x10b   : > { %6502 = dma.done.wait (%p6835_p6), %s487_s28, 2048  }
 0x10c   : > { %6504 = vsyncadd (%p6835_p6), %s487_s28, 4294965248  ;;  %p8214_p11 = scmp.eq.s32.totalorder %s6643_s27, 0 }
 0x10e   : > { %6506 = dma.done.wait (%p8214_p11), [#allocation6], 2048   ;;  %p8215_p3 = pmov %p8214_p11 }
 0x110   : > { %6508 = vsyncadd (%p8215_p3), [#allocation6], 4294965248  ;;  %p8216_p12 = pmov %p8215_p3 }
 0x111   : > { %p8217_p1 = pmov %p8215_p3 }
 0x112   : > { %6510 = dma.done.wait (%p8216_p12), [#allocation9], 24576  }
 0x113   : > { %6512 = vsyncadd (%p8217_p1), [#allocation9], 4294942720  ;;  %p8218_p13 = pmov %p8217_p1 }
 0x114   : > { %p8219_p0 = pmov %p8217_p1 }
 0x115   : > { %6514 = dma.done.wait (%p8218_p13), [#allocation12], 16384  }
 0x116   : > { %6516 = vsyncadd (%p8219_p0), [#allocation12], 4294950912  ;;  %p8220_p6 = pmov %p8219_p0 }
 0x117   : > { %p8221_p2 = pmov %p8219_p0 }
 0x118   : > { %6518 = dma.done.wait (%p8220_p6), [#allocation15], 4096  }
 0x119   : > { %6520 = vsyncadd (%p8221_p2), [#allocation15], 4294963200  ;;  %v6553_v0 = vmov 0   ;;  %v5673_v1 = vld [vmem:[#allocation7 + $0x4] ss:$8 sps:$4 sm:$0xff]   ;;  %v566_v33 = vld [vmem:[%s6945_s15 + $0x10] sm:$0xff]  ;;  %v610_v62 = vlaneseq }
 0x11a   : > { %732 = vmatprep.mubr.bf16.mxu0 %v6553_v0  ;;  %v5675_v2 = vld [vmem:[#allocation7] ss:$8 sps:$4 sm:$0xff]   ;;  %700 = vmatprep.subr.bf16.mxu0 %v5673_v1  ;;  %v5676_v3 = vld [vmem:[#allocation7 + $0x14] ss:$8 sps:$4 sm:$0xff]   ;;  %v5678_v4 = vld [vmem:[#allocation7 + $0x10] ss:$8 sps:$4 sm:$0xff]  }
 0x11b   : > { %701 = vmatpush1.bf16.msra.mxu0 %v5675_v2  ;;  %v5679_v5 = vld [vmem:[#allocation7 + $0x24] ss:$8 sps:$4 sm:$0xff]   ;;  %v5681_v6 = vld [vmem:[#allocation7 + $0x20] ss:$8 sps:$4 sm:$0xff]   ;;  %v5682_v7 = vld [vmem:[#allocation7 + $0x34] ss:$8 sps:$4 sm:$0xff]  }
 0x11c   : > { %702 = vmatprep.subr.bf16.mxu0 %v5676_v3  ;;  %v5684_v8 = vld [vmem:[#allocation7 + $0x30] ss:$8 sps:$4 sm:$0xff]   ;;  %v5685_v9 = vld [vmem:[#allocation7 + $0x44] ss:$8 sps:$4 sm:$0xff]   ;;  %v5699_v11 = vld [vmem:[#allocation8 + $0x100] ss:$8 sps:$4 sm:$0xff]  }
 0x11d   : > { %v5697_v10 = vld [vmem:[#allocation8 + $0x104] ss:$8 sps:$4 sm:$0xff]   ;;  %v5687_v12 = vld [vmem:[#allocation7 + $0x40] ss:$8 sps:$4 sm:$0xff]   ;;  %v5700_v13 = vld [vmem:[#allocation8 + $0x114] ss:$8 sps:$4 sm:$0xff]  }
 0x11e   : > { %v5688_v14 = vld [vmem:[#allocation7 + $0x54] ss:$8 sps:$4 sm:$0xff]   ;;  %1208 = vmatprep.subr.bf16.mxu1 %v5697_v10  ;;  %v5702_v15 = vld [vmem:[#allocation8 + $0x110] ss:$8 sps:$4 sm:$0xff]   ;;  %v5703_v16 = vld [vmem:[#allocation8 + $0x124] ss:$8 sps:$4 sm:$0xff]  }
 0x11f   : > { %703 = vmatpush1.bf16.msra.mxu0 %v5678_v4  ;;  %1209 = vmatpush1.bf16.msra.mxu1 %v5699_v11  ;;  %v5690_v17 = vld [vmem:[#allocation7 + $0x50] ss:$8 sps:$4 sm:$0xff]   ;;  %v5691_v18 = vld [vmem:[#allocation7 + $0x64] ss:$8 sps:$4 sm:$0xff]   ;;  %v5705_v19 = vld [vmem:[#allocation8 + $0x120] ss:$8 sps:$4 sm:$0xff]  }
 0x120   : > { %704 = vmatprep.subr.bf16.mxu0 %v5679_v5  ;;  %1210 = vmatprep.subr.bf16.mxu1 %v5700_v13  ;;  %v5706_v20 = vld [vmem:[#allocation8 + $0x134] ss:$8 sps:$4 sm:$0xff]   ;;  %v5693_v21 = vld [vmem:[#allocation7 + $0x60] ss:$8 sps:$4 sm:$0xff]   ;;  %v5708_v23 = vld [vmem:[#allocation8 + $0x130] ss:$8 sps:$4 sm:$0xff]  }
 0x121   : > { %v5694_v22 = vld [vmem:[#allocation7 + $0x74] ss:$8 sps:$4 sm:$0xff]   ;;  %v5696_v24 = vld [vmem:[#allocation7 + $0x70] ss:$8 sps:$4 sm:$0xff]   ;;  %v5709_v25 = vld [vmem:[#allocation8 + $0x144] ss:$8 sps:$4 sm:$0xff]  }
 0x122   : > { %v564_v26 = vld [vmem:[%s6945_s15] sm:$0xff]  ;;  %v565_v27 = vld [vmem:[%s6945_s15 + $0x8] sm:$0xff]  ;;  %v5712_v30 = vld [vmem:[#allocation8 + $0x154] ss:$8 sps:$4 sm:$0xff]   ;;  %v6989_v63 = vshrl.u32 %v610_v62, 7  ;;  %vm902_vm3 = vcmask 1040384  }
 0x123   : > { %705 = vmatpush1.bf16.msra.mxu0 %v5681_v6  ;;  %1211 = vmatpush1.bf16.msra.mxu1 %v5702_v15  ;;  %v5711_v28 = vld [vmem:[#allocation8 + $0x140] ss:$8 sps:$4 sm:$0xff]   ;;  %v572_v29 = vpack.c.bf16 %v565_v27, %v564_v26  ;;  %v5714_v31 = vld [vmem:[#allocation8 + $0x150] ss:$8 sps:$4 sm:$0xff]   ;;  %v5715_v32 = vld [vmem:[#allocation8 + $0x164] ss:$8 sps:$4 sm:$0xff]  }
 0x124   : > { %706 = vmatprep.subr.bf16.mxu0 %v5682_v7  ;;  %1212 = vmatprep.subr.bf16.mxu1 %v5703_v16  ;;  %v567_v34 = vld [vmem:[%s6945_s15 + $0x18] sm:$0xff]  ;;  %v5717_v35 = vld [vmem:[#allocation8 + $0x160] ss:$8 sps:$4 sm:$0xff]   ;;  %v5721_v39 = vld [vmem:[#allocation8 + $0x184] ss:$8 sps:$4 sm:$0xff]   ;;  %v786_v1 = vand.u32 7, %v6989_v63 }
 0x125   : > { %v5718_v36 = vld [vmem:[#allocation8 + $0x174] ss:$8 sps:$4 sm:$0xff]   ;;  %v573_v37 = vpack.c.bf16 %v567_v34, %v566_v33  ;;  %v5720_v38 = vld [vmem:[#allocation8 + $0x170] ss:$8 sps:$4 sm:$0xff]   ;;  %v568_v40 = vld [vmem:[%s6945_s15 + $0x20] sm:$0xff]  ;;  %v7005_v4 = vsub.s32 0, %v6989_v63 }
 0x126   : > { %v569_v41 = vld [vmem:[%s6945_s15 + $0x28] sm:$0xff]  ;;  %v5724_v43 = vld [vmem:[#allocation8 + $0x194] ss:$8 sps:$4 sm:$0xff]   ;;  %v5726_v45 = vld [vmem:[#allocation8 + $0x190] ss:$8 sps:$4 sm:$0xff]   ;;  %vm5419_vm1 = vcmp.ne.s32.totalorder %v786_v1, 7 }
 0x127   : > { %707 = vmatpush1.bf16.msra.mxu0 %v5684_v8  ;;  %1213 = vmatpush1.bf16.msra.mxu1 %v5705_v19  ;;  %v5723_v42 = vld [vmem:[#allocation8 + $0x180] ss:$8 sps:$4 sm:$0xff]   ;;  %v574_v44 = vpack.c.bf16 %v569_v41, %v568_v40  ;;  %v5727_v46 = vld [vmem:[#allocation8 + $0x1a4] ss:$8 sps:$4 sm:$0xff]   ;;  %v570_v47 = vld [vmem:[%s6945_s15 + $0x30] sm:$0xff]  ;;  %8224 = vst [vmem:[#allocation24_spill] sm:$0xff] %v7005_v4 }
 0x128   : > { %708 = vmatprep.subr.bf16.mxu0 %v5685_v9  ;;  %1214 = vmatprep.subr.bf16.mxu1 %v5706_v20  ;;  %v571_v48 = vld [vmem:[%s6945_s15 + $0x38] sm:$0xff]  ;;  %v5729_v49 = vld [vmem:[#allocation8 + $0x1a0] ss:$8 sps:$4 sm:$0xff]   ;;  %v5733_v53 = vld [vmem:[#allocation8 + $0x1c4] ss:$8 sps:$4 sm:$0xff]   ;;  %v7011_v6 = vsub.s32 1, %v6989_v63 }
 0x129   : > { %v5730_v50 = vld [vmem:[#allocation8 + $0x1b4] ss:$8 sps:$4 sm:$0xff]   ;;  %v575_v51 = vpack.c.bf16 %v571_v48, %v570_v47  ;;  %v5732_v52 = vld [vmem:[#allocation8 + $0x1b0] ss:$8 sps:$4 sm:$0xff]   ;;  %v5735_v54 = vld [vmem:[#allocation8 + $0x1c0] ss:$8 sps:$4 sm:$0xff]  }
 0x12a   : > { %v5736_v55 = vld [vmem:[#allocation8 + $0x1d4] ss:$8 sps:$4 sm:$0xff]   ;;  %v5738_v56 = vld [vmem:[#allocation8 + $0x1d0] ss:$8 sps:$4 sm:$0xff]   ;;  %v5739_v57 = vld [vmem:[#allocation8 + $0x1e4] ss:$8 sps:$4 sm:$0xff]  }
 0x12b   : > { %709 = vmatpush1.bf16.msra.mxu0 %v5687_v12  ;;  %1215 = vmatpush1.bf16.msra.mxu1 %v5708_v23  ;;  %v5741_v58 = vld [vmem:[#allocation8 + $0x1e0] ss:$8 sps:$4 sm:$0xff]   ;;  %v5742_v59 = vld [vmem:[#allocation8 + $0x1f4] ss:$8 sps:$4 sm:$0xff]   ;;  %v5744_v60 = vld [vmem:[#allocation8 + $0x1f0] ss:$8 sps:$4 sm:$0xff]  }
 0x12c   : > { %710 = vmatprep.subr.bf16.mxu0 %v5688_v14  ;;  %1216 = vmatprep.subr.bf16.mxu1 %v5709_v25  ;;  %v5747_v61 = vld [vmem:[#allocation8 + $0x4] ss:$8 sps:$4 sm:$0xff]   ;;  %v608_v5 = vld [vmem:[%s8151_s8] sm:$0x3]  ;;  %8225 = vst [vmem:[#allocation25_spill] sm:$0xff] %v7011_v6  ;;  %v7020_v9 = vadd.s32 16, %v6989_v63 }
 0x12d   : > { %v7014_v7 = vrot.slane %v608_v5, %v7005_v4  ;;  %v7017_v8 = vrot.slane %v608_v5, %v7011_v6  ;;  %vm1522_vm4 = vcmask 1046528   ;;  %v7038_v23 = vadd.s32 40, %v6989_v63  ;;  %v5748_v48 = vld [vmem:[#allocation8 + $0x10] ss:$8 sps:$4 sm:$0xff]   ;;  %s8278_s30 = sld [smem:[#allocation42_spill]]  ;;  %s8311_s12 = sld [smem:[#allocation43_spill]] }
 0x12e   : > { %v8164_v19 = vand.u32 7, %v7020_v9  ;;  %vm5411_vm15 = vcmp.ne.s32.totalorder %v786_v1, 0  ;;  %v5768_v1 = vld [vmem:[#allocation8 + $0x74] ss:$8 sps:$4 sm:$0xff]   ;;  %v6138_v3 = vld [vmem:[#allocation14 + $0x30] ss:$8 sps:$4 sm:$0xff]  }
 0x12f   : > { %711 = vmatpush1.bf16.msra.mxu0 %v5690_v17  ;;  %1217 = vmatpush1.bf16.msra.mxu1 %v5711_v28  ;;  %s8314_s16 = sld [smem:[#allocation44_spill]]  ;;  %s8042_s3 = scalar_lea.vmem [#allocation16], %s4783_s5 }
 0x130   : > { %712 = vmatprep.subr.bf16.mxu0 %v5691_v18  ;;  %1218 = vmatprep.subr.bf16.mxu1 %v5712_v30  ;;  %v7028_v18 = vadd.s32 24, %v6989_v63  ;;  %vm5421_vm6 = vcmp.ne.s32.totalorder %v8164_v19, 7  ;;  %v5760_v19 = vld [vmem:[#allocation8 + $0x50] ss:$8 sps:$4 sm:$0xff]   ;;  %s5409_s11 = sshll.u32 %s6643_s27, 11  ;;  %s4612_s15 = sshll.u32 %s8042_s3, 4  ;;  %s8096_s15 = int_to_ptr.vmem [resolvable:$true] %s4612_s15 }
 0x131   : > { %s8315_s27 = sld [smem:[#allocation45_spill]]  ;;  %s6453_s9 = scalar_lea.vmem %s8096_s15, 2048 }
 0x132   : > { %p6454_p4 = scmp.ne.s32.totalorder %s8096_s15, %s6453_s9  ;;  %p8316_p10 = scmp.ne.s32.totalorder %s8206_s29, 0 }
 0x133   : > { %713 = vmatpush1.bf16.msra.mxu0 %v5693_v21  ;;  %1219 = vmatpush1.bf16.msra.mxu1 %v5714_v31  ;;  %s6554_s26 = smov [#allocation16]  }
 0x134   : > { %714 = vmatprep.subr.bf16.mxu0 %v5694_v22  ;;  %1220 = vmatprep.subr.bf16.mxu1 %v5715_v32  ;;  %v7035_v22 = vadd.s32 32, %v6989_v63  ;;  %v5745_v32 = vld [vmem:[#allocation8] ss:$8 sps:$4 sm:$0xff]   ;;  %p6455_p5 = pnand %p6454_p4, %p8316_p10  ;;  %s6457_s20 = sshll.u32 %s6554_s26, 4  ;;  %s6458_s20 = int_to_ptr.vmem [resolvable:$false] %s6457_s20 }
 0x135   : > { %s6459_s19 = scalar_lea.vmem %s6458_s20, 4096  ;;  %p6460_p9 = scmp.lt.s32.totalorder %s8096_s15, %s6458_s20 }
 0x136   : > { %p6456_p7 = pneg %p6455_p5  ;;  %p6461_p8 = scmp.lt.s32.totalorder %s6459_s19, %s6453_s9 }
 0x137   : > { %715 = vmatpush1.bf16.msra.mxu0 %v5696_v24  ;;  %1221 = vmatpush1.bf16.msra.mxu1 %v5717_v35  ;;  %s8094_s28 = scalar_lea.hbm %s8315_s27, %s5409_s11 }
 0x138   : > { %1222 = vmatprep.subr.bf16.mxu1 %v5718_v36  ;;  %v5750_v36 = vld [vmem:[#allocation8 + $0x14] ss:$8 sps:$4 sm:$0xff]   ;;  %p6462_p11 = por %p6461_p8, %p6460_p9 }
 0x13a   : > { %733 = vmatmul.mubr.bf16.vlgmr.msra.gmra.mrb[0].mxu0 %v572_v29  ;;  %p6463_p3 = pnand %p6462_p11, %p6456_p7 }
 0x13b   : > { %742 = vmatprep.mubr.bf16.mxu0 %v6553_v0  ;;  %1223 = vmatpush1.bf16.msra.mxu1 %v5720_v38 }
 0x13c   : > { %1224 = vmatprep.subr.bf16.mxu1 %v5721_v39  ;;  %v5762_v39 = vld [vmem:[#allocation8 + $0x54] ss:$8 sps:$4 sm:$0xff]  }
 0x13f   : > { %1225 = vmatpush1.bf16.msra.mxu1 %v5723_v42 }
 0x140   : > { %1226 = vmatprep.subr.bf16.mxu1 %v5724_v43 }
 0x142   : > { %743 = vmatmul.mubr.bf16.gmra.mrb[4].mxu0 %v573_v37  ;;  %v8165_v37 = vand.u32 7, %v7028_v18 }
 0x143   : > { %752 = vmatprep.mubr.bf16.mxu0 %v6553_v0  ;;  %1227 = vmatpush1.bf16.msra.mxu1 %v5726_v45 }
 0x144   : > { %1228 = vmatprep.subr.bf16.mxu1 %v5727_v46  ;;  %vm5420_vm5 = vcmp.ne.s32.totalorder %v8165_v37, 7 }
 0x145   : > { %vm7083_vm7 = vmpackc.low %vm5420_vm5, %vm5421_vm6 }
 0x147   : > { %1229 = vmatpush1.bf16.msra.mxu1 %v5729_v49  ;;  %v8162_v49 = vand.u32 7, %v7035_v22 }
 0x148   : > { %1230 = vmatprep.subr.bf16.mxu1 %v5730_v50  ;;  %v8163_v50 = vand.u32 7, %v7038_v23 }
 0x149   : > { %vm5423_vm9 = vcmp.ne.s32.totalorder %v8162_v49, 7 }
 0x14a   : > { %753 = vmatmul.mubr.bf16.gmra.mrb[8].mxu0 %v574_v44  ;;  %vm5422_vm8 = vcmp.ne.s32.totalorder %v8163_v50, 7  ;;  %v5757_v50 = vld [vmem:[#allocation8 + $0x40] ss:$8 sps:$4 sm:$0xff]  }
 0x14b   : > { %762 = vmatprep.mubr.bf16.mxu0 %v6553_v0  ;;  %1231 = vmatpush1.bf16.msra.mxu1 %v5732_v52  ;;  %v6992_v0 = vadd.s32 8, %v6989_v63  ;;  %vm7148_vm10 = vmpackc.low %vm5422_vm8, %vm5423_vm9 }
 0x14c   : > { %1232 = vmatprep.subr.bf16.mxu1 %v5733_v53 }
 0x14d   : > { %v793_v2 = vand.u32 7, %v6992_v0 }
 0x14f   : > { %1233 = vmatpush1.bf16.msra.mxu1 %v5735_v54  ;;  %vm5418_vm0 = vcmp.ne.s32.totalorder %v793_v2, 7  ;;  %vm7209_vm13 = vcmp.ne.s32.totalorder %v793_v2, 0 }
 0x150   : > { %1234 = vmatprep.subr.bf16.mxu1 %v5736_v55  ;;  %vm7000_vm2 = vmpackc.low %vm5418_vm0, %vm5419_vm1 }
 0x151   : > { %vm7235_vm0 = vmpackc.low %vm7209_vm13, %vm5411_vm15 }
 0x152   : > { %763 = vmatmul.mubr.bf16.gmra.mrb[12].mxu0 %v575_v51  ;;  %v6144_v51 = vld [vmem:[#allocation14 + $0x50] ss:$8 sps:$4 sm:$0xff]  }
 0x153   : > { %1235 = vmatpush1.bf16.msra.mxu1 %v5738_v56  ;;  %v5753_v56 = vld [vmem:[#allocation8 + $0x24] ss:$8 sps:$4 sm:$0xff]  }
 0x154   : > { %1236 = vmatprep.subr.bf16.mxu1 %v5739_v57  ;;  %v7091_v57 = vadd.s32 48, %v6989_v63 }
 0x157   : > { %1237 = vmatpush1.bf16.msra.mxu1 %v5741_v58 }
 0x158   : > { %1238 = vmatprep.subr.bf16.mxu1 %v5742_v59 }
 0x15b   : > { %1239 = vmatpush1.bf16.msra.mxu1 %v5744_v60 }
 0x15c   : > { %1441 = vmatprep.subr.bf16.mxu1 %v5747_v61  ;;  %v7095_v61 = vadd.s32 56, %v6989_v63 }
 0x20d   : > { %v734_v10 = vpop.f32.mrb[0].mxu0 }
 0x20e   : > { %v735_v11 = vadd.f32 %v734_v10, %v7014_v7  ;;  %v736_v12 = vpop.f32.mrb[1].mxu0 }
 0x20f   : > { %v737_v13 = vadd.f32 %v736_v12, %v7017_v8  ;;  %v738_v14 = vpop.f32.mrb[2].mxu0 }
 0x210   : > { %v903_v15 = vrot.slane %v735_v11, 7  ;;  %v7025_v16 = vadd.f32 %v738_v14, %v7014_v7  ;;  %v740_v17 = vpop.f32.mrb[3].mxu0  ;;  %v1523_v24 = vrot.slane %v735_v11, 1 }
 0x211   : > { %v904_v20 = vrot.slane %v737_v13, 7  ;;  %v7032_v21 = vadd.f32 %v740_v17, %v7017_v8  ;;  %v1526_v28 = vrot.slane %v737_v13, 1  ;;  %v5756_v17 = vld [vmem:[#allocation8 + $0x34] ss:$8 sps:$4 sm:$0xff]  }
 0x212   : > { %v905_v25 = vrot.slane %v7025_v16, 7  ;;  %v1524_v26 = vrot.slane %v7025_v16, 1  ;;  %v7043_v27 = vpack.c.bf16 %v7025_v16, %v735_v11  ;;  %v7051_v33 = vsel %vm902_vm3, 0.0, %v903_v15  ;;  %v5751_v16 = vld [vmem:[#allocation8 + $0x20] ss:$8 sps:$4 sm:$0xff]  }
 0x213   : > { %v907_v29 = vrot.slane %v7032_v21, 7  ;;  %v1527_v30 = vrot.slane %v7032_v21, 1  ;;  %v7048_v31 = vpack.c.bf16 %v7032_v21, %v737_v13  ;;  %v7061_v38 = vsel %vm902_vm3, 0.0, %v904_v20 }
 0x214   : > { %8226 = vst [vmem:[#allocation26_spill] sm:$0xff] %v7043_v27  ;;  %v7054_v34 = vsel %vm902_vm3, %v903_v15, %v905_v25  ;;  %v7057_v35 = vsel %vm1522_vm4, %v1523_v24, %v1524_v26 }
 0x215   : > { %8227 = vst [vmem:[#allocation27_spill] sm:$0xff] %v7048_v31  ;;  %v744_v40 = vpop.f32.mrb[4].mxu0  ;;  %1240 = vmatprep.mubr.bf16.mxu1 %v7048_v31  ;;  %v7067_v41 = vsel %vm902_vm3, %v904_v20, %v907_v29  ;;  %v7070_v42 = vsel %vm1522_vm4, %v1526_v28, %v1527_v30 }
 0x216   : > { %v745_v43 = vadd.f32 %v744_v40, %v7014_v7  ;;  %v746_v44 = vpop.f32.mrb[5].mxu0  ;;  %1241 = vmatmul.mubr.bf16.vlgmr.msra.gmra.mrb[0].mxu1 %v7043_v27  ;;  %v5916_v27 = vld [vmem:[#allocation10 + $0x90] ss:$8 sps:$4 sm:$0xff]  }
 0x217   : > { %v747_v46 = vadd.f32 %v746_v44, %v7017_v8  ;;  %1442 = vmatpush1.bf16.msra.mxu1 %v5745_v32  ;;  %v748_v47 = vpop.f32.mrb[6].mxu0 }
 0x218   : > { %v909_v52 = vrot.slane %v745_v43, 7  ;;  %v1529_v53 = vrot.slane %v745_v43, 1  ;;  %v7088_v54 = vadd.f32 %v748_v47, %v7014_v7  ;;  %v750_v55 = vpop.f32.mrb[7].mxu0  ;;  %1443 = vmatprep.subr.bf16.mxu1 %v5750_v36 }
 0x219   : > { %v911_v58 = vrot.slane %v747_v46, 7  ;;  %v1531_v59 = vrot.slane %v747_v46, 1  ;;  %v751_v60 = vadd.f32 %v750_v55, %v7017_v8 }
 0x21a   : > { %v7098_v62 = vsel %vm1522_vm4, %v1524_v26, %v1529_v53  ;;  %v913_v5 = vrot.slane %v7088_v54, 7  ;;  %v1533_v10 = vrot.slane %v7088_v54, 1  ;;  %v7103_v11 = vpack.c.bf16 %v7088_v54, %v745_v43 }
 0x21b   : > { %v915_v13 = vrot.slane %v751_v60, 7  ;;  %v1535_v14 = vrot.slane %v751_v60, 1  ;;  %1444 = vmatpush1.bf16.msra.mxu1 %v5748_v48  ;;  %v7107_v15 = vpack.c.bf16 %v751_v60, %v747_v46  ;;  %v7110_v20 = vsel %vm902_vm3, %v907_v29, %v911_v58  ;;  %v5754_v48 = vld [vmem:[#allocation8 + $0x30] ss:$8 sps:$4 sm:$0xff]  }
 0x21c   : > { %8230 = vst [vmem:[#allocation28_spill] sm:$0xff] %v7103_v11  ;;  %1445 = vmatprep.subr.bf16.mxu1 %v5753_v56  ;;  %v7113_v21 = vsel %vm902_vm3, %v905_v25, %v909_v52  ;;  %v7116_v24 = vsel %vm902_vm3, %v909_v52, %v913_v5  ;;  %v7119_v26 = vsel %vm1522_vm4, %v1527_v30, %v1531_v59 }
 0x21d   : > { %8231 = vst [vmem:[#allocation29_spill] sm:$0xff] %v7107_v15  ;;  %v754_v28 = vpop.f32.mrb[8].mxu0  ;;  %1250 = vmatprep.mubr.bf16.mxu1 %v7107_v15  ;;  %v7123_v32 = vsel %vm902_vm3, %v911_v58, %v915_v13  ;;  %v7130_v25 = vsel %vm1522_vm4, %v1531_v59, %v1535_v14  ;;  %v7137_v44 = vsel %vm1522_vm4, %v1529_v53, %v1533_v10  ;;  %v5759_v53 = vld [vmem:[#allocation8 + $0x44] ss:$8 sps:$4 sm:$0xff]   ;;  %v8167_v58 = vand.u32 7, %v7091_v57 }
 0x21e   : > { %v755_v40 = vadd.f32 %v754_v28, %v7014_v7  ;;  %v756_v43 = vpop.f32.mrb[9].mxu0  ;;  %1251 = vmatmul.mubr.bf16.gmra.mrb[4].mxu1 %v7103_v11  ;;  %v5763_v11 = vld [vmem:[#allocation8 + $0x60] ss:$8 sps:$4 sm:$0xff]   ;;  %v6150_v59 = vld [vmem:[#allocation14 + $0x70] ss:$8 sps:$4 sm:$0xff]  }
 0x21f   : > { %v757_v46 = vadd.f32 %v756_v43, %v7017_v8  ;;  %1446 = vmatpush1.bf16.msra.mxu1 %v5751_v16  ;;  %v758_v47 = vpop.f32.mrb[10].mxu0  ;;  %v8166_v43 = vand.u32 7, %v7095_v61  ;;  %vm5425_vm12 = vcmp.ne.s32.totalorder %v8167_v58, 7 }
 0x220   : > { %v917_v52 = vrot.slane %v755_v40, 7  ;;  %v1537_v54 = vrot.slane %v755_v40, 1  ;;  %v7145_v55 = vadd.f32 %v758_v47, %v7014_v7  ;;  %v760_v56 = vpop.f32.mrb[11].mxu0  ;;  %1447 = vmatprep.subr.bf16.mxu1 %v5756_v17 }
 0x221   : > { %v919_v60 = vrot.slane %v757_v46, 7  ;;  %v1539_v16 = vrot.slane %v757_v46, 1  ;;  %v7153_v28 = vadd.f32 %v760_v56, %v7017_v8  ;;  %vm5424_vm11 = vcmp.ne.s32.totalorder %v8166_v43, 7 }
 0x222   : > { %v921_v12 = vrot.slane %v7145_v55, 7  ;;  %v1541_v47 = vrot.slane %v7145_v55, 1  ;;  %v7159_v17 = vpack.c.bf16 %v7145_v55, %v755_v40  ;;  %v7162_v29 = vsel %vm902_vm3, %v913_v5, %v917_v52  ;;  %vm7213_vm14 = vmpackc.low %vm5424_vm11, %vm5425_vm12 }
 0x223   : > { %v923_v36 = vrot.slane %v7153_v28, 7  ;;  %v1543_v49 = vrot.slane %v7153_v28, 1  ;;  %1448 = vmatpush1.bf16.msra.mxu1 %v5754_v48  ;;  %v7167_v56 = vpack.c.bf16 %v7153_v28, %v757_v46  ;;  %v7170_v30 = vsel %vm902_vm3, %v915_v13, %v919_v60 }
 0x224   : > { %8234 = vst [vmem:[#allocation30_spill] sm:$0xff] %v7159_v17  ;;  %1449 = vmatprep.subr.bf16.mxu1 %v5759_v53  ;;  %v7173_v40 = vsel %vm902_vm3, %v917_v52, %v921_v12  ;;  %v7176_v5 = vsel %vm1522_vm4, %v1535_v14, %v1539_v16  ;;  %v7179_v55 = vsel %vm1522_vm4, %v1533_v10, %v1537_v54 }
 0x225   : > { %8235 = vst [vmem:[#allocation31_spill] sm:$0xff] %v7167_v56  ;;  %v7182_v48 = vsel %vm1522_vm4, %v1537_v54, %v1541_v47  ;;  %v764_v46 = vpop.f32.mrb[12].mxu0  ;;  %1260 = vmatprep.mubr.bf16.mxu1 %v7167_v56  ;;  %v7186_v13 = vsel %vm902_vm3, %v919_v60, %v923_v36  ;;  %v7199_v60 = vsel %vm1522_vm4, %v1539_v16, %v1543_v49  ;;  %v5765_v54 = vld [vmem:[#allocation8 + $0x64] ss:$8 sps:$4 sm:$0xff]   ;;  %v5766_v16 = vld [vmem:[#allocation8 + $0x70] ss:$8 sps:$4 sm:$0xff]  }
 0x226   : > { %v765_v10 = vadd.f32 %v764_v46, %v7014_v7  ;;  %v766_v28 = vpop.f32.mrb[13].mxu0  ;;  %1261 = vmatmul.mubr.bf16.gmra.mrb[8].mxu1 %v7159_v17 }
 0x227   : > { %v767_v53 = vadd.f32 %v766_v28, %v7017_v8  ;;  %1450 = vmatpush1.bf16.msra.mxu1 %v5757_v50  ;;  %v768_v52 = vpop.f32.mrb[14].mxu0  ;;  %v6162_v50 = vld [vmem:[#allocation14 + $0xb0] ss:$8 sps:$4 sm:$0xff]  }
 0x228   : > { %v925_v46 = vrot.slane %v765_v10, 7  ;;  %v1545_v14 = vrot.slane %v765_v10, 1  ;;  %v769_v37 = vadd.f32 %v768_v52, %v7014_v7  ;;  %v770_v45 = vpop.f32.mrb[15].mxu0  ;;  %1451 = vmatprep.subr.bf16.mxu1 %v5762_v39 }
 0x229   : > { %v927_v28 = vrot.slane %v767_v53, 7  ;;  %v1547_v43 = vrot.slane %v767_v53, 1  ;;  %v771_v58 = vadd.f32 %v770_v45, %v7017_v8 }
 0x22a   : > { %v929_v7 = vrot.slane %v769_v37, 7  ;;  %v1549_v39 = vrot.slane %v769_v37, 1  ;;  %v7220_v52 = vpack.c.bf16 %v769_v37, %v765_v10  ;;  %v7223_v0 = vsel %vm902_vm3, %v921_v12, %v925_v46 }
 0x22b   : > { %v931_v2 = vrot.slane %v771_v58, 7  ;;  %v1551_v17 = vrot.slane %v771_v58, 1  ;;  %1452 = vmatpush1.bf16.msra.mxu1 %v5760_v19  ;;  %v7225_v56 = vpack.c.bf16 %v771_v58, %v767_v53  ;;  %v7228_v15 = vsel %vm902_vm3, %v923_v36, %v927_v28 }
 0x22c   : > { %8240 = vst [vmem:[#allocation32_spill] sm:$0xff] %v7220_v52  ;;  %v7231_v8 = vsel %vm1522_vm4, %v1549_v39, 0.0  ;;  %1453 = vmatprep.subr.bf16.mxu1 %v5765_v54  ;;  %v7240_v37 = vsel %vm902_vm3, %v925_v46, %v929_v7  ;;  %v7243_v19 = vsel %vm1522_vm4, %v1543_v49, %v1547_v43  ;;  %v7246_v45 = vsel %vm1522_vm4, %v1541_v47, %v1545_v14  ;;  %v5781_v7 = vld [vmem:[#allocation8 + $0xc0] ss:$8 sps:$4 sm:$0xff]  }
 0x22d   : > { %8241 = vst [vmem:[#allocation33_spill] sm:$0xff] %v7225_v56  ;;  %v7249_v12 = vsel %vm1522_vm4, %v1551_v17, 0.0  ;;  %1270 = vmatprep.mubr.bf16.mxu1 %v7225_v56  ;;  %v7253_v36 = vsel %vm902_vm3, %v927_v28, %v931_v2  ;;  %v4909_v58 = vpack.c.bf16 %v7240_v37, %v7223_v0  ;;  %v4966_v53 = vpack.c.bf16 %v7243_v19, %v7199_v60  ;;  %v5778_v2 = vld [vmem:[#allocation8 + $0xb0] ss:$8 sps:$4 sm:$0xff]   ;;  %v5825_v37 = vld [vmem:[#allocation8 + $0x2a4] ss:$8 sps:$4 sm:$0xff]  }
 0x22e   : > { %1271 = vmatmul.mubr.bf16.gmra.mrb[12].mxu1 %v7220_v52  ;;  %v4904_v49 = vpack.c.bf16 %v7253_v36, %v7228_v15  ;;  %v4971_v47 = vpack.c.bf16 %v7246_v45, %v7182_v48  ;;  %v7265_v10 = vsel %vm1522_vm4, %v1547_v43, %v1551_v17  ;;  %v7268_v54 = vsel %vm1522_vm4, %v1545_v14, %v1549_v39  ;;  %v5771_v43 = vld [vmem:[#allocation8 + $0x84] ss:$8 sps:$4 sm:$0xff]   ;;  %v5769_v17 = vld [vmem:[#allocation8 + $0x80] ss:$8 sps:$4 sm:$0xff]   ;;  %v5774_v14 = vld [vmem:[#allocation8 + $0x94] ss:$8 sps:$4 sm:$0xff]  }
 0x22f   : > { %1454 = vmatpush1.bf16.msra.mxu1 %v5763_v11  ;;  %v8244_v46 = vpack.c.bf16 %v7067_v41, %v7061_v38  ;;  %v4976_v28 = vpack.c.bf16 %v7249_v12, %v7265_v10  ;;  %v5772_v11 = vld [vmem:[#allocation8 + $0x90] ss:$8 sps:$4 sm:$0xff]   ;;  %v5777_v38 = vld [vmem:[#allocation8 + $0xa4] ss:$8 sps:$4 sm:$0xff]   ;;  %v5775_v41 = vld [vmem:[#allocation8 + $0xa0] ss:$8 sps:$4 sm:$0xff]   ;;  %v8262_v15 = vpack.c.bf16 %v7119_v26, %v7070_v42  ;;  %v8266_v12 = vpack.c.bf16 %v7231_v8, %v7268_v54 }
 0x230   : > { %1455 = vmatprep.subr.bf16.mxu1 %v5768_v1  ;;  %v5780_v39 = vld [vmem:[#allocation8 + $0xb4] ss:$8 sps:$4 sm:$0xff]   ;;  %v5817_v36 = vld [vmem:[#allocation8 + $0x280] ss:$8 sps:$4 sm:$0xff]   ;;  %v5820_v0 = vld [vmem:[#allocation8 + $0x290] ss:$8 sps:$4 sm:$0xff]  }
 0x231   : > { %4875 = vmatprep.mubr.msk.bf16.mxu1 %vm7235_vm0, %v8244_v46  ;;  %v5783_v46 = vld [vmem:[#allocation8 + $0xc4] ss:$8 sps:$4 sm:$0xff]   ;;  %v5786_v1 = vld [vmem:[#allocation8 + $0xd4] ss:$8 sps:$4 sm:$0xff]   ;;  %v5874_v54 = vld [vmem:[#allocation10 + $0x1b0] ss:$8 sps:$4 sm:$0xff]  }
 0x232   : > { %v7396_v60 = vld [vmem:[%s6955_s2 + $0x8] sm:$0xff]  ;;  %v7399_v19 = vld [vmem:[%s6955_s2 + $0x18] sm:$0xff] }
 0x233   : > { %1456 = vmatpush1.bf16.msra.mxu1 %v5766_v16  ;;  %v5784_v16 = vld [vmem:[#allocation8 + $0xd0] ss:$8 sps:$4 sm:$0xff]   ;;  %v7403_v48 = vpack.c.bf16 %v7399_v19, %v7396_v60  ;;  %v5864_v45 = vld [vmem:[#allocation10 + $0x174] ss:$8 sps:$4 sm:$0xff]   ;;  %v5867_v10 = vld [vmem:[#allocation10 + $0x184] ss:$8 sps:$4 sm:$0xff]  }
 0x234   : > { %1457 = vmatprep.subr.bf16.mxu1 %v5771_v43  ;;  %v5789_v43 = vld [vmem:[#allocation8 + $0xe4] ss:$8 sps:$4 sm:$0xff]   ;;  %v5876_v8 = vld [vmem:[#allocation10 + $0x1b4] ss:$8 sps:$4 sm:$0xff]   ;;  %v5988_v56 = vld [vmem:[#allocation11 + $0x110] ss:$8 sps:$4 sm:$0xff]  }
 0x235   : > { %v5987_v52 = vld [vmem:[#allocation11 + $0x104] ss:$8 sps:$4 sm:$0xff]  }
 0x236   : > { %3271 = vmatprep.subr.bf16.mxu0 %v5987_v52  ;;  %v5999_v52 = vld [vmem:[#allocation11 + $0x144] ss:$8 sps:$4 sm:$0xff]  }
 0x237   : > { %1458 = vmatpush1.bf16.msra.mxu1 %v5769_v17  ;;  %v5787_v17 = vld [vmem:[#allocation8 + $0xe0] ss:$8 sps:$4 sm:$0xff]  }
 0x238   : > { %1459 = vmatprep.subr.bf16.mxu1 %v5774_v14  ;;  %v5792_v14 = vld [vmem:[#allocation8 + $0xf4] ss:$8 sps:$4 sm:$0xff]  }
 0x23b   : > { %1460 = vmatpush1.bf16.msra.mxu1 %v5772_v11  ;;  %v5790_v11 = vld [vmem:[#allocation8 + $0xf0] ss:$8 sps:$4 sm:$0xff]  }
 0x23c   : > { %1461 = vmatprep.subr.bf16.mxu1 %v5777_v38  ;;  %v5795_v38 = vld [vmem:[#allocation8 + $0x204] ss:$8 sps:$4 sm:$0xff]  }
 0x23f   : > { %1462 = vmatpush1.bf16.msra.mxu1 %v5775_v41  ;;  %v8245_v41 = vand.u32 7, %v7028_v18  ;;  %v8250_v18 = vpack.c.bf16 %v7123_v32, %v7110_v20  ;;  %v5804_v20 = vld [vmem:[#allocation8 + $0x234] ss:$8 sps:$4 sm:$0xff]   ;;  %v8255_v32 = vpack.c.bf16 %v7116_v24, %v7113_v21  ;;  %v5805_v21 = vld [vmem:[#allocation8 + $0x240] ss:$8 sps:$4 sm:$0xff]  }
 0x240   : > { %1463 = vmatprep.subr.bf16.mxu1 %v5780_v39  ;;  %v8246_v39 = vand.u32 7, %v7020_v9  ;;  %v5796_v9 = vld [vmem:[#allocation8 + $0x210] ss:$8 sps:$4 sm:$0xff]   ;;  %v6111_v24 = vld [vmem:[#allocation11 + $0x2a0] ss:$8 sps:$4 sm:$0xff]  }
 0x241   : > { %vm5412_vm1 = vcmp.ne.s32.totalorder %v8245_v41, 0  ;;  %v5811_v41 = vld [vmem:[#allocation8 + $0x260] ss:$8 sps:$4 sm:$0xff]  }
 0x242   : > { %vm5413_vm5 = vcmp.ne.s32.totalorder %v8246_v39, 0  ;;  %v5816_v39 = vld [vmem:[#allocation8 + $0x274] ss:$8 sps:$4 sm:$0xff]  }
 0x243   : > { %1464 = vmatpush1.bf16.msra.mxu1 %v5778_v2  ;;  %v5793_v2 = vld [vmem:[#allocation8 + $0x200] ss:$8 sps:$4 sm:$0xff]   ;;  %vm7283_vm6 = vmpackc.low %vm5412_vm1, %vm5413_vm5 }
 0x244   : > { %1465 = vmatprep.subr.bf16.mxu1 %v5783_v46  ;;  %v5798_v46 = vld [vmem:[#allocation8 + $0x214] ss:$8 sps:$4 sm:$0xff]  }
 0x247   : > { %1466 = vmatpush1.bf16.msra.mxu1 %v5781_v7  ;;  %v6096_v7 = vld [vmem:[#allocation11 + $0x250] ss:$8 sps:$4 sm:$0xff]  }
 0x248   : > { %1467 = vmatprep.subr.bf16.mxu1 %v5786_v1  ;;  %v8249_v1 = vpack.c.bf16 %v7054_v34, %v7051_v33  ;;  %v5799_v33 = vld [vmem:[#allocation8 + $0x220] ss:$8 sps:$4 sm:$0xff]   ;;  %v6102_v34 = vld [vmem:[#allocation11 + $0x270] ss:$8 sps:$4 sm:$0xff]  }
 0x24b   : > { %1468 = vmatpush1.bf16.msra.mxu1 %v5784_v16  ;;  %v5801_v16 = vld [vmem:[#allocation8 + $0x224] ss:$8 sps:$4 sm:$0xff]  }
 0x24c   : > { %1469 = vmatprep.subr.bf16.mxu1 %v5789_v43  ;;  %v8251_v43 = vand.u32 7, %v7038_v23  ;;  %v8256_v23 = vpack.c.bf16 %v7186_v13, %v7170_v30  ;;  %v5810_v30 = vld [vmem:[#allocation8 + $0x254] ss:$8 sps:$4 sm:$0xff]   ;;  %v8261_v13 = vpack.c.bf16 %v7173_v40, %v7162_v29  ;;  %v5814_v29 = vld [vmem:[#allocation8 + $0x270] ss:$8 sps:$4 sm:$0xff]  }
 0x24d   : > { %v5819_v40 = vld [vmem:[#allocation8 + $0x284] ss:$8 sps:$4 sm:$0xff]  }
 0x24e   : > { %vm5414_vm8 = vcmp.ne.s32.totalorder %v8251_v43, 0  ;;  %v5826_v43 = vld [vmem:[#allocation8 + $0x2b0] ss:$8 sps:$4 sm:$0xff]  }
 0x24f   : > { %1470 = vmatpush1.bf16.msra.mxu1 %v5787_v17  ;;  %v8252_v17 = vand.u32 7, %v7035_v22  ;;  %v5802_v22 = vld [vmem:[#allocation8 + $0x230] ss:$8 sps:$4 sm:$0xff]  }
 0x250   : > { %1471 = vmatprep.subr.bf16.mxu1 %v5792_v14  ;;  %v5807_v14 = vld [vmem:[#allocation8 + $0x244] ss:$8 sps:$4 sm:$0xff]  }
 0x251   : > { %vm5415_vm9 = vcmp.ne.s32.totalorder %v8252_v17, 0 }
 0x252   : > { %vm7301_vm11 = vmpackc.low %vm5414_vm8, %vm5415_vm9 }
 0x253   : > { %1472 = vmatpush1.bf16.msra.mxu1 %v5790_v11  ;;  %v8257_v11 = vand.u32 7, %v7095_v61  ;;  %v5813_v61 = vld [vmem:[#allocation8 + $0x264] ss:$8 sps:$4 sm:$0xff]  }
 0x254   : > { %1788 = vmatprep.subr.bf16.mxu1 %v5795_v38  ;;  %v8258_v38 = vand.u32 7, %v7091_v57  ;;  %v5808_v57 = vld [vmem:[#allocation8 + $0x250] ss:$8 sps:$4 sm:$0xff]  }
 0x255   : > { %vm5416_vm12 = vcmp.ne.s32.totalorder %v8257_v11, 0  ;;  %v5835_v11 = vld [vmem:[#allocation8 + $0x2e0] ss:$8 sps:$4 sm:$0xff]  }
 0x256   : > { %4880 = vmatmul.mubr.msk.bf16.vlgmr.msra.gmra.mrb[0].mxu1 %vm7235_vm0, %v8249_v1  ;;  %vm5417_vm13 = vcmp.ne.s32.totalorder %v8258_v38, 0  ;;  %v5828_v1 = vld [vmem:[#allocation8 + $0x2b4] ss:$8 sps:$4 sm:$0xff]  }
 0x257   : > { %4885 = vmatprep.mubr.msk.bf16.mxu1 %vm7283_vm6, %v8250_v18  ;;  %1789 = vmatpush1.bf16.msra.mxu1 %v5793_v2  ;;  %vm7319_vm15 = vmpackc.low %vm5416_vm12, %vm5417_vm13  ;;  %v7347_v2 = vld [vmem:[%s6955_s2 + $0x10] sm:$0xff]  ;;  %v7352_v18 = vld [vmem:[%s6955_s2 + $0x20] sm:$0xff] }
 0x258   : > { %1790 = vmatprep.subr.bf16.mxu1 %v5798_v46  ;;  %v2505_v26 = vrot.slane %v7347_v2, 1  ;;  %v5823_v46 = vld [vmem:[#allocation8 + $0x2a0] ss:$8 sps:$4 sm:$0xff]   ;;  %v5840_v38 = vld [vmem:[#allocation8 + $0x2f4] ss:$8 sps:$4 sm:$0xff]  }
 0x25b   : > { %1791 = vmatpush1.bf16.msra.mxu1 %v5796_v9 }
 0x25c   : > { %1792 = vmatprep.subr.bf16.mxu1 %v5801_v16  ;;  %v2510_v16 = vrot.slane %v7352_v18, 1 }
 0x25e   : > { %4890 = vmatmul.mubr.msk.bf16.gmra.mrb[4].mxu1 %vm7283_vm6, %v8255_v32  ;;  %v7361_v17 = vsel %vm1522_vm4, %v2505_v26, %v2510_v16  ;;  %v5829_v32 = vld [vmem:[#allocation8 + $0x2c0] ss:$8 sps:$4 sm:$0xff]  }
 0x25f   : > { %4895 = vmatprep.mubr.msk.bf16.mxu1 %vm7301_vm11, %v8256_v23  ;;  %1793 = vmatpush1.bf16.msra.mxu1 %v5799_v33  ;;  %v5831_v33 = vld [vmem:[#allocation8 + $0x2c4] ss:$8 sps:$4 sm:$0xff]   ;;  %v5834_v23 = vld [vmem:[#allocation8 + $0x2d4] ss:$8 sps:$4 sm:$0xff]  }
 0x260   : > { %1794 = vmatprep.subr.bf16.mxu1 %v5804_v20  ;;  %v5909_v20 = vld [vmem:[#allocation10 + $0x64] ss:$8 sps:$4 sm:$0xff]  }
 0x263   : > { %1795 = vmatpush1.bf16.msra.mxu1 %v5802_v22  ;;  %v5832_v22 = vld [vmem:[#allocation8 + $0x2d0] ss:$8 sps:$4 sm:$0xff]  }
 0x264   : > { %1796 = vmatprep.subr.bf16.mxu1 %v5807_v14  ;;  %v5837_v14 = vld [vmem:[#allocation8 + $0x2e4] ss:$8 sps:$4 sm:$0xff]  }
 0x266   : > { %4900 = vmatmul.mubr.msk.bf16.gmra.mrb[8].mxu1 %vm7301_vm11, %v8261_v13  ;;  %v5841_v13 = vld [vmem:[#allocation10 + $0x100] ss:$8 sps:$4 sm:$0xff]  }
 0x267   : > { %4905 = vmatprep.mubr.msk.bf16.mxu1 %vm7319_vm15, %v4904_v49  ;;  %1797 = vmatpush1.bf16.msra.mxu1 %v5805_v21  ;;  %v5822_v49 = vld [vmem:[#allocation8 + $0x294] ss:$8 sps:$4 sm:$0xff]   ;;  %v5838_v21 = vld [vmem:[#allocation8 + $0x2f0] ss:$8 sps:$4 sm:$0xff]  }
 0x268   : > { %1798 = vmatprep.subr.bf16.mxu1 %v5810_v30  ;;  %v5843_v30 = vld [vmem:[#allocation10 + $0x104] ss:$8 sps:$4 sm:$0xff]  }
 0x26b   : > { %1799 = vmatpush1.bf16.msra.mxu1 %v5808_v57  ;;  %v5846_v57 = vld [vmem:[#allocation10 + $0x114] ss:$8 sps:$4 sm:$0xff]  }
 0x26c   : > { %1800 = vmatprep.subr.bf16.mxu1 %v5813_v61  ;;  %v8263_v61 = vpack.c.bf16 %v7098_v62, %v7057_v35  ;;  %v8265_v35 = vpack.c.bf16 %v7179_v55, %v7137_v44  ;;  %v5850_v62 = vld [vmem:[#allocation10 + $0x130] ss:$8 sps:$4 sm:$0xff]   ;;  %v5861_v55 = vld [vmem:[#allocation10 + $0x164] ss:$8 sps:$4 sm:$0xff]  }
 0x26d   : > { %v5856_v44 = vld [vmem:[#allocation10 + $0x150] ss:$8 sps:$4 sm:$0xff]  }
 0x26e   : > { %4910 = vmatmul.mubr.msk.bf16.gmra.mrb[12].mxu1 %vm7319_vm15, %v4909_v58  ;;  %v7344_v58 = vld [vmem:[%s6955_s2] sm:$0xff] }
 0x26f   : > { %1801 = vmatpush1.bf16.msra.mxu1 %v5811_v41  ;;  %4947 = vmatprep.mubr.msk.bf16.mxu1 %vm7000_vm2, %v8262_v15  ;;  %v2504_v42 = vrot.slane %v7344_v58, 1  ;;  %v8264_v41 = vpack.c.bf16 %v7176_v5, %v7130_v25  ;;  %v5849_v15 = vld [vmem:[#allocation10 + $0x124] ss:$8 sps:$4 sm:$0xff]   ;;  %v5853_v5 = vld [vmem:[#allocation10 + $0x140] ss:$8 sps:$4 sm:$0xff]  }
 0x270   : > { %1802 = vmatprep.subr.bf16.mxu1 %v5816_v39  ;;  %v5844_v39 = vld [vmem:[#allocation10 + $0x110] ss:$8 sps:$4 sm:$0xff]   ;;  %v5855_v25 = vld [vmem:[#allocation10 + $0x144] ss:$8 sps:$4 sm:$0xff]  }
 0x271   : > { %v7355_v9 = vsel %vm1522_vm4, %v2504_v42, %v2505_v26  ;;  %v5871_v42 = vld [vmem:[#allocation10 + $0x1a0] ss:$8 sps:$4 sm:$0xff]   ;;  %v5879_v26 = vld [vmem:[#allocation10 + $0x1c4] ss:$8 sps:$4 sm:$0xff]  }
 0x273   : > { %1803 = vmatpush1.bf16.msra.mxu1 %v5814_v29  ;;  %v5847_v29 = vld [vmem:[#allocation10 + $0x120] ss:$8 sps:$4 sm:$0xff]  }
 0x274   : > { %1804 = vmatprep.subr.bf16.mxu1 %v5819_v40  ;;  %v5852_v40 = vld [vmem:[#allocation10 + $0x134] ss:$8 sps:$4 sm:$0xff]  }
 0x277   : > { %1805 = vmatpush1.bf16.msra.mxu1 %v5817_v36  ;;  %v5858_v36 = vld [vmem:[#allocation10 + $0x154] ss:$8 sps:$4 sm:$0xff]  }
 0x278   : > { %1806 = vmatprep.subr.bf16.mxu1 %v5822_v49  ;;  %v5870_v49 = vld [vmem:[#allocation10 + $0x194] ss:$8 sps:$4 sm:$0xff]  }
 0x27b   : > { %1807 = vmatpush1.bf16.msra.mxu1 %v5820_v0  ;;  %v5868_v0 = vld [vmem:[#allocation10 + $0x190] ss:$8 sps:$4 sm:$0xff]  }
 0x27c   : > { %1808 = vmatprep.subr.bf16.mxu1 %v5825_v37  ;;  %v5873_v37 = vld [vmem:[#allocation10 + $0x1a4] ss:$8 sps:$4 sm:$0xff]  }
 0x27f   : > { %1809 = vmatpush1.bf16.msra.mxu1 %v5823_v46  ;;  %v5877_v46 = vld [vmem:[#allocation10 + $0x1c0] ss:$8 sps:$4 sm:$0xff]  }
 0x280   : > { %1810 = vmatprep.subr.bf16.mxu1 %v5828_v1  ;;  %v5882_v1 = vld [vmem:[#allocation10 + $0x1d4] ss:$8 sps:$4 sm:$0xff]  }
 0x283   : > { %1811 = vmatpush1.bf16.msra.mxu1 %v5826_v43  ;;  %v5880_v43 = vld [vmem:[#allocation10 + $0x1d0] ss:$8 sps:$4 sm:$0xff]  }
 0x284   : > { %1812 = vmatprep.subr.bf16.mxu1 %v5831_v33  ;;  %v5885_v33 = vld [vmem:[#allocation10 + $0x1e4] ss:$8 sps:$4 sm:$0xff]  }
 0x287   : > { %1813 = vmatpush1.bf16.msra.mxu1 %v5829_v32  ;;  %v5883_v32 = vld [vmem:[#allocation10 + $0x1e0] ss:$8 sps:$4 sm:$0xff]  }
 0x288   : > { %1814 = vmatprep.subr.bf16.mxu1 %v5834_v23  ;;  %v5888_v23 = vld [vmem:[#allocation10 + $0x1f4] ss:$8 sps:$4 sm:$0xff]  }
 0x28b   : > { %1815 = vmatpush1.bf16.msra.mxu1 %v5832_v22  ;;  %v7412_v22 = vld [vmem:[%s6955_s2 + $0x28] sm:$0xff] }
 0x28c   : > { %1816 = vmatprep.subr.bf16.mxu1 %v5837_v14  ;;  %v5886_v14 = vld [vmem:[#allocation10 + $0x1f0] ss:$8 sps:$4 sm:$0xff]  }
 0x28f   : > { %1817 = vmatpush1.bf16.msra.mxu1 %v5835_v11  ;;  %v2507_v11 = vrot.slane %v7396_v60, 1 }
 0x290   : > { %1818 = vmatprep.subr.bf16.mxu1 %v5840_v38  ;;  %v2508_v38 = vrot.slane %v7399_v19, 1 }
 0x293   : > { %1819 = vmatpush1.bf16.msra.mxu1 %v5838_v21  ;;  %v7417_v21 = vld [vmem:[%s6955_s2 + $0x38] sm:$0xff] }
 0x294   : > { %2198 = vmatprep.subr.bf16.mxu1 %v5843_v30  ;;  %v2512_v30 = vrot.slane %v7412_v22, 1 }
 0x296   : > { %4952 = vmatmul.mubr.msk.bf16.vlgmr.msra.gmra.mrb[0].mxu1 %vm7000_vm2, %v8263_v61  ;;  %v7425_v61 = vpack.c.bf16 %v7347_v2, %v7344_v58 }
 0x297   : > { %4957 = vmatprep.mubr.msk.bf16.mxu1 %vm7083_vm7, %v8264_v41  ;;  %2199 = vmatpush1.bf16.msra.mxu1 %v5841_v13  ;;  %v5891_v13 = vld [vmem:[#allocation10 + $0x4] ss:$8 sps:$4 sm:$0xff]   ;;  %v7429_v41 = vpack.c.bf16 %v7417_v21, %v7412_v22 }
 0x298   : > { %2200 = vmatprep.subr.bf16.mxu1 %v5846_v57  ;;  %v7421_v57 = vld [vmem:[%s6955_s2 + $0x48] sm:$0xff] }
 0x29b   : > { %2201 = vmatpush1.bf16.msra.mxu1 %v5844_v39  ;;  %v2516_v39 = vrot.slane %v7417_v21, 1 }
 0x29c   : > { %2202 = vmatprep.subr.bf16.mxu1 %v5849_v15  ;;  %v7433_v15 = vld [vmem:[%s6955_s2 + $0x30] sm:$0xff] }
 0x29d   : > { %v1903_v31 = vrot.slane %v7433_v15, 7 }
 0x29e   : > { %4962 = vmatmul.mubr.msk.bf16.gmra.mrb[4].mxu1 %vm7083_vm7, %v8265_v35  ;;  %v5889_v35 = vld [vmem:[#allocation10] ss:$8 sps:$4 sm:$0xff]  }
 0x29f   : > { %4967 = vmatprep.mubr.msk.bf16.mxu1 %vm7148_vm10, %v4966_v53  ;;  %2203 = vmatpush1.bf16.msra.mxu1 %v5847_v29  ;;  %v5859_v53 = vld [vmem:[#allocation10 + $0x160] ss:$8 sps:$4 sm:$0xff]   ;;  %v2520_v29 = vrot.slane %v7421_v57, 1 }
 0x2a0   : > { %2204 = vmatprep.subr.bf16.mxu1 %v5852_v40  ;;  %v7437_v40 = vld [vmem:[%s6955_s2 + $0x40] sm:$0xff] }
 0x2a3   : > { %2205 = vmatpush1.bf16.msra.mxu1 %v5850_v62  ;;  %v2514_v62 = vrot.slane %v7433_v15, 1 }
 0x2a4   : > { %2206 = vmatprep.subr.bf16.mxu1 %v5855_v25  ;;  %v2518_v25 = vrot.slane %v7437_v40, 1 }
 0x2a6   : > { %4972 = vmatmul.mubr.msk.bf16.gmra.mrb[8].mxu1 %vm7148_vm10, %v4971_v47  ;;  %v5862_v47 = vld [vmem:[#allocation10 + $0x170] ss:$8 sps:$4 sm:$0xff]  }
 0x2a7   : > { %4977 = vmatprep.mubr.msk.bf16.mxu1 %vm7213_vm14, %v4976_v28  ;;  %2207 = vmatpush1.bf16.msra.mxu1 %v5853_v5  ;;  %v5865_v28 = vld [vmem:[#allocation10 + $0x180] ss:$8 sps:$4 sm:$0xff]   ;;  %v7442_v5 = vsel %vm1522_vm4, %v2507_v11, %v2508_v38 }
 0x2a8   : > { %2208 = vmatprep.subr.bf16.mxu1 %v5858_v36  ;;  %v7445_v36 = vsel %vm1522_vm4, %v2508_v38, %v2512_v30  ;;  %v5898_v38 = vld [vmem:[#allocation10 + $0x30] ss:$8 sps:$4 sm:$0xff]  }
 0x2ab   : > { %2209 = vmatpush1.bf16.msra.mxu1 %v5856_v44  ;;  %v5894_v44 = vld [vmem:[#allocation10 + $0x14] ss:$8 sps:$4 sm:$0xff]  }
 0x2ac   : > { %2210 = vmatprep.subr.bf16.mxu1 %v5861_v55 }
 0x2ae   : > { %4982 = vmatmul.mubr.msk.bf16.gmra.mrb[12].mxu1 %vm7213_vm14, %v8266_v12  ;;  %v5892_v12 = vld [vmem:[#allocation10 + $0x10] ss:$8 sps:$4 sm:$0xff]  }
 0x2af   : > { %2211 = vmatpush1.bf16.msra.mxu1 %v5859_v53  ;;  %2230 = vmatprep.mubr.bf16.mxu1 %v7403_v48  ;;  %v7451_v53 = vsel %vm1522_vm4, %v2512_v30, %v2516_v39 }
 0x2b0   : > { %2212 = vmatprep.subr.bf16.mxu1 %v5864_v45  ;;  %v7454_v45 = vsel %vm1522_vm4, %v2516_v39, %v2520_v29 }
 0x2b3   : > { %2213 = vmatpush1.bf16.msra.mxu1 %v5862_v47 }
 0x2b4   : > { %2214 = vmatprep.subr.bf16.mxu1 %v5867_v10  ;;  %v7462_v10 = vsel %vm1522_vm4, %v2510_v16, %v2514_v62  ;;  %v7481_v16 = vld [vmem:[%s6955_s2 + $0x50] sm:$0xff] }
 0x2b7   : > { %2215 = vmatpush1.bf16.msra.mxu1 %v5865_v28  ;;  %v7465_v28 = vsel %vm1522_vm4, %v2514_v62, %v2518_v25  ;;  %v5906_v62 = vld [vmem:[#allocation10 + $0x54] ss:$8 sps:$4 sm:$0xff]  }
 0x2b8   : > { %2216 = vmatprep.subr.bf16.mxu1 %v5870_v49  ;;  %v5897_v49 = vld [vmem:[#allocation10 + $0x24] ss:$8 sps:$4 sm:$0xff]  }
 0x2bb   : > { %2217 = vmatpush1.bf16.msra.mxu1 %v5868_v0  ;;  %v7468_v0 = vld [vmem:[%s6955_s2 + $0x58] sm:$0xff] }
 0x2bc   : > { %2218 = vmatprep.subr.bf16.mxu1 %v5873_v37  ;;  %v5904_v37 = vld [vmem:[#allocation10 + $0x50] ss:$8 sps:$4 sm:$0xff]  }
 0x2bf   : > { %2219 = vmatpush1.bf16.msra.mxu1 %v5871_v42  ;;  %v7473_v42 = vld [vmem:[%s6955_s2 + $0x68] sm:$0xff] }
 0x2c0   : > { %2220 = vmatprep.subr.bf16.mxu1 %v5876_v8  ;;  %v7477_v8 = vpack.c.bf16 %v7433_v15, %v7352_v18 }
 0x2c3   : > { %2221 = vmatpush1.bf16.msra.mxu1 %v5874_v54  ;;  %v2524_v54 = vrot.slane %v7468_v0, 1 }
 0x2c4   : > { %2222 = vmatprep.subr.bf16.mxu1 %v5879_v26  ;;  %v2528_v26 = vrot.slane %v7473_v42, 1 }
 0x2c6   : > { %v7498_v11 = vsel %vm1522_vm4, %v2524_v54, %v2528_v26 }
 0x2c7   : > { %2223 = vmatpush1.bf16.msra.mxu1 %v5877_v46  ;;  %v7485_v46 = vld [vmem:[%s6955_s2 + $0x60] sm:$0xff] }
 0x2c8   : > { %2224 = vmatprep.subr.bf16.mxu1 %v5882_v1  ;;  %v5895_v1 = vld [vmem:[#allocation10 + $0x20] ss:$8 sps:$4 sm:$0xff]  }
 0x2cb   : > { %2225 = vmatpush1.bf16.msra.mxu1 %v5880_v43  ;;  %v7489_v43 = vpack.c.bf16 %v7468_v0, %v7421_v57 }
 0x2cc   : > { %2226 = vmatprep.subr.bf16.mxu1 %v5885_v33  ;;  %v2522_v33 = vrot.slane %v7481_v16, 1 }
 0x2cf   : > { %2227 = vmatpush1.bf16.msra.mxu1 %v5883_v32  ;;  %v2526_v32 = vrot.slane %v7485_v46, 1 }
 0x2d0   : > { %2228 = vmatprep.subr.bf16.mxu1 %v5888_v23  ;;  %v5900_v23 = vld [vmem:[#allocation10 + $0x34] ss:$8 sps:$4 sm:$0xff]  }
 0x2d1   : > { %v7507_v39 = vsel %vm1522_vm4, %v2522_v33, %v2526_v32 }
 0x2d3   : > { %2229 = vmatpush1.bf16.msra.mxu1 %v5886_v14  ;;  %v7495_v14 = vsel %vm1522_vm4, %v2520_v29, %v2524_v54  ;;  %v7510_v29 = vld [vmem:[%s6955_s2 + $0x78] sm:$0xff] }
 0x2d4   : > { %2431 = vmatprep.subr.bf16.mxu1 %v5891_v13  ;;  %v7504_v13 = vsel %vm1522_vm4, %v2518_v25, %v2522_v33  ;;  %v5901_v25 = vld [vmem:[#allocation10 + $0x40] ss:$8 sps:$4 sm:$0xff]   ;;  %v7524_v54 = vpack.c.bf16 %v7510_v29, %v7473_v42  ;;  %v1894_v33 = vrot.slane %v7396_v60, 7 }
 0x2d6   : > { %2231 = vmatmul.mubr.bf16.vlgmr.msra.gmra.mrb[0].mxu1 %v7425_v61  ;;  %8267 = vst [vmem:[#allocation34_spill] sm:$0xff] %v7524_v54 }
 0x2d7   : > { %2432 = vmatpush1.bf16.msra.mxu1 %v5889_v35  ;;  %2240 = vmatprep.mubr.bf16.mxu1 %v7429_v41  ;;  %v5903_v35 = vld [vmem:[#allocation10 + $0x44] ss:$8 sps:$4 sm:$0xff]  }
 0x2d8   : > { %2433 = vmatprep.subr.bf16.mxu1 %v5894_v44  ;;  %v7516_v44 = vpack.c.bf16 %v7481_v16, %v7437_v40 }
 0x2db   : > { %2434 = vmatpush1.bf16.msra.mxu1 %v5892_v12  ;;  %v2532_v12 = vrot.slane %v7510_v29, 1 }
 0x2dc   : > { %2435 = vmatprep.subr.bf16.mxu1 %v5897_v49  ;;  %v7520_v49 = vld [vmem:[%s6955_s2 + $0x70] sm:$0xff]  ;;  %s4598_s2 = scalar_lea.sflag [#allocation4], %s6941_s17 }
 0x2dd   : > { %v7531_v30 = vsel %vm1522_vm4, %v2528_v26, %v2532_v12  ;;  %v7553_v47 = vpack.c.bf16 %v7520_v49, %v7485_v46 }
 0x2de   : > { %2241 = vmatmul.mubr.bf16.gmra.mrb[4].mxu1 %v7477_v8 }
 0x2df   : > { %2436 = vmatpush1.bf16.msra.mxu1 %v5895_v1  ;;  %2250 = vmatprep.mubr.bf16.mxu1 %v7489_v43  ;;  %v2530_v1 = vrot.slane %v7520_v49, 1  ;;  %8268 = vst [vmem:[#allocation35_spill] sm:$0xff] %v7553_v47 }
 0x2e0   : > { %2437 = vmatprep.subr.bf16.mxu1 %v5900_v23  ;;  %v8173_v23 = vrot.slane %v7399_v19, 7 }
 0x2e1   : > { %v7540_v60 = vsel %vm1522_vm4, %v2526_v32, %v2530_v1  ;;  %v5907_v32 = vld [vmem:[#allocation10 + $0x60] ss:$8 sps:$4 sm:$0xff]  }
 0x2e2   : > { %v1898_v26 = vsel %vm902_vm3, %v1894_v33, %v8173_v23  ;;  %v5910_v23 = vld [vmem:[#allocation10 + $0x70] ss:$8 sps:$4 sm:$0xff]  }
 0x2e3   : > { %2438 = vmatpush1.bf16.msra.mxu1 %v5898_v38  ;;  %v7534_v38 = vsel %vm1522_vm4, %v2532_v12, 0.0  ;;  %v1940_v12 = vsel %vm902_vm3, 0.0, %v1894_v33  ;;  %v5990_v33 = vld [vmem:[#allocation11 + $0x114] ss:$8 sps:$4 sm:$0xff]  }
 0x2e4   : > { %2439 = vmatprep.subr.bf16.mxu1 %v5903_v35  ;;  %v7543_v35 = vsel %vm1522_vm4, %v2530_v1, 0.0  ;;  %v5050_v55 = vpack.c.bf16 %v1898_v26, %v1940_v12  ;;  %v5912_v1 = vld [vmem:[#allocation10 + $0x74] ss:$8 sps:$4 sm:$0xff]   ;;  %v5991_v12 = vld [vmem:[#allocation11 + $0x120] ss:$8 sps:$4 sm:$0xff]  }
 0x2e5   : > { %v5918_v26 = vld [vmem:[#allocation10 + $0x94] ss:$8 sps:$4 sm:$0xff]  }
 0x2e6   : > { %2251 = vmatmul.mubr.bf16.gmra.mrb[8].mxu1 %v7516_v44 }
 0x2e7   : > { %2440 = vmatpush1.bf16.msra.mxu1 %v5901_v25  ;;  %2260 = vmatprep.mubr.bf16.mxu1 %v7524_v54  ;;  %v5915_v25 = vld [vmem:[#allocation10 + $0x84] ss:$8 sps:$4 sm:$0xff]  }
 0x2e8   : > { %2441 = vmatprep.subr.bf16.mxu1 %v5906_v62  ;;  %v5985_v62 = vld [vmem:[#allocation11 + $0x100] ss:$8 sps:$4 sm:$0xff]  }
 0x2e9   : > { %3272 = vmatpush1.bf16.msra.mxu0 %v5985_v62  ;;  %v5919_v62 = vld [vmem:[#allocation10 + $0xa0] ss:$8 sps:$4 sm:$0xff]  }
 0x2ea   : > { %3273 = vmatprep.subr.bf16.mxu0 %v5990_v33  ;;  %v5924_v33 = vld [vmem:[#allocation10 + $0xb4] ss:$8 sps:$4 sm:$0xff]  }
 0x2eb   : > { %2442 = vmatpush1.bf16.msra.mxu1 %v5904_v37  ;;  %v5993_v37 = vld [vmem:[#allocation11 + $0x124] ss:$8 sps:$4 sm:$0xff]  }
 0x2ec   : > { %2443 = vmatprep.subr.bf16.mxu1 %v5909_v20  ;;  %v5913_v20 = vld [vmem:[#allocation10 + $0x80] ss:$8 sps:$4 sm:$0xff]  }
 0x2ed   : > { %3274 = vmatpush1.bf16.msra.mxu0 %v5988_v56  ;;  %v5922_v56 = vld [vmem:[#allocation10 + $0xb0] ss:$8 sps:$4 sm:$0xff]  }
 0x2ee   : > { %2261 = vmatmul.mubr.bf16.gmra.mrb[12].mxu1 %v7553_v47  ;;  %3275 = vmatprep.subr.bf16.mxu0 %v5993_v37  ;;  %v5927_v37 = vld [vmem:[#allocation10 + $0xc4] ss:$8 sps:$4 sm:$0xff]   ;;  %v5937_v47 = vld [vmem:[#allocation10 + $0x200] ss:$8 sps:$4 sm:$0xff]  }
 0x2ef   : > { %2444 = vmatpush1.bf16.msra.mxu1 %v5907_v32  ;;  %5051 = vmatprep.mubr.msk.bf16.mxu1 %vm7235_vm0, %v5050_v55  ;;  %v5996_v32 = vld [vmem:[#allocation11 + $0x134] ss:$8 sps:$4 sm:$0xff]   ;;  %v5921_v55 = vld [vmem:[#allocation10 + $0xa4] ss:$8 sps:$4 sm:$0xff]  }
 0x2f0   : > { %2445 = vmatprep.subr.bf16.mxu1 %v5912_v1  ;;  %v5994_v1 = vld [vmem:[#allocation11 + $0x130] ss:$8 sps:$4 sm:$0xff]  }
 0x2f1   : > { %3276 = vmatpush1.bf16.msra.mxu0 %v5991_v12  ;;  %v5925_v12 = vld [vmem:[#allocation10 + $0xc0] ss:$8 sps:$4 sm:$0xff]  }
 0x2f2   : > { %3277 = vmatprep.subr.bf16.mxu0 %v5996_v32  ;;  %v5930_v32 = vld [vmem:[#allocation10 + $0xd4] ss:$8 sps:$4 sm:$0xff]  }
 0x2f3   : > { %2446 = vmatpush1.bf16.msra.mxu1 %v5910_v23  ;;  %v5997_v23 = vld [vmem:[#allocation11 + $0x140] ss:$8 sps:$4 sm:$0xff]  }
 0x2f4   : > { %2447 = vmatprep.subr.bf16.mxu1 %v5915_v25  ;;  %v6002_v25 = vld [vmem:[#allocation11 + $0x154] ss:$8 sps:$4 sm:$0xff]  }
 0x2f5   : > { %3278 = vmatpush1.bf16.msra.mxu0 %v5994_v1  ;;  %v5928_v1 = vld [vmem:[#allocation10 + $0xd0] ss:$8 sps:$4 sm:$0xff]  }
 0x2f6   : > { %3279 = vmatprep.subr.bf16.mxu0 %v5999_v52  ;;  %v5933_v52 = vld [vmem:[#allocation10 + $0xe4] ss:$8 sps:$4 sm:$0xff]  }
 0x2f7   : > { %2448 = vmatpush1.bf16.msra.mxu1 %v5913_v20  ;;  %v6000_v20 = vld [vmem:[#allocation11 + $0x150] ss:$8 sps:$4 sm:$0xff]  }
 0x2f8   : > { %2449 = vmatprep.subr.bf16.mxu1 %v5918_v26  ;;  %v6005_v26 = vld [vmem:[#allocation11 + $0x164] ss:$8 sps:$4 sm:$0xff]  }
 0x2f9   : > { %3280 = vmatpush1.bf16.msra.mxu0 %v5997_v23  ;;  %v1893_v23 = vrot.slane %v7344_v58, 7 }
 0x2fa   : > { %3281 = vmatprep.subr.bf16.mxu0 %v6002_v25  ;;  %v1895_v25 = vrot.slane %v7347_v2, 7  ;;  %v5939_v2 = vld [vmem:[#allocation10 + $0x204] ss:$8 sps:$4 sm:$0xff]  }
 0x2fb   : > { %2450 = vmatpush1.bf16.msra.mxu1 %v5916_v27  ;;  %v6003_v27 = vld [vmem:[#allocation11 + $0x160] ss:$8 sps:$4 sm:$0xff]   ;;  %v1939_v58 = vsel %vm902_vm3, 0.0, %v1893_v23 }
 0x2fc   : > { %2451 = vmatprep.subr.bf16.mxu1 %v5921_v55  ;;  %v6008_v55 = vld [vmem:[#allocation11 + $0x174] ss:$8 sps:$4 sm:$0xff]  }
 0x2fd   : > { %3282 = vmatpush1.bf16.msra.mxu0 %v6000_v20  ;;  %v1905_v20 = vrot.slane %v7417_v21, 7 }
 0x2fe   : > { %3283 = vmatprep.subr.bf16.mxu0 %v6005_v26  ;;  %v5936_v26 = vld [vmem:[#allocation10 + $0xf4] ss:$8 sps:$4 sm:$0xff]  }
 0x2ff   : > { %2452 = vmatpush1.bf16.msra.mxu1 %v5919_v62  ;;  %v6006_v62 = vld [vmem:[#allocation11 + $0x170] ss:$8 sps:$4 sm:$0xff]  }
 0x300   : > { %2453 = vmatprep.subr.bf16.mxu1 %v5924_v33  ;;  %v6011_v33 = vld [vmem:[#allocation11 + $0x184] ss:$8 sps:$4 sm:$0xff]  }
 0x301   : > { %3284 = vmatpush1.bf16.msra.mxu0 %v6003_v27  ;;  %v5934_v27 = vld [vmem:[#allocation10 + $0xf0] ss:$8 sps:$4 sm:$0xff]  }
 0x302   : > { %3285 = vmatprep.subr.bf16.mxu0 %v6008_v55  ;;  %v1896_v55 = vsel %vm902_vm3, %v1893_v23, %v1895_v25 }
 0x303   : > { %2454 = vmatpush1.bf16.msra.mxu1 %v5922_v56  ;;  %v5931_v56 = vld [vmem:[#allocation10 + $0xe0] ss:$8 sps:$4 sm:$0xff]  }
 0x304   : > { %2455 = vmatprep.subr.bf16.mxu1 %v5927_v37  ;;  %v1901_v37 = vrot.slane %v7412_v22, 7 }
 0x305   : > { %3286 = vmatpush1.bf16.msra.mxu0 %v6006_v62  ;;  %v5055_v62 = vpack.c.bf16 %v1896_v55, %v1939_v58  ;;  %v6018_v55 = vld [vmem:[#allocation11 + $0x1b0] ss:$8 sps:$4 sm:$0xff]  }
 0x306   : > { %3287 = vmatprep.subr.bf16.mxu0 %v6011_v33  ;;  %v1906_v21 = vsel %vm902_vm3, %v1901_v37, %v1905_v20  ;;  %v6017_v33 = vld [vmem:[#allocation11 + $0x1a4] ss:$8 sps:$4 sm:$0xff]  }
 0x307   : > { %2456 = vmatpush1.bf16.msra.mxu1 %v5925_v12  ;;  %v6009_v12 = vld [vmem:[#allocation11 + $0x180] ss:$8 sps:$4 sm:$0xff]  }
 0x308   : > { %2457 = vmatprep.subr.bf16.mxu1 %v5930_v32  ;;  %v6014_v32 = vld [vmem:[#allocation11 + $0x194] ss:$8 sps:$4 sm:$0xff]  }
 0x309   : > { %3288 = vmatpush1.bf16.msra.mxu0 %v6009_v12  ;;  %v6020_v12 = vld [vmem:[#allocation11 + $0x1b4] ss:$8 sps:$4 sm:$0xff]  }
 0x30a   : > { %3289 = vmatprep.subr.bf16.mxu0 %v6014_v32 }
 0x30b   : > { %2458 = vmatpush1.bf16.msra.mxu1 %v5928_v1  ;;  %v8269_v1 = vrot.slane %v7399_v19, 7  ;;  %v1913_v19 = vrot.slane %v7468_v0, 7  ;;  %v5945_v0 = vld [vmem:[#allocation10 + $0x224] ss:$8 sps:$4 sm:$0xff]  }
 0x30c   : > { %2459 = vmatprep.subr.bf16.mxu1 %v5933_v52  ;;  %v6012_v52 = vld [vmem:[#allocation11 + $0x190] ss:$8 sps:$4 sm:$0xff]  }
 0x30d   : > { %v1902_v22 = vsel %vm902_vm3, %v8269_v1, %v1901_v37  ;;  %v5942_v1 = vld [vmem:[#allocation10 + $0x214] ss:$8 sps:$4 sm:$0xff]   ;;  %3290 = vmatpush1.bf16.msra.mxu0 %v6012_v52  ;;  %v6015_v37 = vld [vmem:[#allocation11 + $0x1a0] ss:$8 sps:$4 sm:$0xff]   ;;  %v1917_v52 = vrot.slane %v7473_v42, 7 }
 0x30e   : > { %v5060_v23 = vpack.c.bf16 %v1906_v21, %v1902_v22  ;;  %3291 = vmatprep.subr.bf16.mxu0 %v6017_v33  ;;  %v1911_v22 = vrot.slane %v7481_v16, 7  ;;  %v5943_v21 = vld [vmem:[#allocation10 + $0x220] ss:$8 sps:$4 sm:$0xff]  }
 0x30f   : > { %2460 = vmatpush1.bf16.msra.mxu1 %v5931_v56  ;;  %v1899_v56 = vrot.slane %v7352_v18, 7  ;;  %v5940_v18 = vld [vmem:[#allocation10 + $0x210] ss:$8 sps:$4 sm:$0xff]   ;;  %v6021_v33 = vld [vmem:[#allocation11 + $0x1c0] ss:$8 sps:$4 sm:$0xff]  }
 0x310   : > { %2461 = vmatprep.subr.bf16.mxu1 %v5936_v26  ;;  %v1909_v26 = vrot.slane %v7421_v57, 7 }
 0x311   : > { %v1900_v15 = vsel %vm902_vm3, %v1895_v25, %v1899_v56  ;;  %v1904_v57 = vsel %vm902_vm3, %v1899_v56, %v1903_v31  ;;  %3292 = vmatpush1.bf16.msra.mxu0 %v6015_v37  ;;  %v6026_v56 = vld [vmem:[#allocation11 + $0x1d4] ss:$8 sps:$4 sm:$0xff]  }
 0x312   : > { %v1910_v32 = vsel %vm902_vm3, %v1905_v20, %v1909_v26  ;;  %v5065_v58 = vpack.c.bf16 %v1904_v57, %v1900_v15  ;;  %3293 = vmatprep.subr.bf16.mxu0 %v6020_v12  ;;  %v5948_v20 = vld [vmem:[#allocation10 + $0x234] ss:$8 sps:$4 sm:$0xff]   ;;  %v1915_v12 = vrot.slane %v7485_v46, 7  ;;  %v5949_v15 = vld [vmem:[#allocation10 + $0x240] ss:$8 sps:$4 sm:$0xff]  }
 0x313   : > { %2462 = vmatpush1.bf16.msra.mxu1 %v5934_v27  ;;  %v1914_v27 = vsel %vm902_vm3, %v1909_v26, %v1913_v19 }
 0x314   : > { %2769 = vmatprep.subr.bf16.mxu1 %v5939_v2  ;;  %v6023_v2 = vld [vmem:[#allocation11 + $0x1c4] ss:$8 sps:$4 sm:$0xff]   ;;  %v5070_v25 = vpack.c.bf16 %v1914_v27, %v1910_v32  ;;  %v5955_v27 = vld [vmem:[#allocation10 + $0x260] ss:$8 sps:$4 sm:$0xff]  }
 0x315   : > { %3294 = vmatpush1.bf16.msra.mxu0 %v6018_v55  ;;  %v5960_v55 = vld [vmem:[#allocation10 + $0x274] ss:$8 sps:$4 sm:$0xff]  }
 0x316   : > { %5056 = vmatmul.mubr.msk.bf16.vlgmr.msra.gmra.mrb[0].mxu1 %vm7235_vm0, %v5055_v62  ;;  %v1921_v62 = vrot.slane %v7510_v29, 7  ;;  %3295 = vmatprep.subr.bf16.mxu0 %v6023_v2  ;;  %v5951_v29 = vld [vmem:[#allocation10 + $0x244] ss:$8 sps:$4 sm:$0xff]   ;;  %v8270_v2 = vpack.c.bf16 %v7445_v36, %v7442_v5  ;;  %v5973_v36 = vld [vmem:[#allocation10 + $0x2c0] ss:$8 sps:$4 sm:$0xff]  }
 0x317   : > { %2770 = vmatpush1.bf16.msra.mxu1 %v5937_v47  ;;  %5061 = vmatprep.mubr.msk.bf16.mxu1 %vm7283_vm6, %v5060_v23  ;;  %v1907_v47 = vrot.slane %v7437_v40, 7  ;;  %v5946_v40 = vld [vmem:[#allocation10 + $0x230] ss:$8 sps:$4 sm:$0xff]   ;;  %v1918_v23 = vsel %vm902_vm3, %v1913_v19, %v1917_v52  ;;  %v5975_v5 = vld [vmem:[#allocation10 + $0x2c4] ss:$8 sps:$4 sm:$0xff]  }
 0x318   : > { %2771 = vmatprep.subr.bf16.mxu1 %v5942_v1  ;;  %v1922_v26 = vsel %vm902_vm3, %v1917_v52, %v1921_v62  ;;  %v6024_v1 = vld [vmem:[#allocation11 + $0x1d0] ss:$8 sps:$4 sm:$0xff]   ;;  %v5969_v52 = vld [vmem:[#allocation10 + $0x2a4] ss:$8 sps:$4 sm:$0xff]   ;;  %v5967_v62 = vld [vmem:[#allocation10 + $0x2a0] ss:$8 sps:$4 sm:$0xff]  }
 0x319   : > { %v1908_v16 = vsel %vm902_vm3, %v1903_v31, %v1907_v47  ;;  %v1912_v42 = vsel %vm902_vm3, %v1907_v47, %v1911_v22  ;;  %3296 = vmatpush1.bf16.msra.mxu0 %v6021_v33  ;;  %v5080_v57 = vpack.c.bf16 %v1922_v26, %v1918_v23  ;;  %v5954_v31 = vld [vmem:[#allocation10 + $0x254] ss:$8 sps:$4 sm:$0xff]   ;;  %v5952_v19 = vld [vmem:[#allocation10 + $0x250] ss:$8 sps:$4 sm:$0xff]   ;;  %v5963_v47 = vld [vmem:[#allocation10 + $0x284] ss:$8 sps:$4 sm:$0xff]   ;;  %v8271_v26 = vpack.c.bf16 %v7361_v17, %v7355_v9 }
 0x31a   : > { %v5075_v37 = vpack.c.bf16 %v1912_v42, %v1908_v16  ;;  %3297 = vmatprep.subr.bf16.mxu0 %v6026_v56  ;;  %v5970_v33 = vld [vmem:[#allocation10 + $0x2b0] ss:$8 sps:$4 sm:$0xff]   ;;  %v5978_v56 = vld [vmem:[#allocation10 + $0x2d4] ss:$8 sps:$4 sm:$0xff]   ;;  %v5981_v16 = vld [vmem:[#allocation10 + $0x2e4] ss:$8 sps:$4 sm:$0xff]   ;;  %v8275_v9 = vpack.c.bf16 %v7507_v39, %v7504_v13  ;;  %v8276_v17 = vpack.c.bf16 %v7534_v38, %v7531_v30 }
 0x31b   : > { %2772 = vmatpush1.bf16.msra.mxu1 %v5940_v18  ;;  %v1919_v18 = vrot.slane %v7520_v49, 7  ;;  %v5957_v49 = vld [vmem:[#allocation10 + $0x264] ss:$8 sps:$4 sm:$0xff]   ;;  %v5979_v42 = vld [vmem:[#allocation10 + $0x2e0] ss:$8 sps:$4 sm:$0xff]  }
 0x31c   : > { %2773 = vmatprep.subr.bf16.mxu1 %v5945_v0  ;;  %v1916_v0 = vsel %vm902_vm3, %v1911_v22, %v1915_v12  ;;  %v5961_v22 = vld [vmem:[#allocation10 + $0x280] ss:$8 sps:$4 sm:$0xff]   ;;  %v5982_v23 = vld [vmem:[#allocation10 + $0x2f0] ss:$8 sps:$4 sm:$0xff]  }
 0x31d   : > { %3298 = vmatpush1.bf16.msra.mxu0 %v6024_v1  ;;  %v1920_v46 = vsel %vm902_vm3, %v1915_v12, %v1919_v18  ;;  %v8272_v1 = vpack.c.bf16 %v7454_v45, %v7451_v53  ;;  %v8274_v12 = vpack.c.bf16 %v7498_v11, %v7495_v14  ;;  %v8277_v53 = vpack.c.bf16 %v7543_v35, %v7540_v60  ;;  %v6029_v45 = vld [vmem:[#allocation11 + $0x1e4] ss:$8 sps:$4 sm:$0xff]   ;;  %v6030_v14 = vld [vmem:[#allocation11 + $0x1f0] ss:$8 sps:$4 sm:$0xff]   ;;  %v2874_v30 = vld [vmem:[%s8278_s30] sm:$0x3] }
 0x31e   : > { %5066 = vmatmul.mubr.msk.bf16.gmra.mrb[4].mxu1 %vm7283_vm6, %v5065_v58  ;;  %v5085_v32 = vpack.c.bf16 %v1920_v46, %v1916_v0  ;;  %v5958_v58 = vld [vmem:[#allocation10 + $0x270] ss:$8 sps:$4 sm:$0xff]   ;;  %3299 = vmatprep.subr.bf16.mxu0 %v6029_v45  ;;  %v6035_v11 = vld [vmem:[#allocation11 + $0x4] ss:$8 sps:$4 sm:$0xff]   ;;  %v7646_v13 = vrot.slane %v2874_v30, %v7005_v4  ;;  %v7649_v39 = vrot.slane %v2874_v30, %v7011_v6  ;;  %v6038_v30 = vld [vmem:[#allocation11 + $0x14] ss:$8 sps:$4 sm:$0xff]  }
 0x31f   : > { %2774 = vmatpush1.bf16.msra.mxu1 %v5943_v21  ;;  %5071 = vmatprep.mubr.msk.bf16.mxu1 %vm7301_vm11, %v5070_v25  ;;  %v5966_v21 = vld [vmem:[#allocation10 + $0x294] ss:$8 sps:$4 sm:$0xff]   ;;  %v5964_v25 = vld [vmem:[#allocation10 + $0x290] ss:$8 sps:$4 sm:$0xff]  }
 0x320   : > { %2775 = vmatprep.subr.bf16.mxu1 %v5948_v20  ;;  %v5972_v20 = vld [vmem:[#allocation10 + $0x2b4] ss:$8 sps:$4 sm:$0xff]  }
 0x323   : > { %2776 = vmatpush1.bf16.msra.mxu1 %v5946_v40  ;;  %v5976_v40 = vld [vmem:[#allocation10 + $0x2d0] ss:$8 sps:$4 sm:$0xff]  }
 0x324   : > { %2777 = vmatprep.subr.bf16.mxu1 %v5951_v29  ;;  %v5984_v29 = vld [vmem:[#allocation10 + $0x2f4] ss:$8 sps:$4 sm:$0xff]  }
 0x326   : > { %5076 = vmatmul.mubr.msk.bf16.gmra.mrb[8].mxu1 %vm7301_vm11, %v5075_v37  ;;  %v8273_v37 = vpack.c.bf16 %v7465_v28, %v7462_v10  ;;  %v6027_v10 = vld [vmem:[#allocation11 + $0x1e0] ss:$8 sps:$4 sm:$0xff]   ;;  %v6032_v28 = vld [vmem:[#allocation11 + $0x1f4] ss:$8 sps:$4 sm:$0xff]  }
 0x327   : > { %2778 = vmatpush1.bf16.msra.mxu1 %v5949_v15  ;;  %5081 = vmatprep.mubr.msk.bf16.mxu1 %vm7319_vm15, %v5080_v57 }
 0x328   : > { %2779 = vmatprep.subr.bf16.mxu1 %v5954_v31  ;;  %3300 = vmatpush1.bf16.msra.mxu0 %v6027_v10  ;;  %v6033_v10 = vld [vmem:[#allocation11] ss:$8 sps:$4 sm:$0xff]  }
 0x329   : > { %3301 = vmatprep.subr.bf16.mxu0 %v6032_v28 }
 0x32b   : > { %2780 = vmatpush1.bf16.msra.mxu1 %v5952_v19 }
 0x32c   : > { %2781 = vmatprep.subr.bf16.mxu1 %v5957_v49  ;;  %3302 = vmatpush1.bf16.msra.mxu0 %v6030_v14 }
 0x32d   : > { %3504 = vmatprep.subr.bf16.mxu0 %v6035_v11 }
 0x32e   : > { %5086 = vmatmul.mubr.msk.bf16.gmra.mrb[12].mxu1 %vm7319_vm15, %v5085_v32 }
 0x32f   : > { %2782 = vmatpush1.bf16.msra.mxu1 %v5955_v27  ;;  %5123 = vmatprep.mubr.msk.bf16.mxu1 %vm7000_vm2, %v8270_v2 }
 0x330   : > { %2783 = vmatprep.subr.bf16.mxu1 %v5960_v55 }
 0x333   : > { %2784 = vmatpush1.bf16.msra.mxu1 %v5958_v58 }
 0x334   : > { %2785 = vmatprep.subr.bf16.mxu1 %v5963_v47 }
 0x337   : > { %2786 = vmatpush1.bf16.msra.mxu1 %v5961_v22 }
 0x338   : > { %2787 = vmatprep.subr.bf16.mxu1 %v5966_v21 }
 0x33b   : > { %2788 = vmatpush1.bf16.msra.mxu1 %v5964_v25 }
 0x33c   : > { %2789 = vmatprep.subr.bf16.mxu1 %v5969_v52 }
 0x33f   : > { %2790 = vmatpush1.bf16.msra.mxu1 %v5967_v62 }
 0x340   : > { %2791 = vmatprep.subr.bf16.mxu1 %v5972_v20 }
 0x343   : > { %2792 = vmatpush1.bf16.msra.mxu1 %v5970_v33 }
 0x344   : > { %2793 = vmatprep.subr.bf16.mxu1 %v5975_v5 }
 0x347   : > { %2794 = vmatpush1.bf16.msra.mxu1 %v5973_v36 }
 0x348   : > { %2795 = vmatprep.subr.bf16.mxu1 %v5978_v56 }
 0x34b   : > { %2796 = vmatpush1.bf16.msra.mxu1 %v5976_v40 }
 0x34c   : > { %2797 = vmatprep.subr.bf16.mxu1 %v5981_v16 }
 0x34f   : > { %2798 = vmatpush1.bf16.msra.mxu1 %v5979_v42 }
 0x350   : > { %2799 = vmatprep.subr.bf16.mxu1 %v5984_v29 }
 0x353   : > { %2800 = vmatpush1.bf16.msra.mxu1 %v5982_v23 }
 0x356   : > { %5128 = vmatmul.mubr.msk.bf16.vlgmr.msra.gmra.mrb[0].mxu1 %vm7000_vm2, %v8271_v26 }
 0x357   : > { %5133 = vmatprep.mubr.msk.bf16.mxu1 %vm7083_vm7, %v8272_v1 }
 0x35e   : > { %5138 = vmatmul.mubr.msk.bf16.gmra.mrb[4].mxu1 %vm7083_vm7, %v8273_v37 }
 0x35f   : > { %5143 = vmatprep.mubr.msk.bf16.mxu1 %vm7148_vm10, %v8274_v12 }
 0x366   : > { %5148 = vmatmul.mubr.msk.bf16.gmra.mrb[8].mxu1 %vm7148_vm10, %v8275_v9 }
 0x367   : > { %5153 = vmatprep.mubr.msk.bf16.mxu1 %vm7213_vm14, %v8276_v17 }
 0x36e   : > { %5158 = vmatmul.mubr.msk.bf16.gmra.mrb[12].mxu1 %vm7213_vm14, %v8277_v53 }
 0x429   : > { %v2803_v38 = vpop.f32.mrb[0].mxu1 }
 0x42a   : > { %v2886_v60 = vadd.f32 %v7646_v13, %v2803_v38  ;;  %v2805_v35 = vpop.f32.mrb[1].mxu1 }
 0x42b   : > { %v2887_v18 = vadd.f32 %v7649_v39, %v2805_v35  ;;  %v2807_v15 = vpop.f32.mrb[2].mxu1 }
 0x42c   : > { %vm2902_vm1 = vcmp.gt.f32.partialorder %v2886_v60, 0.0  ;;  %v2918_v57 = vmul.f32 0.2, %v2886_v60  ;;  %v2888_v31 = vadd.f32 %v7646_v13, %v2807_v15  ;;  %v2809_v19 = vpop.f32.mrb[3].mxu1 }
 0x42d   : > { %vm2903_vm5 = vcmp.gt.f32.partialorder %v2887_v18, 0.0  ;;  %v2919_v0 = vmul.f32 0.2, %v2887_v18  ;;  %v2889_v46 = vadd.f32 %v7649_v39, %v2809_v19 }
 0x42e   : > { %v2934_v49 = vsel %vm2902_vm1, %v2886_v60, %v2918_v57  ;;  %vm2904_vm8 = vcmp.gt.f32.partialorder %v2888_v31, 0.0  ;;  %v2920_v32 = vmul.f32 0.2, %v2888_v31 }
 0x42f   : > { %v2966_v27 = vrot.slane %v2934_v49, 7  ;;  %v2935_v55 = vsel %vm2903_vm5, %v2887_v18, %v2919_v0  ;;  %vm2905_vm9 = vcmp.gt.f32.partialorder %v2889_v46, 0.0  ;;  %v3577_v58 = vrot.slane %v2934_v49, 1 }
 0x430   : > { %v2967_v2 = vrot.slane %v2935_v55, 7  ;;  %v7655_v47 = vsel %vm2904_vm8, %v2888_v31, %v2920_v32  ;;  %v2921_v22 = vmul.f32 0.2, %v2889_v46  ;;  %v3580_v21 = vrot.slane %v2935_v55, 1  ;;  %v6036_v32 = vld [vmem:[#allocation11 + $0x10] ss:$8 sps:$4 sm:$0xff]  }
 0x431   : > { %v2968_v25 = vrot.slane %v7655_v47, 7  ;;  %v3070_v52 = vpack.c.bf16 %v7655_v47, %v2934_v49  ;;  %v3578_v62 = vrot.slane %v7655_v47, 1  ;;  %v2813_v20 = vpop.f32.mrb[4].mxu1  ;;  %v7661_v33 = vsel %vm902_vm3, 0.0, %v2966_v27 }
 0x432   : > { %v7663_v5 = vsel %vm2905_vm9, %v2889_v46, %v2921_v22  ;;  %v2890_v36 = vadd.f32 %v7646_v13, %v2813_v20  ;;  %v2815_v56 = vpop.f32.mrb[5].mxu1  ;;  %v7667_v40 = vsel %vm902_vm3, 0.0, %v2967_v2 }
 0x433   : > { %v7672_v16 = vsel %vm902_vm3, %v2966_v27, %v2968_v25  ;;  %v7675_v42 = vsel %vm1522_vm4, %v3577_v58, %v3578_v62  ;;  %v2970_v29 = vrot.slane %v7663_v5, 7  ;;  %v8179_v23 = vrot.slane %v7663_v5, 1  ;;  %v2817_v26 = vpop.f32.mrb[6].mxu1 }
 0x434   : > { %vm2906_vm12 = vcmp.gt.f32.partialorder %v2890_v36, 0.0  ;;  %v2922_v37 = vmul.f32 0.2, %v2890_v36  ;;  %v2891_v12 = vadd.f32 %v7649_v39, %v2815_v56  ;;  %v2819_v9 = vpop.f32.mrb[7].mxu1  ;;  %v2892_v17 = vadd.f32 %v7646_v13, %v2817_v26 }
 0x435   : > { %v2893_v53 = vadd.f32 %v7649_v39, %v2819_v9  ;;  %v3071_v45 = vpack.c.bf16 %v7663_v5, %v2935_v55  ;;  %v7686_v28 = vsel %vm902_vm3, %v2967_v2, %v2970_v29  ;;  %v7699_v31 = vsel %vm1522_vm4, %v3580_v21, %v8179_v23 }
 0x436   : > { %v7688_v14 = vsel %vm2906_vm12, %v2890_v36, %v2922_v37  ;;  %vm2907_vm13 = vcmp.gt.f32.partialorder %v2891_v12, 0.0  ;;  %v2923_v11 = vmul.f32 0.2, %v2891_v12  ;;  %vm2908_vm1 = vcmp.gt.f32.partialorder %v2892_v17, 0.0 }
 0x437   : > { %v2972_v60 = vrot.slane %v7688_v14, 7  ;;  %v8178_v35 = vrot.slane %v7688_v14, 1  ;;  %v2924_v18 = vmul.f32 0.2, %v2892_v17  ;;  %3303 = vmatprep.mubr.bf16.mxu0 %v3071_v45  ;;  %vm2909_vm5 = vcmp.gt.f32.partialorder %v2893_v53, 0.0 }
 0x438   : > { %v7694_v15 = vsel %vm2907_vm13, %v2891_v12, %v2923_v11  ;;  %v2925_v57 = vmul.f32 0.2, %v2893_v53  ;;  %3304 = vmatmul.mubr.bf16.vlgmr.msra.gmra.mrb[16].mxu0 %v3070_v52  ;;  %v6041_v52 = vld [vmem:[#allocation11 + $0x24] ss:$8 sps:$4 sm:$0xff]  }
 0x439   : > { %v7704_v19 = vsel %vm1522_vm4, %v3578_v62, %v8178_v35  ;;  %v2974_v0 = vrot.slane %v7694_v15, 7  ;;  %v7708_v49 = vsel %vm2908_vm1, %v2892_v17, %v2924_v18  ;;  %3505 = vmatpush1.bf16.msra.mxu0 %v6033_v10  ;;  %v2823_v27 = vpop.f32.mrb[8].mxu1  ;;  %v6039_v17 = vld [vmem:[#allocation11 + $0x20] ss:$8 sps:$4 sm:$0xff]  }
 0x43a   : > { %v2976_v58 = vrot.slane %v7708_v49, 7  ;;  %v7714_v22 = vsel %vm2909_vm5, %v2893_v53, %v2925_v57  ;;  %3506 = vmatprep.subr.bf16.mxu0 %v6038_v30  ;;  %v2825_v21 = vpop.f32.mrb[9].mxu1  ;;  %v2894_v36 = vadd.f32 %v7646_v13, %v2823_v27  ;;  %v3072_v53 = vpack.c.bf16 %v7708_v49, %v7688_v14  ;;  %v6044_v57 = vld [vmem:[#allocation11 + $0x34] ss:$8 sps:$4 sm:$0xff]  }
 0x43b   : > { %v2978_v62 = vrot.slane %v7714_v22, 7  ;;  %v2895_v56 = vadd.f32 %v7649_v39, %v2825_v21  ;;  %v2827_v26 = vpop.f32.mrb[10].mxu1  ;;  %v3073_v9 = vpack.c.bf16 %v7714_v22, %v7694_v15  ;;  %v7726_v45 = vsel %vm902_vm3, %v2970_v29, %v2974_v0 }
 0x43c   : > { %v2896_v37 = vadd.f32 %v7646_v13, %v2827_v26  ;;  %v2829_v12 = vpop.f32.mrb[11].mxu1  ;;  %vm2910_vm8 = vcmp.gt.f32.partialorder %v2894_v36, 0.0  ;;  %v2926_v10 = vmul.f32 0.2, %v2894_v36 }
 0x43d   : > { %3507 = vmatpush1.bf16.msra.mxu0 %v6036_v32  ;;  %vm2911_vm9 = vcmp.gt.f32.partialorder %v2895_v56, 0.0  ;;  %v2927_v11 = vmul.f32 0.2, %v2895_v56  ;;  %v2897_v18 = vadd.f32 %v7649_v39, %v2829_v12  ;;  %3313 = vmatprep.mubr.bf16.mxu0 %v3073_v9  ;;  %v7730_v27 = vsel %vm902_vm3, %v2974_v0, %v2978_v62 }
 0x43e   : > { %vm2912_vm12 = vcmp.gt.f32.partialorder %v2896_v37, 0.0  ;;  %v2928_v30 = vmul.f32 0.2, %v2896_v37  ;;  %3508 = vmatprep.subr.bf16.mxu0 %v6041_v52  ;;  %v7732_v21 = vsel %vm2910_vm8, %v2894_v36, %v2926_v10  ;;  %v7743_v32 = vsel %vm902_vm3, %v2968_v25, %v2972_v60  ;;  %v6042_v10 = vld [vmem:[#allocation11 + $0x30] ss:$8 sps:$4 sm:$0xff]  }
 0x43f   : > { %v7734_v26 = vsel %vm2911_vm9, %v2895_v56, %v2927_v11  ;;  %v2980_v52 = vrot.slane %v7732_v21, 7  ;;  %vm2913_vm13 = vcmp.gt.f32.partialorder %v2897_v18, 0.0  ;;  %v2929_v9 = vmul.f32 0.2, %v2897_v18 }
 0x440   : > { %v2982_v0 = vrot.slane %v7734_v26, 7  ;;  %3314 = vmatmul.mubr.bf16.gmra.mrb[20].mxu0 %v3072_v53  ;;  %v7750_v56 = vsel %vm2912_vm12, %v2896_v37, %v2928_v30  ;;  %v7757_v25 = vsel %vm902_vm3, %v2972_v60, %v2976_v58  ;;  %v6047_v30 = vld [vmem:[#allocation11 + $0x44] ss:$8 sps:$4 sm:$0xff]   ;;  %v6045_v60 = vld [vmem:[#allocation11 + $0x40] ss:$8 sps:$4 sm:$0xff]  }
 0x441   : > { %3509 = vmatpush1.bf16.msra.mxu0 %v6039_v17  ;;  %v2833_v47 = vpop.f32.mrb[12].mxu1  ;;  %v2984_v11 = vrot.slane %v7750_v56, 7  ;;  %v3074_v17 = vpack.c.bf16 %v7750_v56, %v7732_v21  ;;  %v7764_v29 = vsel %vm2913_vm13, %v2897_v18, %v2929_v9 }
 0x442   : > { %3510 = vmatprep.subr.bf16.mxu0 %v6044_v57  ;;  %v2898_v37 = vadd.f32 %v7646_v13, %v2833_v47  ;;  %v2835_v53 = vpop.f32.mrb[13].mxu1  ;;  %v7770_v12 = vsel %vm902_vm3, %v2978_v62, %v2982_v0  ;;  %v2986_v57 = vrot.slane %v7764_v29, 7  ;;  %v3075_v62 = vpack.c.bf16 %v7764_v29, %v7734_v26 }
 0x443   : > { %v2899_v1 = vadd.f32 %v7649_v39, %v2835_v53  ;;  %v2837_v38 = vpop.f32.mrb[14].mxu1 }
 0x444   : > { %vm2914_vm1 = vcmp.gt.f32.partialorder %v2898_v37, 0.0  ;;  %v2930_v55 = vmul.f32 0.2, %v2898_v37  ;;  %v2839_v35 = vpop.f32.mrb[15].mxu1  ;;  %v2900_v9 = vadd.f32 %v7646_v13, %v2837_v38  ;;  %v7781_v36 = vsel %vm902_vm3, %v2982_v0, %v2986_v57  ;;  %v6050_v38 = vld [vmem:[#allocation11 + $0x54] ss:$8 sps:$4 sm:$0xff]   ;;  %3323 = vmatprep.mubr.bf16.mxu0 %v3075_v62 }
 0x445   : > { %3511 = vmatpush1.bf16.msra.mxu0 %v6042_v10  ;;  %vm2915_vm5 = vcmp.gt.f32.partialorder %v2899_v1, 0.0  ;;  %v2931_v18 = vmul.f32 0.2, %v2899_v1  ;;  %v2901_v53 = vadd.f32 %v7649_v39, %v2839_v35  ;;  %v7786_v10 = vsel %vm902_vm3, %v2976_v58, %v2980_v52 }
 0x446   : > { %v7776_v2 = vsel %vm2914_vm1, %v2898_v37, %v2930_v55  ;;  %3512 = vmatprep.subr.bf16.mxu0 %v6047_v30  ;;  %vm2916_vm8 = vcmp.gt.f32.partialorder %v2900_v9, 0.0  ;;  %v2932_v37 = vmul.f32 0.2, %v2900_v9  ;;  %v7793_v58 = vsel %vm902_vm3, %v2980_v52, %v2984_v11 }
 0x447   : > { %v2988_v47 = vrot.slane %v7776_v2, 7  ;;  %v3599_v13 = vrot.slane %v7776_v2, 1  ;;  %v2947_v39 = vsel %vm2915_vm5, %v2899_v1, %v2931_v18  ;;  %vm2917_vm9 = vcmp.gt.f32.partialorder %v2901_v53, 0.0  ;;  %v6048_v1 = vld [vmem:[#allocation11 + $0x50] ss:$8 sps:$4 sm:$0xff]  }
 0x448   : > { %v2990_v35 = vrot.slane %v2947_v39, 7  ;;  %v3601_v55 = vrot.slane %v2947_v39, 1  ;;  %v2933_v30 = vmul.f32 0.2, %v2901_v53  ;;  %3324 = vmatmul.mubr.bf16.gmra.mrb[24].mxu0 %v3074_v17  ;;  %v2948_v23 = vsel %vm2916_vm8, %v2900_v9, %v2932_v37  ;;  %v6053_v9 = vld [vmem:[#allocation11 + $0x64] ss:$8 sps:$4 sm:$0xff]  }
 0x449   : > { %v7796_v20 = vsel %vm902_vm3, %v2984_v11, %v2988_v47  ;;  %3513 = vmatpush1.bf16.msra.mxu0 %v6045_v60  ;;  %v8279_v17 = vrot.slane %v7694_v15, 1  ;;  %v8280_v62 = vrot.slane %v7663_v5, 1  ;;  %v2992_v52 = vrot.slane %v2948_v23, 7  ;;  %v6051_v15 = vld [vmem:[#allocation11 + $0x60] ss:$8 sps:$4 sm:$0xff]  }
 0x44a   : > { %v7801_v46 = vsel %vm902_vm3, %v2986_v57, %v2990_v35  ;;  %v3603_v6 = vrot.slane %v2948_v23, 1  ;;  %v2949_v11 = vsel %vm2917_vm9, %v2901_v53, %v2933_v30  ;;  %3514 = vmatprep.subr.bf16.mxu0 %v6050_v38  ;;  %v3076_v60 = vpack.c.bf16 %v2948_v23, %v7776_v2 }
 0x44b   : > { %v7808_v0 = vsel %vm1522_vm4, %v8280_v62, %v8279_v17  ;;  %v2994_v37 = vrot.slane %v2949_v11, 7  ;;  %v3605_v4 = vrot.slane %v2949_v11, 1  ;;  %v3077_v18 = vpack.c.bf16 %v2949_v11, %v2947_v39 }
 0x44c   : > { %v5298_v57 = vpack.c.bf16 %v7808_v0, %v7699_v31  ;;  %v7814_v54 = vsel %vm902_vm3, %v2988_v47, %v2992_v52  ;;  %v8281_v5 = vrot.slane %v7714_v22, 1  ;;  %v8282_v53 = vrot.slane %v7734_v26, 1  ;;  %v6114_v31 = vld [vmem:[#allocation11 + $0x2b0] ss:$8 sps:$4 sm:$0xff]   ;;  %v6119_v0 = vld [vmem:[#allocation11 + $0x2c4] ss:$8 sps:$4 sm:$0xff]  }
 0x44d   : > { %v8284_v39 = vrot.slane %v7708_v49, 1  ;;  %v8285_v38 = vrot.slane %v7688_v14, 1  ;;  %3515 = vmatpush1.bf16.msra.mxu0 %v6048_v1  ;;  %3333 = vmatprep.mubr.bf16.mxu0 %v3077_v18  ;;  %v7838_v30 = vsel %vm902_vm3, %v2990_v35, %v2994_v37  ;;  %v5261_v52 = vpack.c.bf16 %v7814_v54, %v7796_v20  ;;  %v6056_v14 = vld [vmem:[#allocation11 + $0x74] ss:$8 sps:$4 sm:$0xff]   ;;  %v6113_v54 = vld [vmem:[#allocation11 + $0x2a4] ss:$8 sps:$4 sm:$0xff]  }
 0x44e   : > { %v7821_v62 = vsel %vm1522_vm4, %v8279_v17, %v8281_v5  ;;  %v8283_v23 = vmov %v8281_v5  ;;  %v7845_v11 = vsel %vm1522_vm4, %v3605_v4, 0.0  ;;  %3516 = vmatprep.subr.bf16.mxu0 %v6053_v9  ;;  %v5256_v5 = vpack.c.bf16 %v7838_v30, %v7801_v46  ;;  %v6107_v46 = vld [vmem:[#allocation11 + $0x284] ss:$8 sps:$4 sm:$0xff]   ;;  %v6108_v30 = vld [vmem:[#allocation11 + $0x290] ss:$8 sps:$4 sm:$0xff]  }
 0x44f   : > { %v7828_v2 = vsel %vm1522_vm4, %v8283_v23, %v8282_v53  ;;  %v7835_v47 = vsel %vm1522_vm4, %v8285_v38, %v8284_v39  ;;  %v8286_v1 = vrot.slane %v7732_v21, 1  ;;  %v8287_v18 = vmov %v8284_v39  ;;  %v6116_v20 = vld [vmem:[#allocation11 + $0x2b4] ss:$8 sps:$4 sm:$0xff]  }
 0x450   : > { %v5308_v22 = vpack.c.bf16 %v7828_v2, %v7821_v62  ;;  %v8288_v37 = vrot.slane %v7764_v29, 1  ;;  %v8289_v17 = vmov %v8282_v53  ;;  %v8291_v38 = vrot.slane %v7750_v56, 1  ;;  %3334 = vmatmul.mubr.bf16.gmra.mrb[28].mxu0 %v3076_v60  ;;  %v6054_v60 = vld [vmem:[#allocation11 + $0x70] ss:$8 sps:$4 sm:$0xff]   ;;  %v6146_v62 = vld [vmem:[#allocation14 + $0x54] ss:$8 sps:$4 sm:$0xff]  }
 0x451   : > { %v7854_v35 = vsel %vm1522_vm4, %v8287_v18, %v8286_v1  ;;  %v7893_v21 = vsel %vm1522_vm4, %v3603_v6, 0.0  ;;  %3517 = vmatpush1.bf16.msra.mxu0 %v6051_v15  ;;  %v8293_v56 = vpack.c.bf16 %v7686_v28, %v7667_v40  ;;  %v6060_v15 = vld [vmem:[#allocation11 + $0x90] ss:$8 sps:$4 sm:$0xff]   ;;  %v6065_v40 = vld [vmem:[#allocation11 + $0xa4] ss:$8 sps:$4 sm:$0xff]   ;;  %v8297_v63 = vpack.c.bf16 %v7781_v36, %v7770_v12 }
 0x452   : > { %v7861_v53 = vsel %vm1522_vm4, %v8289_v17, %v8288_v37  ;;  %v8290_v9 = vmov %v8288_v37  ;;  %v5313_v39 = vpack.c.bf16 %v7854_v35, %v7835_v47  ;;  %v7877_v26 = vsel %vm1522_vm4, %v8286_v1, %v8291_v38  ;;  %3518 = vmatprep.subr.bf16.mxu0 %v6056_v14  ;;  %v6063_v28 = vld [vmem:[#allocation11 + $0xa0] ss:$8 sps:$4 sm:$0xff]   ;;  %v6068_v1 = vld [vmem:[#allocation11 + $0xb4] ss:$8 sps:$4 sm:$0xff]   ;;  %v6101_v12 = vld [vmem:[#allocation11 + $0x264] ss:$8 sps:$4 sm:$0xff]  }
 0x453   : > { %v7866_v23 = vsel %vm1522_vm4, %v8290_v9, %v3601_v55  ;;  %v8292_v18 = vmov %v8291_v38  ;;  %v7887_v17 = vsel %vm1522_vm4, %v3601_v55, %v3605_v4  ;;  %v7890_v9 = vsel %vm1522_vm4, %v3599_v13, %v3603_v6  ;;  %5227 = vmatprep.mubr.msk.bf16.mxu0 %vm7235_vm0, %v8293_v56  ;;  %v6057_v55 = vld [vmem:[#allocation11 + $0x80] ss:$8 sps:$4 sm:$0xff]   ;;  %v6062_v6 = vld [vmem:[#allocation11 + $0x94] ss:$8 sps:$4 sm:$0xff]   ;;  %v6071_v56 = vld [vmem:[#allocation11 + $0xc4] ss:$8 sps:$4 sm:$0xff]  }
 0x454   : > { %v5318_v49 = vpack.c.bf16 %v7866_v23, %v7861_v53  ;;  %v7882_v29 = vsel %vm1522_vm4, %v8292_v18, %v3599_v13  ;;  %v5328_v38 = vpack.c.bf16 %v7845_v11, %v7887_v17  ;;  %v6059_v13 = vld [vmem:[#allocation11 + $0x84] ss:$8 sps:$4 sm:$0xff]   ;;  %v6066_v18 = vld [vmem:[#allocation11 + $0xb0] ss:$8 sps:$4 sm:$0xff]   ;;  %v6069_v4 = vld [vmem:[#allocation11 + $0xc0] ss:$8 sps:$4 sm:$0xff]   ;;  %v8300_v35 = vpack.c.bf16 %v7893_v21, %v7890_v9 }
 0x455   : > { %v5323_v37 = vpack.c.bf16 %v7882_v29, %v7877_v26  ;;  %3519 = vmatpush1.bf16.msra.mxu0 %v6054_v60  ;;  %v6074_v14 = vld [vmem:[#allocation11 + $0xd4] ss:$8 sps:$4 sm:$0xff]   ;;  %v6072_v60 = vld [vmem:[#allocation11 + $0xd0] ss:$8 sps:$4 sm:$0xff]   ;;  %v6099_v36 = vld [vmem:[#allocation11 + $0x260] ss:$8 sps:$4 sm:$0xff]  }
 0x456   : > { %3520 = vmatprep.subr.bf16.mxu0 %v6059_v13  ;;  %v6077_v13 = vld [vmem:[#allocation11 + $0xe4] ss:$8 sps:$4 sm:$0xff]   ;;  %v6147_v47 = vld [vmem:[#allocation14 + $0x60] ss:$8 sps:$4 sm:$0xff]   ;;  %v6158_v23 = vld [vmem:[#allocation14 + $0x94] ss:$8 sps:$4 sm:$0xff]  }
 0x457   : > { %v6149_v2 = vld [vmem:[#allocation14 + $0x64] ss:$8 sps:$4 sm:$0xff]   ;;  %v6153_v53 = vld [vmem:[#allocation14 + $0x80] ss:$8 sps:$4 sm:$0xff]   ;;  %v6164_v29 = vld [vmem:[#allocation14 + $0xb4] ss:$8 sps:$4 sm:$0xff]  }
 0x458   : > { %v6155_v11 = vld [vmem:[#allocation14 + $0x84] ss:$8 sps:$4 sm:$0xff]   ;;  %v6159_v26 = vld [vmem:[#allocation14 + $0xa0] ss:$8 sps:$4 sm:$0xff]   ;;  %v6170_v17 = vld [vmem:[#allocation14 + $0xd4] ss:$8 sps:$4 sm:$0xff]  }
 0x459   : > { %3521 = vmatpush1.bf16.msra.mxu0 %v6057_v55  ;;  %v6075_v55 = vld [vmem:[#allocation11 + $0xe0] ss:$8 sps:$4 sm:$0xff]   ;;  %v6168_v9 = vld [vmem:[#allocation14 + $0xd0] ss:$8 sps:$4 sm:$0xff]   ;;  %v6173_v21 = vld [vmem:[#allocation14 + $0xe4] ss:$8 sps:$4 sm:$0xff]  }
 0x45a   : > { %3522 = vmatprep.subr.bf16.mxu0 %v6062_v6  ;;  %v6080_v6 = vld [vmem:[#allocation11 + $0xf4] ss:$8 sps:$4 sm:$0xff]  }
 0x45d   : > { %3523 = vmatpush1.bf16.msra.mxu0 %v6060_v15  ;;  %v6078_v15 = vld [vmem:[#allocation11 + $0xf0] ss:$8 sps:$4 sm:$0xff]  }
 0x45e   : > { %3524 = vmatprep.subr.bf16.mxu0 %v6065_v40  ;;  %v6083_v40 = vld [vmem:[#allocation11 + $0x204] ss:$8 sps:$4 sm:$0xff]  }
 0x461   : > { %3525 = vmatpush1.bf16.msra.mxu0 %v6063_v28  ;;  %v6081_v28 = vld [vmem:[#allocation11 + $0x200] ss:$8 sps:$4 sm:$0xff]  }
 0x462   : > { %3526 = vmatprep.subr.bf16.mxu0 %v6068_v1  ;;  %v6086_v1 = vld [vmem:[#allocation11 + $0x214] ss:$8 sps:$4 sm:$0xff]  }
 0x465   : > { %3527 = vmatpush1.bf16.msra.mxu0 %v6066_v18  ;;  %v8294_v18 = vpack.c.bf16 %v7672_v16, %v7661_v33  ;;  %v8296_v33 = vpack.c.bf16 %v7757_v25, %v7743_v32  ;;  %v6090_v16 = vld [vmem:[#allocation11 + $0x230] ss:$8 sps:$4 sm:$0xff]   ;;  %v8298_v32 = vpack.c.bf16 %v7793_v58, %v7786_v10  ;;  %v6104_v25 = vld [vmem:[#allocation11 + $0x274] ss:$8 sps:$4 sm:$0xff]   ;;  %v6105_v10 = vld [vmem:[#allocation11 + $0x280] ss:$8 sps:$4 sm:$0xff]  }
 0x466   : > { %3528 = vmatprep.subr.bf16.mxu0 %v6071_v56  ;;  %v6084_v56 = vld [vmem:[#allocation11 + $0x210] ss:$8 sps:$4 sm:$0xff]   ;;  %v6110_v58 = vld [vmem:[#allocation11 + $0x294] ss:$8 sps:$4 sm:$0xff]  }
 0x469   : > { %3529 = vmatpush1.bf16.msra.mxu0 %v6069_v4  ;;  %v8295_v4 = vpack.c.bf16 %v7730_v27, %v7726_v45  ;;  %v6095_v45 = vld [vmem:[#allocation11 + $0x244] ss:$8 sps:$4 sm:$0xff]   ;;  %v6093_v27 = vld [vmem:[#allocation11 + $0x240] ss:$8 sps:$4 sm:$0xff]  }
 0x46a   : > { %3530 = vmatprep.subr.bf16.mxu0 %v6074_v14  ;;  %v6089_v14 = vld [vmem:[#allocation11 + $0x224] ss:$8 sps:$4 sm:$0xff]  }
 0x46d   : > { %3531 = vmatpush1.bf16.msra.mxu0 %v6072_v60  ;;  %v6087_v60 = vld [vmem:[#allocation11 + $0x220] ss:$8 sps:$4 sm:$0xff]  }
 0x46e   : > { %3532 = vmatprep.subr.bf16.mxu0 %v6077_v13  ;;  %v6092_v13 = vld [vmem:[#allocation11 + $0x234] ss:$8 sps:$4 sm:$0xff]  }
 0x471   : > { %3533 = vmatpush1.bf16.msra.mxu0 %v6075_v55  ;;  %v6098_v55 = vld [vmem:[#allocation11 + $0x254] ss:$8 sps:$4 sm:$0xff]  }
 0x472   : > { %3534 = vmatprep.subr.bf16.mxu0 %v6080_v6  ;;  %v6125_v6 = vld [vmem:[#allocation11 + $0x2e4] ss:$8 sps:$4 sm:$0xff]  }
 0x475   : > { %3535 = vmatpush1.bf16.msra.mxu0 %v6078_v15  ;;  %v6123_v15 = vld [vmem:[#allocation11 + $0x2e0] ss:$8 sps:$4 sm:$0xff]  }
 0x476   : > { %3842 = vmatprep.subr.bf16.mxu0 %v6083_v40  ;;  %v6128_v40 = vld [vmem:[#allocation11 + $0x2f4] ss:$8 sps:$4 sm:$0xff]  }
 0x478   : > { %5232 = vmatmul.mubr.msk.bf16.vlgmr.msra.gmra.mrb[16].mxu0 %vm7235_vm0, %v8294_v18  ;;  %v6129_v18 = vld [vmem:[#allocation14] ss:$8 sps:$4 sm:$0xff]  }
 0x479   : > { %5237 = vmatprep.mubr.msk.bf16.mxu0 %vm7283_vm6, %v8295_v4  ;;  %3843 = vmatpush1.bf16.msra.mxu0 %v6081_v28  ;;  %v6126_v28 = vld [vmem:[#allocation11 + $0x2f0] ss:$8 sps:$4 sm:$0xff]   ;;  %v6134_v4 = vld [vmem:[#allocation14 + $0x14] ss:$8 sps:$4 sm:$0xff]  }
 0x47a   : > { %3844 = vmatprep.subr.bf16.mxu0 %v6086_v1  ;;  %v6131_v1 = vld [vmem:[#allocation14 + $0x4] ss:$8 sps:$4 sm:$0xff]  }
 0x47d   : > { %3845 = vmatpush1.bf16.msra.mxu0 %v6084_v56  ;;  %v8299_v56 = vpack.c.bf16 %v7704_v19, %v7675_v42  ;;  %v6143_v42 = vld [vmem:[#allocation14 + $0x44] ss:$8 sps:$4 sm:$0xff]   ;;  %v6141_v19 = vld [vmem:[#allocation14 + $0x40] ss:$8 sps:$4 sm:$0xff]  }
 0x47e   : > { %3846 = vmatprep.subr.bf16.mxu0 %v6089_v14  ;;  %v6132_v14 = vld [vmem:[#allocation14 + $0x10] ss:$8 sps:$4 sm:$0xff]  }
 0x480   : > { %5242 = vmatmul.mubr.msk.bf16.gmra.mrb[20].mxu0 %vm7283_vm6, %v8296_v33  ;;  %v6140_v33 = vld [vmem:[#allocation14 + $0x34] ss:$8 sps:$4 sm:$0xff]  }
 0x481   : > { %5247 = vmatprep.mubr.msk.bf16.mxu0 %vm7301_vm11, %v8297_v63  ;;  %3847 = vmatpush1.bf16.msra.mxu0 %v6087_v60  ;;  %v6137_v60 = vld [vmem:[#allocation14 + $0x24] ss:$8 sps:$4 sm:$0xff]   ;;  %v6176_v63 = vld [vmem:[#allocation14 + $0xf4] ss:$8 sps:$4 sm:$0xff]  }
 0x482   : > { %3848 = vmatprep.subr.bf16.mxu0 %v6092_v13  ;;  %v6135_v13 = vld [vmem:[#allocation14 + $0x20] ss:$8 sps:$4 sm:$0xff]  }
 0x485   : > { %3849 = vmatpush1.bf16.msra.mxu0 %v6090_v16  ;;  %v6174_v16 = vld [vmem:[#allocation14 + $0xf0] ss:$8 sps:$4 sm:$0xff]  }
 0x486   : > { %3850 = vmatprep.subr.bf16.mxu0 %v6095_v45  ;;  %v6179_v45 = vld [vmem:[#allocation13 + $0x4] ss:$8 sps:$4 sm:$0xff]  }
 0x488   : > { %5252 = vmatmul.mubr.msk.bf16.gmra.mrb[24].mxu0 %vm7301_vm11, %v8298_v32  ;;  %v6180_v32 = vld [vmem:[#allocation13 + $0x10] ss:$8 sps:$4 sm:$0xff]  }
 0x489   : > { %5257 = vmatprep.mubr.msk.bf16.mxu0 %vm7319_vm15, %v5256_v5  ;;  %3851 = vmatpush1.bf16.msra.mxu0 %v6093_v27  ;;  %v6120_v5 = vld [vmem:[#allocation11 + $0x2d0] ss:$8 sps:$4 sm:$0xff]   ;;  %v6177_v27 = vld [vmem:[#allocation13] ss:$8 sps:$4 sm:$0xff]  }
 0x48a   : > { %3852 = vmatprep.subr.bf16.mxu0 %v6098_v55  ;;  %v6182_v55 = vld [vmem:[#allocation13 + $0x14] ss:$8 sps:$4 sm:$0xff]  }
 0x48d   : > { %3853 = vmatpush1.bf16.msra.mxu0 %v6096_v7  ;;  %v6185_v7 = vld [vmem:[#allocation13 + $0x24] ss:$8 sps:$4 sm:$0xff]  }
 0x48e   : > { %3854 = vmatprep.subr.bf16.mxu0 %v6101_v12  ;;  %v6183_v12 = vld [vmem:[#allocation13 + $0x20] ss:$8 sps:$4 sm:$0xff]  }
 0x490   : > { %5262 = vmatmul.mubr.msk.bf16.gmra.mrb[28].mxu0 %vm7319_vm15, %v5261_v52  ;;  %v6122_v52 = vld [vmem:[#allocation11 + $0x2d4] ss:$8 sps:$4 sm:$0xff]  }
 0x491   : > { %3855 = vmatpush1.bf16.msra.mxu0 %v6099_v36  ;;  %5299 = vmatprep.mubr.msk.bf16.mxu0 %vm7000_vm2, %v5298_v57  ;;  %v6117_v57 = vld [vmem:[#allocation11 + $0x2c0] ss:$8 sps:$4 sm:$0xff]   ;;  %v6188_v36 = vld [vmem:[#allocation13 + $0x34] ss:$8 sps:$4 sm:$0xff]  }
 0x492   : > { %3856 = vmatprep.subr.bf16.mxu0 %v6104_v25  ;;  %v6186_v25 = vld [vmem:[#allocation13 + $0x30] ss:$8 sps:$4 sm:$0xff]  }
 0x495   : > { %3857 = vmatpush1.bf16.msra.mxu0 %v6102_v34  ;;  %v6191_v34 = vld [vmem:[#allocation13 + $0x44] ss:$8 sps:$4 sm:$0xff]  }
 0x496   : > { %3858 = vmatprep.subr.bf16.mxu0 %v6107_v46  ;;  %v6194_v46 = vld [vmem:[#allocation13 + $0x54] ss:$8 sps:$4 sm:$0xff]  }
 0x499   : > { %3859 = vmatpush1.bf16.msra.mxu0 %v6105_v10  ;;  %v8301_v10 = vld [vmem:[#allocation34_spill] sm:$0xff] }
 0x49a   : > { %3860 = vmatprep.subr.bf16.mxu0 %v6110_v58  ;;  %v6197_v58 = vld [vmem:[#allocation13 + $0x64] ss:$8 sps:$4 sm:$0xff]  }
 0x49d   : > { %3861 = vmatpush1.bf16.msra.mxu0 %v6108_v30  ;;  %v6200_v30 = vld [vmem:[#allocation13 + $0x74] ss:$8 sps:$4 sm:$0xff]  }
 0x49e   : > { %3862 = vmatprep.subr.bf16.mxu0 %v6113_v54  ;;  %v8302_v54 = vld [vmem:[#allocation35_spill] sm:$0xff] }
 0x4a1   : > { %3863 = vmatpush1.bf16.msra.mxu0 %v6111_v24  ;;  %v6198_v24 = vld [vmem:[#allocation13 + $0x70] ss:$8 sps:$4 sm:$0xff]  }
 0x4a2   : > { %3864 = vmatprep.subr.bf16.mxu0 %v6116_v20  ;;  %v6203_v20 = vld [vmem:[#allocation13 + $0x84] ss:$8 sps:$4 sm:$0xff]  }
 0x4a5   : > { %3865 = vmatpush1.bf16.msra.mxu0 %v6114_v31  ;;  %v6206_v31 = vld [vmem:[#allocation13 + $0x94] ss:$8 sps:$4 sm:$0xff]  }
 0x4a6   : > { %3866 = vmatprep.subr.bf16.mxu0 %v6119_v0  ;;  %v6204_v0 = vld [vmem:[#allocation13 + $0x90] ss:$8 sps:$4 sm:$0xff]  }
 0x4a9   : > { %3867 = vmatpush1.bf16.msra.mxu0 %v6117_v57  ;;  %v6209_v57 = vld [vmem:[#allocation13 + $0xa4] ss:$8 sps:$4 sm:$0xff]  }
 0x4aa   : > { %3868 = vmatprep.subr.bf16.mxu0 %v6122_v52  ;;  %v6207_v52 = vld [vmem:[#allocation13 + $0xa0] ss:$8 sps:$4 sm:$0xff]  }
 0x4ad   : > { %3869 = vmatpush1.bf16.msra.mxu0 %v6120_v5  ;;  %v6212_v5 = vld [vmem:[#allocation13 + $0xb4] ss:$8 sps:$4 sm:$0xff]  }
 0x4ae   : > { %3870 = vmatprep.subr.bf16.mxu0 %v6125_v6  ;;  %v6210_v6 = vld [vmem:[#allocation13 + $0xb0] ss:$8 sps:$4 sm:$0xff]  }
 0x4b1   : > { %3871 = vmatpush1.bf16.msra.mxu0 %v6123_v15  ;;  %v6215_v15 = vld [vmem:[#allocation13 + $0xc4] ss:$8 sps:$4 sm:$0xff]  }
 0x4b2   : > { %3872 = vmatprep.subr.bf16.mxu0 %v6128_v40  ;;  %v6213_v40 = vld [vmem:[#allocation13 + $0xc0] ss:$8 sps:$4 sm:$0xff]  }
 0x4b5   : > { %3873 = vmatpush1.bf16.msra.mxu0 %v6126_v28  ;;  %v6218_v28 = vld [vmem:[#allocation13 + $0xd4] ss:$8 sps:$4 sm:$0xff]  }
 0x4b6   : > { %4231 = vmatprep.subr.bf16.mxu0 %v6131_v1  ;;  %v6216_v1 = vld [vmem:[#allocation13 + $0xd0] ss:$8 sps:$4 sm:$0xff]  }
 0x4b8   : > { %5304 = vmatmul.mubr.msk.bf16.vlgmr.msra.gmra.mrb[16].mxu0 %vm7000_vm2, %v8299_v56  ;;  %v6224_v56 = vld [vmem:[#allocation13 + $0xf4] ss:$8 sps:$4 sm:$0xff]  }
 0x4b9   : > { %5309 = vmatprep.mubr.msk.bf16.mxu0 %vm7083_vm7, %v5308_v22  ;;  %4232 = vmatpush1.bf16.msra.mxu0 %v6129_v18  ;;  %v6152_v22 = vld [vmem:[#allocation14 + $0x74] ss:$8 sps:$4 sm:$0xff]   ;;  %v6221_v18 = vld [vmem:[#allocation13 + $0xe4] ss:$8 sps:$4 sm:$0xff]  }
 0x4ba   : > { %4233 = vmatprep.subr.bf16.mxu0 %v6134_v4  ;;  %v6219_v4 = vld [vmem:[#allocation13 + $0xe0] ss:$8 sps:$4 sm:$0xff]  }
 0x4bd   : > { %4234 = vmatpush1.bf16.msra.mxu0 %v6132_v14  ;;  %v6222_v14 = vld [vmem:[#allocation13 + $0xf0] ss:$8 sps:$4 sm:$0xff]  }
 0x4be   : > { %4235 = vmatprep.subr.bf16.mxu0 %v6137_v60  ;;  %v8304_v60 = vld [vmem:[#allocation26_spill] sm:$0xff] }
 0x4c0   : > { %5314 = vmatmul.mubr.msk.bf16.gmra.mrb[20].mxu0 %vm7083_vm7, %v5313_v39  ;;  %v6156_v39 = vld [vmem:[#allocation14 + $0x90] ss:$8 sps:$4 sm:$0xff]  }
 0x4c1   : > { %5319 = vmatprep.mubr.msk.bf16.mxu0 %vm7148_vm10, %v5318_v49  ;;  %4236 = vmatpush1.bf16.msra.mxu0 %v6135_v13  ;;  %v6161_v49 = vld [vmem:[#allocation14 + $0xa4] ss:$8 sps:$4 sm:$0xff]  }
 0x4c2   : > { %4237 = vmatprep.subr.bf16.mxu0 %v6140_v33  ;;  %v8305_v13 = vld [vmem:[#allocation29_spill] sm:$0xff]  ;;  %v8306_v33 = vld [vmem:[#allocation28_spill] sm:$0xff] }
 0x4c5   : > { %4238 = vmatpush1.bf16.msra.mxu0 %v6138_v3  ;;  %v8307_v3 = vld [vmem:[#allocation31_spill] sm:$0xff] }
 0x4c6   : > { %4239 = vmatprep.subr.bf16.mxu0 %v6143_v42  ;;  %v8308_v42 = vld [vmem:[#allocation30_spill] sm:$0xff] }
 0x4c8   : > { %5324 = vmatmul.mubr.msk.bf16.gmra.mrb[24].mxu0 %vm7148_vm10, %v5323_v37  ;;  %v6167_v37 = vld [vmem:[#allocation14 + $0xc4] ss:$8 sps:$4 sm:$0xff]  }
 0x4c9   : > { %5329 = vmatprep.mubr.msk.bf16.mxu0 %vm7213_vm14, %v5328_v38  ;;  %4240 = vmatpush1.bf16.msra.mxu0 %v6141_v19  ;;  %v6171_v38 = vld [vmem:[#allocation14 + $0xe0] ss:$8 sps:$4 sm:$0xff]  }
 0x4ca   : > { %4241 = vmatprep.subr.bf16.mxu0 %v6146_v62  ;;  %v8309_v19 = vld [vmem:[#allocation33_spill] sm:$0xff]  ;;  %v8310_v62 = vld [vmem:[#allocation32_spill] sm:$0xff] }
 0x4cd   : > { %4242 = vmatpush1.bf16.msra.mxu0 %v6144_v51 }
 0x4ce   : > { %4243 = vmatprep.subr.bf16.mxu0 %v6149_v2 }
 0x4d0   : > { %5334 = vmatmul.mubr.msk.bf16.gmra.mrb[28].mxu0 %vm7213_vm14, %v8300_v35 }
 0x4d1   : > { %4244 = vmatpush1.bf16.msra.mxu0 %v6147_v47  ;;  %4263 = vmatprep.mubr.bf16.mxu0 %v7403_v48  ;;  %v6165_v48 = vld [vmem:[#allocation14 + $0xc0] ss:$8 sps:$4 sm:$0xff]  }
 0x4d2   : > { %4245 = vmatprep.subr.bf16.mxu0 %v6152_v22 }
 0x4d5   : > { %4246 = vmatpush1.bf16.msra.mxu0 %v6150_v59 }
 0x4d6   : > { %4247 = vmatprep.subr.bf16.mxu0 %v6155_v11 }
 0x4d9   : > { %4248 = vmatpush1.bf16.msra.mxu0 %v6153_v53 }
 0x4da   : > { %4249 = vmatprep.subr.bf16.mxu0 %v6158_v23 }
 0x4dd   : > { %4250 = vmatpush1.bf16.msra.mxu0 %v6156_v39 }
 0x4de   : > { %4251 = vmatprep.subr.bf16.mxu0 %v6161_v49 }
 0x4e1   : > { %4252 = vmatpush1.bf16.msra.mxu0 %v6159_v26 }
 0x4e2   : > { %4253 = vmatprep.subr.bf16.mxu0 %v6164_v29 }
 0x4e5   : > { %4254 = vmatpush1.bf16.msra.mxu0 %v6162_v50 }
 0x4e6   : > { %4255 = vmatprep.subr.bf16.mxu0 %v6167_v37 }
 0x4e9   : > { %4256 = vmatpush1.bf16.msra.mxu0 %v6165_v48 }
 0x4ea   : > { %4257 = vmatprep.subr.bf16.mxu0 %v6170_v17  ;;  %v3931_v17 = vld [vmem:[%s8311_s12] sm:$0x3] }
 0x4ed   : > { %4258 = vmatpush1.bf16.msra.mxu0 %v6168_v9  ;;  %v8312_v9 = vld [vmem:[#allocation24_spill] sm:$0xff] }
 0x4ee   : > { %4259 = vmatprep.subr.bf16.mxu0 %v6173_v21  ;;  %v8013_v21 = vrot.slane %v3931_v17, %v8312_v9 }
 0x4f1   : > { %4260 = vmatpush1.bf16.msra.mxu0 %v6171_v38  ;;  %v8313_v38 = vld [vmem:[#allocation25_spill] sm:$0xff] }
 0x4f2   : > { %4261 = vmatprep.subr.bf16.mxu0 %v6176_v63  ;;  %v8016_v63 = vrot.slane %v3931_v17, %v8313_v38 }
 0x4f5   : > { %4262 = vmatpush1.bf16.msra.mxu0 %v6174_v16 }
 0x4f6   : > { %4464 = vmatprep.subr.bf16.mxu0 %v6179_v45  ;;  %v4537_v45 = vld [vmem:[%s8314_s16] sm:$0x3] }
 0x4f8   : > { %4264 = vmatmul.mubr.bf16.vlgmr.msra.gmra.mrb[32].mxu0 %v7425_v61  ;;  %v6189_v61 = vld [vmem:[#allocation13 + $0x40] ss:$8 sps:$4 sm:$0xff]  }
 0x4f9   : > { %4465 = vmatpush1.bf16.msra.mxu0 %v6177_v27  ;;  %4273 = vmatprep.mubr.bf16.mxu0 %v7429_v41  ;;  %v6192_v41 = vld [vmem:[#allocation13 + $0x50] ss:$8 sps:$4 sm:$0xff]  }
 0x4fa   : > { %4466 = vmatprep.subr.bf16.mxu0 %v6182_v55 }
 0x4fd   : > { %4467 = vmatpush1.bf16.msra.mxu0 %v6180_v32 }
 0x4fe   : > { %4468 = vmatprep.subr.bf16.mxu0 %v6185_v7  ;;  %v8026_v7 = vrot.slane %v4537_v45, %v8312_v9 }
 0x500   : > { %4274 = vmatmul.mubr.bf16.gmra.mrb[36].mxu0 %v7477_v8  ;;  %v6195_v8 = vld [vmem:[#allocation13 + $0x60] ss:$8 sps:$4 sm:$0xff]  }
 0x501   : > { %4469 = vmatpush1.bf16.msra.mxu0 %v6183_v12  ;;  %4283 = vmatprep.mubr.bf16.mxu0 %v7489_v43  ;;  %v8303_v43 = vld [vmem:[#allocation27_spill] sm:$0xff] }
 0x502   : > { %4470 = vmatprep.subr.bf16.mxu0 %v6188_v36  ;;  %v8029_v36 = vrot.slane %v4537_v45, %v8313_v38 }
 0x505   : > { %4471 = vmatpush1.bf16.msra.mxu0 %v6186_v25 }
 0x506   : > { %4472 = vmatprep.subr.bf16.mxu0 %v6191_v34 }
 0x508   : > { %4284 = vmatmul.mubr.bf16.gmra.mrb[40].mxu0 %v7516_v44  ;;  %v6201_v44 = vld [vmem:[#allocation13 + $0x80] ss:$8 sps:$4 sm:$0xff]  }
 0x509   : > { %4473 = vmatpush1.bf16.msra.mxu0 %v6189_v61  ;;  %4293 = vmatprep.mubr.bf16.mxu0 %v8301_v10 }
 0x50a   : > { %4474 = vmatprep.subr.bf16.mxu0 %v6194_v46 }
 0x50d   : > { %4475 = vmatpush1.bf16.msra.mxu0 %v6192_v41 }
 0x50e   : > { %4476 = vmatprep.subr.bf16.mxu0 %v6197_v58 }
 0x510   : > { %4294 = vmatmul.mubr.bf16.gmra.mrb[44].mxu0 %v8302_v54 }
 0x511   : > { %4477 = vmatpush1.bf16.msra.mxu0 %v6195_v8  ;;  %4496 = vmatprep.mubr.bf16.mxu0 %v8303_v43 }
 0x512   : > { %4478 = vmatprep.subr.bf16.mxu0 %v6200_v30 }
 0x515   : > { %4479 = vmatpush1.bf16.msra.mxu0 %v6198_v24 }
 0x516   : > { %4480 = vmatprep.subr.bf16.mxu0 %v6203_v20 }
 0x519   : > { %4481 = vmatpush1.bf16.msra.mxu0 %v6201_v44 }
 0x51a   : > { %4482 = vmatprep.subr.bf16.mxu0 %v6206_v31 }
 0x51d   : > { %4483 = vmatpush1.bf16.msra.mxu0 %v6204_v0 }
 0x51e   : > { %4484 = vmatprep.subr.bf16.mxu0 %v6209_v57 }
 0x521   : > { %4485 = vmatpush1.bf16.msra.mxu0 %v6207_v52 }
 0x522   : > { %4486 = vmatprep.subr.bf16.mxu0 %v6212_v5 }
 0x525   : > { %4487 = vmatpush1.bf16.msra.mxu0 %v6210_v6 }
 0x526   : > { %4488 = vmatprep.subr.bf16.mxu0 %v6215_v15 }
 0x529   : > { %4489 = vmatpush1.bf16.msra.mxu0 %v6213_v40 }
 0x52a   : > { %4490 = vmatprep.subr.bf16.mxu0 %v6218_v28 }
 0x52d   : > { %4491 = vmatpush1.bf16.msra.mxu0 %v6216_v1 }
 0x52e   : > { %4492 = vmatprep.subr.bf16.mxu0 %v6221_v18 }
 0x531   : > { %4493 = vmatpush1.bf16.msra.mxu0 %v6219_v4 }
 0x532   : > { %4494 = vmatprep.subr.bf16.mxu0 %v6224_v56 }
 0x535   : > { %4495 = vmatpush1.bf16.msra.mxu0 %v6222_v14 }
 0x538   : > { %4497 = vmatmul.mubr.bf16.vlgmr.msra.gmra.mrb[32].mxu0 %v8304_v60 }
 0x539   : > { %4506 = vmatprep.mubr.bf16.mxu0 %v8305_v13 }
 0x540   : > { %4507 = vmatmul.mubr.bf16.gmra.mrb[36].mxu0 %v8306_v33 }
 0x541   : > { %4516 = vmatprep.mubr.bf16.mxu0 %v8307_v3 }
 0x548   : > { %4517 = vmatmul.mubr.bf16.gmra.mrb[40].mxu0 %v8308_v42 }
 0x549   : > { %4526 = vmatprep.mubr.bf16.mxu0 %v8309_v19 }
 0x550   : > { %4527 = vmatmul.mubr.bf16.gmra.mrb[44].mxu0 %v8310_v62 }
 0x58b   : > { %v3876_v51 = vpop.f32.mrb[16].mxu0 }
 0x58c   : > { %v3878_v2 = vpop.f32.mrb[17].mxu0  ;;  %v3943_v16 = vadd.f32 %v8013_v21, %v3876_v51 }
 0x58d   : > { %v3880_v47 = vpop.f32.mrb[18].mxu0  ;;  %v3944_v27 = vadd.f32 %v8016_v63, %v3878_v2 }
 0x58e   : > { %v3882_v22 = vpop.f32.mrb[19].mxu0  ;;  %v3945_v55 = vadd.f32 %v8013_v21, %v3880_v47  ;;  %v3975_v12 = vmul.f32 0.2, %v3943_v16  ;;  %vm3959_vm2 = vcmp.gt.f32.partialorder %v3943_v16, 0.0 }
 0x58f   : > { %v3946_v32 = vadd.f32 %v8016_v63, %v3882_v22  ;;  %v3976_v25 = vmul.f32 0.2, %v3944_v27  ;;  %vm3960_vm3 = vcmp.gt.f32.partialorder %v3944_v27, 0.0 }
 0x590   : > { %v3977_v34 = vmul.f32 0.2, %v3945_v55  ;;  %vm3961_vm4 = vcmp.gt.f32.partialorder %v3945_v55, 0.0  ;;  %v3991_v8 = vsel %vm3959_vm2, %v3943_v16, %v3975_v12 }
 0x591   : > { %v3978_v46 = vmul.f32 0.2, %v3946_v32  ;;  %vm3962_vm7 = vcmp.gt.f32.partialorder %v3946_v32, 0.0  ;;  %v3992_v20 = vsel %vm3960_vm3, %v3944_v27, %v3976_v25 }
 0x592   : > { %v3993_v52 = vsel %vm3961_vm4, %v3945_v55, %v3977_v34 }
 0x593   : > { %v3886_v35 = vpop.f32.mrb[20].mxu0  ;;  %v3994_v40 = vsel %vm3962_vm7, %v3946_v32, %v3978_v46 }
 0x594   : > { %v3888_v59 = vpop.f32.mrb[21].mxu0  ;;  %v3947_v58 = vadd.f32 %v8013_v21, %v3886_v35 }
 0x595   : > { %v3890_v11 = vpop.f32.mrb[22].mxu0  ;;  %v3948_v43 = vadd.f32 %v8016_v63, %v3888_v59 }
 0x596   : > { %v3892_v53 = vpop.f32.mrb[23].mxu0  ;;  %v3949_v0 = vadd.f32 %v8013_v21, %v3890_v11  ;;  %v3979_v28 = vmul.f32 0.2, %v3947_v58  ;;  %vm3963_vm10 = vcmp.gt.f32.partialorder %v3947_v58, 0.0 }
 0x597   : > { %v3950_v6 = vadd.f32 %v8016_v63, %v3892_v53  ;;  %v3980_v18 = vmul.f32 0.2, %v3948_v43  ;;  %vm3964_vm14 = vcmp.gt.f32.partialorder %v3948_v43, 0.0 }
 0x598   : > { %v3981_v4 = vmul.f32 0.2, %v3949_v0  ;;  %vm3965_vm0 = vcmp.gt.f32.partialorder %v3949_v0, 0.0  ;;  %v3995_v3 = vsel %vm3963_vm10, %v3947_v58, %v3979_v28 }
 0x599   : > { %v3982_v14 = vmul.f32 0.2, %v3950_v6  ;;  %vm3966_vm6 = vcmp.gt.f32.partialorder %v3950_v6, 0.0  ;;  %v3996_v2 = vsel %vm3964_vm14, %v3948_v43, %v3980_v18 }
 0x59a   : > { %v3997_v11 = vsel %vm3965_vm0, %v3949_v0, %v3981_v4 }
 0x59b   : > { %v3896_v23 = vpop.f32.mrb[24].mxu0  ;;  %v3998_v17 = vsel %vm3966_vm6, %v3950_v6, %v3982_v14 }
 0x59c   : > { %v7995_v39 = vpop.f32.mrb[25].mxu0  ;;  %v3951_v33 = vadd.f32 %v8013_v21, %v3896_v23 }
 0x59d   : > { %v7997_v49 = vpop.f32.mrb[26].mxu0  ;;  %v3952_v62 = vadd.f32 %v8016_v63, %v7995_v39 }
 0x59e   : > { %v7999_v26 = vpop.f32.mrb[27].mxu0  ;;  %v3953_v35 = vadd.f32 %v8013_v21, %v7997_v49  ;;  %v3983_v9 = vmul.f32 0.2, %v3951_v33  ;;  %vm3967_vm11 = vcmp.gt.f32.partialorder %v3951_v33, 0.0 }
 0x59f   : > { %v3954_v23 = vadd.f32 %v8016_v63, %v7999_v26  ;;  %v3984_v16 = vmul.f32 0.2, %v3952_v62  ;;  %vm3968_vm15 = vcmp.gt.f32.partialorder %v3952_v62, 0.0 }
 0x5a0   : > { %v3985_v49 = vmul.f32 0.2, %v3953_v35  ;;  %vm3969_vm12 = vcmp.gt.f32.partialorder %v3953_v35, 0.0  ;;  %v3999_v12 = vsel %vm3967_vm11, %v3951_v33, %v3983_v9 }
 0x5a1   : > { %v3986_v27 = vmul.f32 0.2, %v3954_v23  ;;  %vm3970_vm13 = vcmp.gt.f32.partialorder %v3954_v23, 0.0 }
 0x5a3   : > { %v8001_v29 = vpop.f32.mrb[28].mxu0 }
 0x5a4   : > { %v8003_v50 = vpop.f32.mrb[29].mxu0  ;;  %v3955_v26 = vadd.f32 %v8013_v21, %v8001_v29  ;;  %v4001_v29 = vsel %vm3969_vm12, %v3953_v35, %v3985_v49 }
 0x5a5   : > { %v8005_v37 = vpop.f32.mrb[30].mxu0 }
 0x5a6   : > { %v8007_v48 = vpop.f32.mrb[31].mxu0  ;;  %vm3971_vm1 = vcmp.gt.f32.partialorder %v3955_v26, 0.0 }
 0x5a7   : > { %v3958_v43 = vadd.f32 %v8016_v63, %v8007_v48 }
 0x5a9   : > { %v3990_v0 = vmul.f32 0.2, %v3958_v43  ;;  %vm3974_vm9 = vcmp.gt.f32.partialorder %v3958_v43, 0.0 }
 0x5ab   : > { %v4006_v14 = vsel %vm3974_vm9, %v3958_v43, %v3990_v0 }
 0x60b   : > { %v4498_v61 = vpop.f32.mrb[32].mxu0 }
 0x60c   : > { %v4549_v41 = vadd.f32 %v8026_v7, %v4498_v61  ;;  %v4500_v10 = vpop.f32.mrb[33].mxu0  ;;  %v3956_v61 = vadd.f32 %v8016_v63, %v8003_v50 }
 0x60d   : > { %v4550_v30 = vadd.f32 %v8029_v36, %v4500_v10  ;;  %v4502_v54 = vpop.f32.mrb[34].mxu0 }
 0x60e   : > { %v4565_v24 = vadd.f32 %v4549_v41, %v3991_v8  ;;  %v4551_v44 = vadd.f32 %v8026_v7, %v4502_v54  ;;  %v4504_v31 = vpop.f32.mrb[35].mxu0  ;;  %v4000_v41 = vsel %vm3968_vm15, %v3952_v62, %v3984_v16  ;;  %v3957_v8 = vadd.f32 %v8013_v21, %v8005_v37 }
 0x60f   : > { %v4566_v57 = vadd.f32 %v4550_v30, %v3992_v20  ;;  %v4552_v5 = vadd.f32 %v8029_v36, %v4504_v31  ;;  %v3987_v20 = vmul.f32 0.2, %v3955_v26  ;;  %v3988_v37 = vmul.f32 0.2, %v3956_v61 }
 0x610   : > { %4581 = vst [vmem:[%s8042_s3] sm:$0xff] %v4565_v24  ;;  %v4567_v15 = vadd.f32 %v4551_v44, %v3993_v52  ;;  %v4002_v24 = vsel %vm3970_vm13, %v3954_v23, %v3986_v27  ;;  %vm3972_vm5 = vcmp.gt.f32.partialorder %v3956_v61, 0.0  ;;  %v3989_v21 = vmul.f32 0.2, %v3957_v8 }
 0x611   : > { %4582 = vst [vmem:[%s8042_s3 + $0x8] sm:$0xff] %v4566_v57  ;;  %v4568_v1 = vadd.f32 %v4552_v5, %v3994_v40  ;;  %vm3973_vm8 = vcmp.gt.f32.partialorder %v3957_v8, 0.0  ;;  %v4003_v57 = vsel %vm3971_vm1, %v3955_v26, %v3987_v20 }
 0x612   : > { %4583 = vst [vmem:[%s8042_s3 + $0x10] sm:$0xff] %v4567_v15  ;;  %v4004_v15 = vsel %vm3972_vm5, %v3956_v61, %v3988_v37  ;;  %v4005_v18 = vsel %vm3973_vm8, %v3957_v8, %v3989_v21 }
 0x613   : > { %4584 = vst [vmem:[%s8042_s3 + $0x18] sm:$0xff] %v4568_v1  ;;  %v4508_v56 = vpop.f32.mrb[36].mxu0 }
 0x614   : > { %v4553_v60 = vadd.f32 %v8026_v7, %v4508_v56  ;;  %v4510_v13 = vpop.f32.mrb[37].mxu0 }
 0x615   : > { %v4554_v42 = vadd.f32 %v8029_v36, %v4510_v13  ;;  %v4512_v19 = vpop.f32.mrb[38].mxu0 }
 0x616   : > { %v4569_v51 = vadd.f32 %v4553_v60, %v3995_v3  ;;  %v4555_v47 = vadd.f32 %v8026_v7, %v4512_v19  ;;  %v4514_v22 = vpop.f32.mrb[39].mxu0 }
 0x617   : > { %v4570_v59 = vadd.f32 %v4554_v42, %v3996_v2  ;;  %v4556_v53 = vadd.f32 %v8029_v36, %v4514_v22 }
 0x618   : > { %4585 = vst [vmem:[%s8042_s3 + $0x20] sm:$0xff] %v4569_v51  ;;  %v4571_v39 = vadd.f32 %v4555_v47, %v3997_v11 }
 0x619   : > { %4586 = vst [vmem:[%s8042_s3 + $0x28] sm:$0xff] %v4570_v59  ;;  %v4572_v38 = vadd.f32 %v4556_v53, %v3998_v17 }
 0x61a   : > { %4587 = vst [vmem:[%s8042_s3 + $0x30] sm:$0xff] %v4571_v39 }
 0x61b   : > { %4588 = vst [vmem:[%s8042_s3 + $0x38] sm:$0xff] %v4572_v38  ;;  %v4518_v45 = vpop.f32.mrb[40].mxu0 }
 0x61c   : > { %v4557_v55 = vadd.f32 %v8026_v7, %v4518_v45  ;;  %v4520_v32 = vpop.f32.mrb[41].mxu0 }
 0x61d   : > { %v4558_v25 = vadd.f32 %v8029_v36, %v4520_v32  ;;  %v4522_v34 = vpop.f32.mrb[42].mxu0 }
 0x61e   : > { %v4573_v46 = vadd.f32 %v4557_v55, %v3999_v12  ;;  %v4559_v10 = vadd.f32 %v8026_v7, %v4522_v34  ;;  %v4524_v58 = vpop.f32.mrb[43].mxu0 }
 0x61f   : > { %v4574_v30 = vadd.f32 %v4558_v25, %v4000_v41  ;;  %v4560_v54 = vadd.f32 %v8029_v36, %v4524_v58 }
 0x620   : > { %4589 = vst [vmem:[%s8042_s3 + $0x40] sm:$0xff] %v4573_v46  ;;  %v4575_v50 = vadd.f32 %v4559_v10, %v4001_v29 }
 0x621   : > { %4590 = vst [vmem:[%s8042_s3 + $0x48] sm:$0xff] %v4574_v30  ;;  %v4576_v44 = vadd.f32 %v4560_v54, %v4002_v24 }
 0x622   : > { %4591 = vst [vmem:[%s8042_s3 + $0x50] sm:$0xff] %v4575_v50 }
 0x623   : > { %4592 = vst [vmem:[%s8042_s3 + $0x58] sm:$0xff] %v4576_v44  ;;  %v4528_v31 = vpop.f32.mrb[44].mxu0 }
 0x624   : > { %v4561_v48 = vadd.f32 %v8026_v7, %v4528_v31  ;;  %v4530_v63 = vpop.f32.mrb[45].mxu0 }
 0x625   : > { %v4562_v52 = vadd.f32 %v8029_v36, %v4530_v63  ;;  %v4532_v5 = vpop.f32.mrb[46].mxu0 }
 0x626   : > { %v4577_v6 = vadd.f32 %v4561_v48, %v4003_v57  ;;  %v4563_v40 = vadd.f32 %v8026_v7, %v4532_v5  ;;  %v4534_v28 = vpop.f32.mrb[47].mxu0 }
 0x627   : > { %v4578_v1 = vadd.f32 %v4562_v52, %v4004_v15  ;;  %v4564_v4 = vadd.f32 %v8029_v36, %v4534_v28 }
 0x628   : > { %4593 = vst [vmem:[%s8042_s3 + $0x60] sm:$0xff] %v4577_v6  ;;  %v4579_v56 = vadd.f32 %v4563_v40, %v4005_v18 }
 0x629   : > { %4594 = vst [vmem:[%s8042_s3 + $0x68] sm:$0xff] %v4578_v1  ;;  %v4580_v7 = vadd.f32 %v4564_v4, %v4006_v14 }
 0x62a   : > { %4595 = vst [vmem:[%s8042_s3 + $0x70] sm:$0xff] %v4579_v56 }
 0x62b   : > { %4596 = vst [vmem:[%s8042_s3 + $0x78] sm:$0xff] %v4580_v7 }
 0x62c   : > { %6466 = shalt.err (!%p6463_p3)
}
 0x62d   : > { %s6467_s30 = scalar_lea.hbm %s8094_s28, 2048  ;;  %s6471_s12 = scalar_lea.hbm %s8315_s27, 4096 }
 0x62e   : > { %p6468_p12 = scmp.ne.s32.totalorder %s8094_s28, %s6467_s30  ;;  %p6472_p0 = scmp.lt.u32.totalorder %s8094_s28, %s8315_s27 }
 0x62f   : > { %p6473_p6 = scmp.lt.u32.totalorder %s6471_s12, %s6467_s30  ;;  %p6475_p4 = scmp.lt.u32.totalorder %s6467_s30, %s8094_s28 }
 0x630   : > { %p6469_p1 = pnand %p6468_p12, %p8316_p10 }
 0x631   : > { %p6474_p2 = por %p6473_p6, %p6472_p0 }
 0x632   : > { %p6470_p13 = pneg %p6469_p1 }
 0x633   : > { %p6476_p5 = por %p6475_p4, %p6474_p2 }
 0x635   : > { %p6477_p7 = pnand %p6476_p5, %p6470_p13 }
 0x637   : > { %6480 = shalt.err (!%p6477_p7)
}
 0x638   : > { %s6555_s16 = smov 256   ;;  %s6556_s3 = smov 16  }
 0x639   : > { %5582 = dma.vmem_to_hbm [thread:$0]  (%p8316_p10), %s8096_s15, 2048, %s8094_s28, %s4598_s2, %s6555_s16, %s6555_s16, %s6556_s3  }
 0x63a PF: > { %s4627_s11 = sand.u32 1, %s6527_s21   ;;  %p8317_p9 = scmp.ne.s32.totalorder %s8207_s14, 0 }
 0x63b   : > { %p8318_p8 = scmp.ge.s32.totalorder %s6539_s24, 2  ;;  %s4628_s0 = scalar_lea.sflag [#allocation4], %s4627_s11 }
 0x63d   : > { %p5611_p11 = pnand %p8318_p8, %p8317_p9 }
 0x63f   : > { %6522 = dma.done.wait (!%p5611_p11), %s4628_s0, 2048  }
 0x640   : > { %6524 = vsyncadd (!%p5611_p11), %s4628_s0, 4294965248  ;;  %p31_p3 = scmp.ge.s32.totalorder %s6816_s25, 4   ;;  %s8319_s21 = smov %s6531_s22 }
 0x641   : > { %s8320_s22 = smov %s6535_s23  ;;  %s8321_s23 = smov %s6827_s10 }
 0x642   : > { %s8322_s24 = smov %s6816_s25  ;;  %33 = sbr.rel (!%p31_p3) target bundleno = 21 (0x15), region = 156 }
 0x649   :  { %4633 = vsyncpa [#allocation3], 1 }
 0x64a   :  { %4635 = vsyncpa [#allocation3 + $0x1], 1 }
 0x64b   :  { %4636 = vsyncpa [#allocation6], 1 }
 0x64c   :  { %4638 = vsyncpa [#allocation6 + $0x1], 1 }
 0x64d   :  { %4639 = vsyncpa [#allocation9], 1 }
 0x64e   :  { %4640 = vsyncpa [#allocation12], 1 }
 0x64f   :  { %4641 = vsyncpa [#allocation15], 1 }
 0x650   :  { %4642 = vsyncpa [#allocation4], 1 }
 0x651   :  { %4644 = vsyncpa [#allocation4 + $0x1], 1 }

</bundles_post_ra>
